<compile_context>
chip_gen: v7x
topology: tpu7x:2x2x1
jax: 0.10.0
libtpu: 0.0.40
codegen_flags: <defaults>
</compile_context>

<pallas_src>
import functools

import jax
import jax.numpy as jnp
from jax.experimental import pallas as pl
from jax.experimental.pallas import tpu as pltpu


def _round_up(x, m):
    return ((x + m - 1) // m) * m


def _sepconv3d_kernel(x_ref, w_ref, o_ref, *, tap_offsets, chunk):
    # x_ref: (1, Cin, Fin)  bf16  zero-padded flattened (Dp,Hp,Wp) frame, channels on sublanes
    # w_ref: (T,  Cout, Cin) bf16 fused depthwise+pointwise weight, one (Cout,Cin) slab per tap
    # o_ref: (1, Cout, Fc)  f32   output in padded-frame coordinates (wrapper crops the valid window)
    cout = o_ref.shape[1]
    fc = o_ref.shape[2]
    n_chunks = fc // chunk
    # Static loops: acc liveness is bounded by construction (one 16-vreg f32
    # accumulator per chunk, per-tap slices are consumed immediately by the MXU).
    for c in range(n_chunks):
        base = c * chunk
        acc = jnp.zeros((cout, chunk), jnp.float32)           # vreg accumulator, no VMEM scratch
        for t, ofs in enumerate(tap_offsets):                 # 27 taps, static unroll
            # Shifted-frame trick: tap (kd,kh,kw) reads frame columns [base+ofs, base+ofs+chunk).
            src = x_ref[0, :, base + ofs:base + ofs + chunk]  # (Cin, chunk) bf16, lane-dense
            acc = acc + jnp.dot(w_ref[t], src,
                                preferred_element_type=jnp.float32)
        o_ref[0, :, base:base + chunk] = acc.astype(o_ref.dtype)   # lane-dense full-width store


def separable_conv3d(x, dw_weight, pw_weight, *, stride=1, padding=0, dilation=1,
                     chunk=512):
    """Fused depthwise (groups=Cin/8) 3-D conv + 1x1x1 pointwise conv (bias=False).

    x: (N, Cin, D, H, W) f32; dw_weight: (Cin, 8, KD, KH, KW);
    pw_weight: (Cout, Cin, 1, 1, 1).  Returns (N, Cout, Dout, Hout, Wout) f32 (NCDHW).
    """
    assert stride == 1, "only stride=1 (the VoxBlock-body default) is implemented"
    # TODO(synk): stride=2 (VoxBlock downsampling tail) needs a strided column gather.
    assert chunk % 128 == 0
    N, Cin, D, H, W = x.shape
    Cout = pw_weight.shape[0]
    _, gs, KD, KH, KW = dw_weight.shape
    groups = Cin // gs
    assert groups * gs == Cin

    p, dil = padding, dilation
    Dp, Hp, Wp = D + 2 * p, H + 2 * p, W + 2 * p
    Dout = Dp - dil * (KD - 1)
    Hout = Hp - dil * (KH - 1)
    Wout = Wp - dil * (KW - 1)

    # ---- host-side weight fold: grouped depthwise x pointwise -> per-tap (Cout, Cin).
    # No (Cin x Cin) block-diagonal densification; the fused weight is the same size
    # as an ordinary dense conv weight.
    # TODO(synk): at very large Cin*Cout the fused weight should be tiled over Cout.
    dw_g = dw_weight.reshape(groups, gs, gs, KD, KH, KW).astype(jnp.float32)      # [g,ol,il,kd,kh,kw]
    pw_g = pw_weight[:, :, 0, 0, 0].reshape(Cout, groups, gs).astype(jnp.float32)  # [co,g,ol]
    fused = jnp.einsum("cgo,goidhw->dhwcgi", pw_g, dw_g)                            # [kd,kh,kw,co,g,il]
    fused = fused.reshape(KD * KH * KW, Cout, Cin).astype(jnp.bfloat16)

    # ---- flattened, zero-padded input frame: (N, Cin, Fin).
    F = Dp * Hp * Wp
    Fc = _round_up(F, chunk)                                   # frame columns computed in-kernel
    max_ofs = dil * ((KD - 1) * Hp * Wp + (KH - 1) * Wp + (KW - 1))
    Fin = _round_up(Fc + max_ofs, 128)                         # lane-aligned, covers every tap shift
    xp = jnp.pad(x, ((0, 0), (0, 0), (p, p), (p, p), (p, p)))
    x_in = jnp.pad(xp.reshape(N, Cin, F), ((0, 0), (0, 0), (0, Fin - F)))
    x_in = x_in.astype(jnp.bfloat16)

    # Flat-frame offset of each tap (kd,kh,kw).
    tap_offsets = tuple(dil * (kd * Hp * Wp + kh * Wp + kw)
                        for kd in range(KD) for kh in range(KH) for kw in range(KW))

    kernel = functools.partial(_sepconv3d_kernel, tap_offsets=tap_offsets, chunk=chunk)
    out_frame = pl.pallas_call(
        kernel,
        out_shape=jax.ShapeDtypeStruct((N, Cout, Fc), jnp.float32),
        grid_spec=pltpu.PrefetchScalarGridSpec(
            num_scalar_prefetch=0,
            grid=(N,),
            # TODO(synk): for N==1 on v7x, add a second "parallel" grid axis over frame
            # chunks so both TensorCores are used.
            in_specs=[
                pl.BlockSpec((1, Cin, Fin), lambda n: (n, 0, 0)),
                pl.BlockSpec((KD * KH * KW, Cout, Cin), lambda n: (0, 0, 0)),
            ],
            out_specs=pl.BlockSpec((1, Cout, Fc), lambda n: (n, 0, 0)),
        ),
        compiler_params=pltpu.CompilerParams(dimension_semantics=("parallel",)),
    )(x_in, fused)

    # Crop the padded-frame result to the valid output window; result is already NCDHW,
    # so no post-kernel transpose is needed.
    out = out_frame[:, :, :F].reshape(N, Cout, Dp, Hp, Wp)
    return out[:, :, :Dout, :Hout, :Wout]


if __name__ == "__main__":
    # SeparableConv3d config as used inside VoxBlock: kernel_size=3, stride=1,
    # padding=dilation=1, bias=False; in_channels must be a multiple of 8.
    N, Cin, Cout = 2, 16, 32
    D = H = W = 8
    K, pad, dil = 3, 1, 1
    gs = 8
    groups = Cin // gs

    key = jax.random.PRNGKey(0)
    kx, kdw, kpw = jax.random.split(key, 3)
    x = jax.random.normal(kx, (N, Cin, D, H, W), dtype=jnp.float32)
    # nn.Conv3d weight shapes: depthwise (Cin, Cin/groups=8, K, K, K), pointwise (Cout, Cin, 1, 1, 1)
    dw_w = 0.1 * jax.random.normal(kdw, (Cin, gs, K, K, K), dtype=jnp.float32)
    pw_w = 0.1 * jax.random.normal(kpw, (Cout, Cin, 1, 1, 1), dtype=jnp.float32)

    out = separable_conv3d(x, dw_w, pw_w, stride=1, padding=pad, dilation=dil)
    out = jax.block_until_ready(out)

    # Pure-JAX reference (grouped conv + pointwise conv), NCDHW like PyTorch.
    ref_dw = jax.lax.conv_general_dilated(
        x, dw_w, window_strides=(1, 1, 1), padding=[(pad, pad)] * 3,
        rhs_dilation=(dil, dil, dil),
        dimension_numbers=("NCDHW", "OIDHW", "NCDHW"),
        feature_group_count=groups,
        precision=jax.lax.Precision.HIGHEST)
    ref = jax.lax.conv_general_dilated(
        ref_dw, pw_w, window_strides=(1, 1, 1), padding="VALID",
        dimension_numbers=("NCDHW", "OIDHW", "NCDHW"),
        precision=jax.lax.Precision.HIGHEST)
    ref = jax.block_until_ready(ref)

    assert out.shape == ref.shape == (N, Cout, D, H, W), (out.shape, ref.shape)
    # bf16 matmul operands (f32 accumulation): rounding across the 432-term
    # contraction gives O(1e-2) absolute error at these magnitudes (outputs ~O(2));
    # any indexing / weight-fold bug would produce O(1) errors instead.
    err = float(jnp.max(jnp.abs(out - ref)))
    assert err < 5e-2, f"max abs err {err}"
    print("KERNEL_OK")
</pallas_src>

<mosaic_0001>
module attributes {stable_mosaic.version = 11 : i64} {
  func.func @_sepconv3d_kernel(%arg0: i32, %arg1: memref<1x16x1280xbf16, #tpu.memory_space<vmem>>, %arg2: memref<27x32x16xbf16, #tpu.memory_space<vmem>>, %arg3: memref<1x32x1024xf32, #tpu.memory_space<vmem>>) attributes {dimension_semantics = [#tpu.dimension_semantics<parallel>], iteration_bounds = array<i64: 2>, scalar_prefetch = 0 : i64, scratch_operands = 0 : i64, tpu.core_type = #tpu.core_type<tc>, window_params = [{transform_indices = @transform_0, window_bounds = array<i64: 1, 16, 1280>}, {pipeline_mode = #tpu.pipeline_mode<synchronous>, transform_indices = @transform_1, window_bounds = array<i64: 27, 32, 16>}, {transform_indices = @transform_2, window_bounds = array<i64: 1, 32, 1024>}]} {
    %cst = arith.constant 0.000000e+00 : f32
    %0 = vector.broadcast %cst : f32 to vector<32x512xf32>
    %c0 = arith.constant 0 : index
    %c0_0 = arith.constant 0 : index
    %c0_1 = arith.constant 0 : index
    %1 = vector.load %arg1[%c0, %c0_0, %c0_1] : memref<1x16x1280xbf16, #tpu.memory_space<vmem>>, vector<1x16x512xbf16>
    %2 = vector.shape_cast %1 : vector<1x16x512xbf16> to vector<16x512xbf16>
    %c0_2 = arith.constant 0 : index
    %c0_3 = arith.constant 0 : index
    %c0_4 = arith.constant 0 : index
    %3 = vector.load %arg2[%c0_2, %c0_3, %c0_4] : memref<27x32x16xbf16, #tpu.memory_space<vmem>>, vector<1x32x16xbf16>
    %4 = vector.shape_cast %3 : vector<1x32x16xbf16> to vector<32x16xbf16>
    %cst_5 = arith.constant dense<0.000000e+00> : vector<32x512xf32>
    %5 = tpu.matmul %4, %2, %cst_5 {dimension_numbers = #tpu.dot_dimension_numbers<[1], [0], [0], [1], [0, 0, 1, 1], [], []>} : vector<32x16xbf16>, vector<16x512xbf16>, vector<32x512xf32> -> vector<32x512xf32>
    %6 = arith.addf %0, %5 : vector<32x512xf32>
    %c0_6 = arith.constant 0 : index
    %c0_7 = arith.constant 0 : index
    %c1 = arith.constant 1 : index
    %7 = vector.load %arg1[%c0_6, %c0_7, %c1] : memref<1x16x1280xbf16, #tpu.memory_space<vmem>>, vector<1x16x512xbf16>
    %8 = vector.shape_cast %7 : vector<1x16x512xbf16> to vector<16x512xbf16>
    %c1_8 = arith.constant 1 : index
    %c0_9 = arith.constant 0 : index
    %c0_10 = arith.constant 0 : index
    %9 = vector.load %arg2[%c1_8, %c0_9, %c0_10] : memref<27x32x16xbf16, #tpu.memory_space<vmem>>, vector<1x32x16xbf16>
    %10 = vector.shape_cast %9 : vector<1x32x16xbf16> to vector<32x16xbf16>
    %cst_11 = arith.constant dense<0.000000e+00> : vector<32x512xf32>
    %11 = tpu.matmul %10, %8, %cst_11 {dimension_numbers = #tpu.dot_dimension_numbers<[1], [0], [0], [1], [0, 0, 1, 1], [], []>} : vector<32x16xbf16>, vector<16x512xbf16>, vector<32x512xf32> -> vector<32x512xf32>
    %12 = arith.addf %6, %11 : vector<32x512xf32>
    %c0_12 = arith.constant 0 : index
    %c0_13 = arith.constant 0 : index
    %c2 = arith.constant 2 : index
    %13 = vector.load %arg1[%c0_12, %c0_13, %c2] : memref<1x16x1280xbf16, #tpu.memory_space<vmem>>, vector<1x16x512xbf16>
    %14 = vector.shape_cast %13 : vector<1x16x512xbf16> to vector<16x512xbf16>
    %c2_14 = arith.constant 2 : index
    %c0_15 = arith.constant 0 : index
    %c0_16 = arith.constant 0 : index
    %15 = vector.load %arg2[%c2_14, %c0_15, %c0_16] : memref<27x32x16xbf16, #tpu.memory_space<vmem>>, vector<1x32x16xbf16>
    %16 = vector.shape_cast %15 : vector<1x32x16xbf16> to vector<32x16xbf16>
    %cst_17 = arith.constant dense<0.000000e+00> : vector<32x512xf32>
    %17 = tpu.matmul %16, %14, %cst_17 {dimension_numbers = #tpu.dot_dimension_numbers<[1], [0], [0], [1], [0, 0, 1, 1], [], []>} : vector<32x16xbf16>, vector<16x512xbf16>, vector<32x512xf32> -> vector<32x512xf32>
    %18 = arith.addf %12, %17 : vector<32x512xf32>
    %c0_18 = arith.constant 0 : index
    %c0_19 = arith.constant 0 : index
    %c10 = arith.constant 10 : index
    %19 = vector.load %arg1[%c0_18, %c0_19, %c10] : memref<1x16x1280xbf16, #tpu.memory_space<vmem>>, vector<1x16x512xbf16>
    %20 = vector.shape_cast %19 : vector<1x16x512xbf16> to vector<16x512xbf16>
    %c3 = arith.constant 3 : index
    %c0_20 = arith.constant 0 : index
    %c0_21 = arith.constant 0 : index
    %21 = vector.load %arg2[%c3, %c0_20, %c0_21] : memref<27x32x16xbf16, #tpu.memory_space<vmem>>, vector<1x32x16xbf16>
    %22 = vector.shape_cast %21 : vector<1x32x16xbf16> to vector<32x16xbf16>
    %cst_22 = arith.constant dense<0.000000e+00> : vector<32x512xf32>
    %23 = tpu.matmul %22, %20, %cst_22 {dimension_numbers = #tpu.dot_dimension_numbers<[1], [0], [0], [1], [0, 0, 1, 1], [], []>} : vector<32x16xbf16>, vector<16x512xbf16>, vector<32x512xf32> -> vector<32x512xf32>
    %24 = arith.addf %18, %23 : vector<32x512xf32>
    %c0_23 = arith.constant 0 : index
    %c0_24 = arith.constant 0 : index
    %c11 = arith.constant 11 : index
    %25 = vector.load %arg1[%c0_23, %c0_24, %c11] : memref<1x16x1280xbf16, #tpu.memory_space<vmem>>, vector<1x16x512xbf16>
    %26 = vector.shape_cast %25 : vector<1x16x512xbf16> to vector<16x512xbf16>
    %c4 = arith.constant 4 : index
    %c0_25 = arith.constant 0 : index
    %c0_26 = arith.constant 0 : index
    %27 = vector.load %arg2[%c4, %c0_25, %c0_26] : memref<27x32x16xbf16, #tpu.memory_space<vmem>>, vector<1x32x16xbf16>
    %28 = vector.shape_cast %27 : vector<1x32x16xbf16> to vector<32x16xbf16>
    %cst_27 = arith.constant dense<0.000000e+00> : vector<32x512xf32>
    %29 = tpu.matmul %28, %26, %cst_27 {dimension_numbers = #tpu.dot_dimension_numbers<[1], [0], [0], [1], [0, 0, 1, 1], [], []>} : vector<32x16xbf16>, vector<16x512xbf16>, vector<32x512xf32> -> vector<32x512xf32>
    %30 = arith.addf %24, %29 : vector<32x512xf32>
    %c0_28 = arith.constant 0 : index
    %c0_29 = arith.constant 0 : index
    %c12 = arith.constant 12 : index
    %31 = vector.load %arg1[%c0_28, %c0_29, %c12] : memref<1x16x1280xbf16, #tpu.memory_space<vmem>>, vector<1x16x512xbf16>
    %32 = vector.shape_cast %31 : vector<1x16x512xbf16> to vector<16x512xbf16>
    %c5 = arith.constant 5 : index
    %c0_30 = arith.constant 0 : index
    %c0_31 = arith.constant 0 : index
    %33 = vector.load %arg2[%c5, %c0_30, %c0_31] : memref<27x32x16xbf16, #tpu.memory_space<vmem>>, vector<1x32x16xbf16>
    %34 = vector.shape_cast %33 : vector<1x32x16xbf16> to vector<32x16xbf16>
    %cst_32 = arith.constant dense<0.000000e+00> : vector<32x512xf32>
    %35 = tpu.matmul %34, %32, %cst_32 {dimension_numbers = #tpu.dot_dimension_numbers<[1], [0], [0], [1], [0, 0, 1, 1], [], []>} : vector<32x16xbf16>, vector<16x512xbf16>, vector<32x512xf32> -> vector<32x512xf32>
    %36 = arith.addf %30, %35 : vector<32x512xf32>
    %c0_33 = arith.constant 0 : index
    %c0_34 = arith.constant 0 : index
    %c20 = arith.constant 20 : index
    %37 = vector.load %arg1[%c0_33, %c0_34, %c20] : memref<1x16x1280xbf16, #tpu.memory_space<vmem>>, vector<1x16x512xbf16>
    %38 = vector.shape_cast %37 : vector<1x16x512xbf16> to vector<16x512xbf16>
    %c6 = arith.constant 6 : index
    %c0_35 = arith.constant 0 : index
    %c0_36 = arith.constant 0 : index
    %39 = vector.load %arg2[%c6, %c0_35, %c0_36] : memref<27x32x16xbf16, #tpu.memory_space<vmem>>, vector<1x32x16xbf16>
    %40 = vector.shape_cast %39 : vector<1x32x16xbf16> to vector<32x16xbf16>
    %cst_37 = arith.constant dense<0.000000e+00> : vector<32x512xf32>
    %41 = tpu.matmul %40, %38, %cst_37 {dimension_numbers = #tpu.dot_dimension_numbers<[1], [0], [0], [1], [0, 0, 1, 1], [], []>} : vector<32x16xbf16>, vector<16x512xbf16>, vector<32x512xf32> -> vector<32x512xf32>
    %42 = arith.addf %36, %41 : vector<32x512xf32>
    %c0_38 = arith.constant 0 : index
    %c0_39 = arith.constant 0 : index
    %c21 = arith.constant 21 : index
    %43 = vector.load %arg1[%c0_38, %c0_39, %c21] : memref<1x16x1280xbf16, #tpu.memory_space<vmem>>, vector<1x16x512xbf16>
    %44 = vector.shape_cast %43 : vector<1x16x512xbf16> to vector<16x512xbf16>
    %c7 = arith.constant 7 : index
    %c0_40 = arith.constant 0 : index
    %c0_41 = arith.constant 0 : index
    %45 = vector.load %arg2[%c7, %c0_40, %c0_41] : memref<27x32x16xbf16, #tpu.memory_space<vmem>>, vector<1x32x16xbf16>
    %46 = vector.shape_cast %45 : vector<1x32x16xbf16> to vector<32x16xbf16>
    %cst_42 = arith.constant dense<0.000000e+00> : vector<32x512xf32>
    %47 = tpu.matmul %46, %44, %cst_42 {dimension_numbers = #tpu.dot_dimension_numbers<[1], [0], [0], [1], [0, 0, 1, 1], [], []>} : vector<32x16xbf16>, vector<16x512xbf16>, vector<32x512xf32> -> vector<32x512xf32>
    %48 = arith.addf %42, %47 : vector<32x512xf32>
    %c0_43 = arith.constant 0 : index
    %c0_44 = arith.constant 0 : index
    %c22 = arith.constant 22 : index
    %49 = vector.load %arg1[%c0_43, %c0_44, %c22] : memref<1x16x1280xbf16, #tpu.memory_space<vmem>>, vector<1x16x512xbf16>
    %50 = vector.shape_cast %49 : vector<1x16x512xbf16> to vector<16x512xbf16>
    %c8 = arith.constant 8 : index
    %c0_45 = arith.constant 0 : index
    %c0_46 = arith.constant 0 : index
    %51 = vector.load %arg2[%c8, %c0_45, %c0_46] : memref<27x32x16xbf16, #tpu.memory_space<vmem>>, vector<1x32x16xbf16>
    %52 = vector.shape_cast %51 : vector<1x32x16xbf16> to vector<32x16xbf16>
    %cst_47 = arith.constant dense<0.000000e+00> : vector<32x512xf32>
    %53 = tpu.matmul %52, %50, %cst_47 {dimension_numbers = #tpu.dot_dimension_numbers<[1], [0], [0], [1], [0, 0, 1, 1], [], []>} : vector<32x16xbf16>, vector<16x512xbf16>, vector<32x512xf32> -> vector<32x512xf32>
    %54 = arith.addf %48, %53 : vector<32x512xf32>
    %c0_48 = arith.constant 0 : index
    %c0_49 = arith.constant 0 : index
    %c100 = arith.constant 100 : index
    %55 = vector.load %arg1[%c0_48, %c0_49, %c100] : memref<1x16x1280xbf16, #tpu.memory_space<vmem>>, vector<1x16x512xbf16>
    %56 = vector.shape_cast %55 : vector<1x16x512xbf16> to vector<16x512xbf16>
    %c9 = arith.constant 9 : index
    %c0_50 = arith.constant 0 : index
    %c0_51 = arith.constant 0 : index
    %57 = vector.load %arg2[%c9, %c0_50, %c0_51] : memref<27x32x16xbf16, #tpu.memory_space<vmem>>, vector<1x32x16xbf16>
    %58 = vector.shape_cast %57 : vector<1x32x16xbf16> to vector<32x16xbf16>
    %cst_52 = arith.constant dense<0.000000e+00> : vector<32x512xf32>
    %59 = tpu.matmul %58, %56, %cst_52 {dimension_numbers = #tpu.dot_dimension_numbers<[1], [0], [0], [1], [0, 0, 1, 1], [], []>} : vector<32x16xbf16>, vector<16x512xbf16>, vector<32x512xf32> -> vector<32x512xf32>
    %60 = arith.addf %54, %59 : vector<32x512xf32>
    %c0_53 = arith.constant 0 : index
    %c0_54 = arith.constant 0 : index
    %c101 = arith.constant 101 : index
    %61 = vector.load %arg1[%c0_53, %c0_54, %c101] : memref<1x16x1280xbf16, #tpu.memory_space<vmem>>, vector<1x16x512xbf16>
    %62 = vector.shape_cast %61 : vector<1x16x512xbf16> to vector<16x512xbf16>
    %c10_55 = arith.constant 10 : index
    %c0_56 = arith.constant 0 : index
    %c0_57 = arith.constant 0 : index
    %63 = vector.load %arg2[%c10_55, %c0_56, %c0_57] : memref<27x32x16xbf16, #tpu.memory_space<vmem>>, vector<1x32x16xbf16>
    %64 = vector.shape_cast %63 : vector<1x32x16xbf16> to vector<32x16xbf16>
    %cst_58 = arith.constant dense<0.000000e+00> : vector<32x512xf32>
    %65 = tpu.matmul %64, %62, %cst_58 {dimension_numbers = #tpu.dot_dimension_numbers<[1], [0], [0], [1], [0, 0, 1, 1], [], []>} : vector<32x16xbf16>, vector<16x512xbf16>, vector<32x512xf32> -> vector<32x512xf32>
    %66 = arith.addf %60, %65 : vector<32x512xf32>
    %c0_59 = arith.constant 0 : index
    %c0_60 = arith.constant 0 : index
    %c102 = arith.constant 102 : index
    %67 = vector.load %arg1[%c0_59, %c0_60, %c102] : memref<1x16x1280xbf16, #tpu.memory_space<vmem>>, vector<1x16x512xbf16>
    %68 = vector.shape_cast %67 : vector<1x16x512xbf16> to vector<16x512xbf16>
    %c11_61 = arith.constant 11 : index
    %c0_62 = arith.constant 0 : index
    %c0_63 = arith.constant 0 : index
    %69 = vector.load %arg2[%c11_61, %c0_62, %c0_63] : memref<27x32x16xbf16, #tpu.memory_space<vmem>>, vector<1x32x16xbf16>
    %70 = vector.shape_cast %69 : vector<1x32x16xbf16> to vector<32x16xbf16>
    %cst_64 = arith.constant dense<0.000000e+00> : vector<32x512xf32>
    %71 = tpu.matmul %70, %68, %cst_64 {dimension_numbers = #tpu.dot_dimension_numbers<[1], [0], [0], [1], [0, 0, 1, 1], [], []>} : vector<32x16xbf16>, vector<16x512xbf16>, vector<32x512xf32> -> vector<32x512xf32>
    %72 = arith.addf %66, %71 : vector<32x512xf32>
    %c0_65 = arith.constant 0 : index
    %c0_66 = arith.constant 0 : index
    %c110 = arith.constant 110 : index
    %73 = vector.load %arg1[%c0_65, %c0_66, %c110] : memref<1x16x1280xbf16, #tpu.memory_space<vmem>>, vector<1x16x512xbf16>
    %74 = vector.shape_cast %73 : vector<1x16x512xbf16> to vector<16x512xbf16>
    %c12_67 = arith.constant 12 : index
    %c0_68 = arith.constant 0 : index
    %c0_69 = arith.constant 0 : index
    %75 = vector.load %arg2[%c12_67, %c0_68, %c0_69] : memref<27x32x16xbf16, #tpu.memory_space<vmem>>, vector<1x32x16xbf16>
    %76 = vector.shape_cast %75 : vector<1x32x16xbf16> to vector<32x16xbf16>
    %cst_70 = arith.constant dense<0.000000e+00> : vector<32x512xf32>
    %77 = tpu.matmul %76, %74, %cst_70 {dimension_numbers = #tpu.dot_dimension_numbers<[1], [0], [0], [1], [0, 0, 1, 1], [], []>} : vector<32x16xbf16>, vector<16x512xbf16>, vector<32x512xf32> -> vector<32x512xf32>
    %78 = arith.addf %72, %77 : vector<32x512xf32>
    %c0_71 = arith.constant 0 : index
    %c0_72 = arith.constant 0 : index
    %c111 = arith.constant 111 : index
    %79 = vector.load %arg1[%c0_71, %c0_72, %c111] : memref<1x16x1280xbf16, #tpu.memory_space<vmem>>, vector<1x16x512xbf16>
    %80 = vector.shape_cast %79 : vector<1x16x512xbf16> to vector<16x512xbf16>
    %c13 = arith.constant 13 : index
    %c0_73 = arith.constant 0 : index
    %c0_74 = arith.constant 0 : index
    %81 = vector.load %arg2[%c13, %c0_73, %c0_74] : memref<27x32x16xbf16, #tpu.memory_space<vmem>>, vector<1x32x16xbf16>
    %82 = vector.shape_cast %81 : vector<1x32x16xbf16> to vector<32x16xbf16>
    %cst_75 = arith.constant dense<0.000000e+00> : vector<32x512xf32>
    %83 = tpu.matmul %82, %80, %cst_75 {dimension_numbers = #tpu.dot_dimension_numbers<[1], [0], [0], [1], [0, 0, 1, 1], [], []>} : vector<32x16xbf16>, vector<16x512xbf16>, vector<32x512xf32> -> vector<32x512xf32>
    %84 = arith.addf %78, %83 : vector<32x512xf32>
    %c0_76 = arith.constant 0 : index
    %c0_77 = arith.constant 0 : index
    %c112 = arith.constant 112 : index
    %85 = vector.load %arg1[%c0_76, %c0_77, %c112] : memref<1x16x1280xbf16, #tpu.memory_space<vmem>>, vector<1x16x512xbf16>
    %86 = vector.shape_cast %85 : vector<1x16x512xbf16> to vector<16x512xbf16>
    %c14 = arith.constant 14 : index
    %c0_78 = arith.constant 0 : index
    %c0_79 = arith.constant 0 : index
    %87 = vector.load %arg2[%c14, %c0_78, %c0_79] : memref<27x32x16xbf16, #tpu.memory_space<vmem>>, vector<1x32x16xbf16>
    %88 = vector.shape_cast %87 : vector<1x32x16xbf16> to vector<32x16xbf16>
    %cst_80 = arith.constant dense<0.000000e+00> : vector<32x512xf32>
    %89 = tpu.matmul %88, %86, %cst_80 {dimension_numbers = #tpu.dot_dimension_numbers<[1], [0], [0], [1], [0, 0, 1, 1], [], []>} : vector<32x16xbf16>, vector<16x512xbf16>, vector<32x512xf32> -> vector<32x512xf32>
    %90 = arith.addf %84, %89 : vector<32x512xf32>
    %c0_81 = arith.constant 0 : index
    %c0_82 = arith.constant 0 : index
    %c120 = arith.constant 120 : index
    %91 = vector.load %arg1[%c0_81, %c0_82, %c120] : memref<1x16x1280xbf16, #tpu.memory_space<vmem>>, vector<1x16x512xbf16>
    %92 = vector.shape_cast %91 : vector<1x16x512xbf16> to vector<16x512xbf16>
    %c15 = arith.constant 15 : index
    %c0_83 = arith.constant 0 : index
    %c0_84 = arith.constant 0 : index
    %93 = vector.load %arg2[%c15, %c0_83, %c0_84] : memref<27x32x16xbf16, #tpu.memory_space<vmem>>, vector<1x32x16xbf16>
    %94 = vector.shape_cast %93 : vector<1x32x16xbf16> to vector<32x16xbf16>
    %cst_85 = arith.constant dense<0.000000e+00> : vector<32x512xf32>
    %95 = tpu.matmul %94, %92, %cst_85 {dimension_numbers = #tpu.dot_dimension_numbers<[1], [0], [0], [1], [0, 0, 1, 1], [], []>} : vector<32x16xbf16>, vector<16x512xbf16>, vector<32x512xf32> -> vector<32x512xf32>
    %96 = arith.addf %90, %95 : vector<32x512xf32>
    %c0_86 = arith.constant 0 : index
    %c0_87 = arith.constant 0 : index
    %c121 = arith.constant 121 : index
    %97 = vector.load %arg1[%c0_86, %c0_87, %c121] : memref<1x16x1280xbf16, #tpu.memory_space<vmem>>, vector<1x16x512xbf16>
    %98 = vector.shape_cast %97 : vector<1x16x512xbf16> to vector<16x512xbf16>
    %c16 = arith.constant 16 : index
    %c0_88 = arith.constant 0 : index
    %c0_89 = arith.constant 0 : index
    %99 = vector.load %arg2[%c16, %c0_88, %c0_89] : memref<27x32x16xbf16, #tpu.memory_space<vmem>>, vector<1x32x16xbf16>
    %100 = vector.shape_cast %99 : vector<1x32x16xbf16> to vector<32x16xbf16>
    %cst_90 = arith.constant dense<0.000000e+00> : vector<32x512xf32>
    %101 = tpu.matmul %100, %98, %cst_90 {dimension_numbers = #tpu.dot_dimension_numbers<[1], [0], [0], [1], [0, 0, 1, 1], [], []>} : vector<32x16xbf16>, vector<16x512xbf16>, vector<32x512xf32> -> vector<32x512xf32>
    %102 = arith.addf %96, %101 : vector<32x512xf32>
    %c0_91 = arith.constant 0 : index
    %c0_92 = arith.constant 0 : index
    %c122 = arith.constant 122 : index
    %103 = vector.load %arg1[%c0_91, %c0_92, %c122] : memref<1x16x1280xbf16, #tpu.memory_space<vmem>>, vector<1x16x512xbf16>
    %104 = vector.shape_cast %103 : vector<1x16x512xbf16> to vector<16x512xbf16>
    %c17 = arith.constant 17 : index
    %c0_93 = arith.constant 0 : index
    %c0_94 = arith.constant 0 : index
    %105 = vector.load %arg2[%c17, %c0_93, %c0_94] : memref<27x32x16xbf16, #tpu.memory_space<vmem>>, vector<1x32x16xbf16>
    %106 = vector.shape_cast %105 : vector<1x32x16xbf16> to vector<32x16xbf16>
    %cst_95 = arith.constant dense<0.000000e+00> : vector<32x512xf32>
    %107 = tpu.matmul %106, %104, %cst_95 {dimension_numbers = #tpu.dot_dimension_numbers<[1], [0], [0], [1], [0, 0, 1, 1], [], []>} : vector<32x16xbf16>, vector<16x512xbf16>, vector<32x512xf32> -> vector<32x512xf32>
    %108 = arith.addf %102, %107 : vector<32x512xf32>
    %c0_96 = arith.constant 0 : index
    %c0_97 = arith.constant 0 : index
    %c200 = arith.constant 200 : index
    %109 = vector.load %arg1[%c0_96, %c0_97, %c200] : memref<1x16x1280xbf16, #tpu.memory_space<vmem>>, vector<1x16x512xbf16>
    %110 = vector.shape_cast %109 : vector<1x16x512xbf16> to vector<16x512xbf16>
    %c18 = arith.constant 18 : index
    %c0_98 = arith.constant 0 : index
    %c0_99 = arith.constant 0 : index
    %111 = vector.load %arg2[%c18, %c0_98, %c0_99] : memref<27x32x16xbf16, #tpu.memory_space<vmem>>, vector<1x32x16xbf16>
    %112 = vector.shape_cast %111 : vector<1x32x16xbf16> to vector<32x16xbf16>
    %cst_100 = arith.constant dense<0.000000e+00> : vector<32x512xf32>
    %113 = tpu.matmul %112, %110, %cst_100 {dimension_numbers = #tpu.dot_dimension_numbers<[1], [0], [0], [1], [0, 0, 1, 1], [], []>} : vector<32x16xbf16>, vector<16x512xbf16>, vector<32x512xf32> -> vector<32x512xf32>
    %114 = arith.addf %108, %113 : vector<32x512xf32>
    %c0_101 = arith.constant 0 : index
    %c0_102 = arith.constant 0 : index
    %c201 = arith.constant 201 : index
    %115 = vector.load %arg1[%c0_101, %c0_102, %c201] : memref<1x16x1280xbf16, #tpu.memory_space<vmem>>, vector<1x16x512xbf16>
    %116 = vector.shape_cast %115 : vector<1x16x512xbf16> to vector<16x512xbf16>
    %c19 = arith.constant 19 : index
    %c0_103 = arith.constant 0 : index
    %c0_104 = arith.constant 0 : index
    %117 = vector.load %arg2[%c19, %c0_103, %c0_104] : memref<27x32x16xbf16, #tpu.memory_space<vmem>>, vector<1x32x16xbf16>
    %118 = vector.shape_cast %117 : vector<1x32x16xbf16> to vector<32x16xbf16>
    %cst_105 = arith.constant dense<0.000000e+00> : vector<32x512xf32>
    %119 = tpu.matmul %118, %116, %cst_105 {dimension_numbers = #tpu.dot_dimension_numbers<[1], [0], [0], [1], [0, 0, 1, 1], [], []>} : vector<32x16xbf16>, vector<16x512xbf16>, vector<32x512xf32> -> vector<32x512xf32>
    %120 = arith.addf %114, %119 : vector<32x512xf32>
    %c0_106 = arith.constant 0 : index
    %c0_107 = arith.constant 0 : index
    %c202 = arith.constant 202 : index
    %121 = vector.load %arg1[%c0_106, %c0_107, %c202] : memref<1x16x1280xbf16, #tpu.memory_space<vmem>>, vector<1x16x512xbf16>
    %122 = vector.shape_cast %121 : vector<1x16x512xbf16> to vector<16x512xbf16>
    %c20_108 = arith.constant 20 : index
    %c0_109 = arith.constant 0 : index
    %c0_110 = arith.constant 0 : index
    %123 = vector.load %arg2[%c20_108, %c0_109, %c0_110] : memref<27x32x16xbf16, #tpu.memory_space<vmem>>, vector<1x32x16xbf16>
    %124 = vector.shape_cast %123 : vector<1x32x16xbf16> to vector<32x16xbf16>
    %cst_111 = arith.constant dense<0.000000e+00> : vector<32x512xf32>
    %125 = tpu.matmul %124, %122, %cst_111 {dimension_numbers = #tpu.dot_dimension_numbers<[1], [0], [0], [1], [0, 0, 1, 1], [], []>} : vector<32x16xbf16>, vector<16x512xbf16>, vector<32x512xf32> -> vector<32x512xf32>
    %126 = arith.addf %120, %125 : vector<32x512xf32>
    %c0_112 = arith.constant 0 : index
    %c0_113 = arith.constant 0 : index
    %c210 = arith.constant 210 : index
    %127 = vector.load %arg1[%c0_112, %c0_113, %c210] : memref<1x16x1280xbf16, #tpu.memory_space<vmem>>, vector<1x16x512xbf16>
    %128 = vector.shape_cast %127 : vector<1x16x512xbf16> to vector<16x512xbf16>
    %c21_114 = arith.constant 21 : index
    %c0_115 = arith.constant 0 : index
    %c0_116 = arith.constant 0 : index
    %129 = vector.load %arg2[%c21_114, %c0_115, %c0_116] : memref<27x32x16xbf16, #tpu.memory_space<vmem>>, vector<1x32x16xbf16>
    %130 = vector.shape_cast %129 : vector<1x32x16xbf16> to vector<32x16xbf16>
    %cst_117 = arith.constant dense<0.000000e+00> : vector<32x512xf32>
    %131 = tpu.matmul %130, %128, %cst_117 {dimension_numbers = #tpu.dot_dimension_numbers<[1], [0], [0], [1], [0, 0, 1, 1], [], []>} : vector<32x16xbf16>, vector<16x512xbf16>, vector<32x512xf32> -> vector<32x512xf32>
    %132 = arith.addf %126, %131 : vector<32x512xf32>
    %c0_118 = arith.constant 0 : index
    %c0_119 = arith.constant 0 : index
    %c211 = arith.constant 211 : index
    %133 = vector.load %arg1[%c0_118, %c0_119, %c211] : memref<1x16x1280xbf16, #tpu.memory_space<vmem>>, vector<1x16x512xbf16>
    %134 = vector.shape_cast %133 : vector<1x16x512xbf16> to vector<16x512xbf16>
    %c22_120 = arith.constant 22 : index
    %c0_121 = arith.constant 0 : index
    %c0_122 = arith.constant 0 : index
    %135 = vector.load %arg2[%c22_120, %c0_121, %c0_122] : memref<27x32x16xbf16, #tpu.memory_space<vmem>>, vector<1x32x16xbf16>
    %136 = vector.shape_cast %135 : vector<1x32x16xbf16> to vector<32x16xbf16>
    %cst_123 = arith.constant dense<0.000000e+00> : vector<32x512xf32>
    %137 = tpu.matmul %136, %134, %cst_123 {dimension_numbers = #tpu.dot_dimension_numbers<[1], [0], [0], [1], [0, 0, 1, 1], [], []>} : vector<32x16xbf16>, vector<16x512xbf16>, vector<32x512xf32> -> vector<32x512xf32>
    %138 = arith.addf %132, %137 : vector<32x512xf32>
    %c0_124 = arith.constant 0 : index
    %c0_125 = arith.constant 0 : index
    %c212 = arith.constant 212 : index
    %139 = vector.load %arg1[%c0_124, %c0_125, %c212] : memref<1x16x1280xbf16, #tpu.memory_space<vmem>>, vector<1x16x512xbf16>
    %140 = vector.shape_cast %139 : vector<1x16x512xbf16> to vector<16x512xbf16>
    %c23 = arith.constant 23 : index
    %c0_126 = arith.constant 0 : index
    %c0_127 = arith.constant 0 : index
    %141 = vector.load %arg2[%c23, %c0_126, %c0_127] : memref<27x32x16xbf16, #tpu.memory_space<vmem>>, vector<1x32x16xbf16>
    %142 = vector.shape_cast %141 : vector<1x32x16xbf16> to vector<32x16xbf16>
    %cst_128 = arith.constant dense<0.000000e+00> : vector<32x512xf32>
    %143 = tpu.matmul %142, %140, %cst_128 {dimension_numbers = #tpu.dot_dimension_numbers<[1], [0], [0], [1], [0, 0, 1, 1], [], []>} : vector<32x16xbf16>, vector<16x512xbf16>, vector<32x512xf32> -> vector<32x512xf32>
    %144 = arith.addf %138, %143 : vector<32x512xf32>
    %c0_129 = arith.constant 0 : index
    %c0_130 = arith.constant 0 : index
    %c220 = arith.constant 220 : index
    %145 = vector.load %arg1[%c0_129, %c0_130, %c220] : memref<1x16x1280xbf16, #tpu.memory_space<vmem>>, vector<1x16x512xbf16>
    %146 = vector.shape_cast %145 : vector<1x16x512xbf16> to vector<16x512xbf16>
    %c24 = arith.constant 24 : index
    %c0_131 = arith.constant 0 : index
    %c0_132 = arith.constant 0 : index
    %147 = vector.load %arg2[%c24, %c0_131, %c0_132] : memref<27x32x16xbf16, #tpu.memory_space<vmem>>, vector<1x32x16xbf16>
    %148 = vector.shape_cast %147 : vector<1x32x16xbf16> to vector<32x16xbf16>
    %cst_133 = arith.constant dense<0.000000e+00> : vector<32x512xf32>
    %149 = tpu.matmul %148, %146, %cst_133 {dimension_numbers = #tpu.dot_dimension_numbers<[1], [0], [0], [1], [0, 0, 1, 1], [], []>} : vector<32x16xbf16>, vector<16x512xbf16>, vector<32x512xf32> -> vector<32x512xf32>
    %150 = arith.addf %144, %149 : vector<32x512xf32>
    %c0_134 = arith.constant 0 : index
    %c0_135 = arith.constant 0 : index
    %c221 = arith.constant 221 : index
    %151 = vector.load %arg1[%c0_134, %c0_135, %c221] : memref<1x16x1280xbf16, #tpu.memory_space<vmem>>, vector<1x16x512xbf16>
    %152 = vector.shape_cast %151 : vector<1x16x512xbf16> to vector<16x512xbf16>
    %c25 = arith.constant 25 : index
    %c0_136 = arith.constant 0 : index
    %c0_137 = arith.constant 0 : index
    %153 = vector.load %arg2[%c25, %c0_136, %c0_137] : memref<27x32x16xbf16, #tpu.memory_space<vmem>>, vector<1x32x16xbf16>
    %154 = vector.shape_cast %153 : vector<1x32x16xbf16> to vector<32x16xbf16>
    %cst_138 = arith.constant dense<0.000000e+00> : vector<32x512xf32>
    %155 = tpu.matmul %154, %152, %cst_138 {dimension_numbers = #tpu.dot_dimension_numbers<[1], [0], [0], [1], [0, 0, 1, 1], [], []>} : vector<32x16xbf16>, vector<16x512xbf16>, vector<32x512xf32> -> vector<32x512xf32>
    %156 = arith.addf %150, %155 : vector<32x512xf32>
    %c0_139 = arith.constant 0 : index
    %c0_140 = arith.constant 0 : index
    %c222 = arith.constant 222 : index
    %157 = vector.load %arg1[%c0_139, %c0_140, %c222] : memref<1x16x1280xbf16, #tpu.memory_space<vmem>>, vector<1x16x512xbf16>
    %158 = vector.shape_cast %157 : vector<1x16x512xbf16> to vector<16x512xbf16>
    %c26 = arith.constant 26 : index
    %c0_141 = arith.constant 0 : index
    %c0_142 = arith.constant 0 : index
    %159 = vector.load %arg2[%c26, %c0_141, %c0_142] : memref<27x32x16xbf16, #tpu.memory_space<vmem>>, vector<1x32x16xbf16>
    %160 = vector.shape_cast %159 : vector<1x32x16xbf16> to vector<32x16xbf16>
    %cst_143 = arith.constant dense<0.000000e+00> : vector<32x512xf32>
    %161 = tpu.matmul %160, %158, %cst_143 {dimension_numbers = #tpu.dot_dimension_numbers<[1], [0], [0], [1], [0, 0, 1, 1], [], []>} : vector<32x16xbf16>, vector<16x512xbf16>, vector<32x512xf32> -> vector<32x512xf32>
    %162 = arith.addf %156, %161 : vector<32x512xf32>
    %c0_144 = arith.constant 0 : index
    %c0_145 = arith.constant 0 : index
    %c0_146 = arith.constant 0 : index
    %163 = vector.load %arg3[%c0_144, %c0_145, %c0_146] : memref<1x32x1024xf32, #tpu.memory_space<vmem>>, vector<1x32x512xf32>
    %164 = vector.shape_cast %163 : vector<1x32x512xf32> to vector<32x512xf32>
    %165 = vector.shape_cast %162 : vector<32x512xf32> to vector<1x32x512xf32>
    tpu.vector_store %arg3[%c0_144, %c0_145, %c0_146], %165 {strides = array<i32>} : memref<1x32x1024xf32, #tpu.memory_space<vmem>>, vector<1x32x512xf32>,
    %cst_147 = arith.constant 0.000000e+00 : f32
    %166 = vector.broadcast %cst_147 : f32 to vector<32x512xf32>
    %c0_148 = arith.constant 0 : index
    %c0_149 = arith.constant 0 : index
    %c512 = arith.constant 512 : index
    %167 = vector.load %arg1[%c0_148, %c0_149, %c512] : memref<1x16x1280xbf16, #tpu.memory_space<vmem>>, vector<1x16x512xbf16>
    %168 = vector.shape_cast %167 : vector<1x16x512xbf16> to vector<16x512xbf16>
    %c0_150 = arith.constant 0 : index
    %c0_151 = arith.constant 0 : index
    %c0_152 = arith.constant 0 : index
    %169 = vector.load %arg2[%c0_150, %c0_151, %c0_152] : memref<27x32x16xbf16, #tpu.memory_space<vmem>>, vector<1x32x16xbf16>
    %170 = vector.shape_cast %169 : vector<1x32x16xbf16> to vector<32x16xbf16>
    %cst_153 = arith.constant dense<0.000000e+00> : vector<32x512xf32>
    %171 = tpu.matmul %170, %168, %cst_153 {dimension_numbers = #tpu.dot_dimension_numbers<[1], [0], [0], [1], [0, 0, 1, 1], [], []>} : vector<32x16xbf16>, vector<16x512xbf16>, vector<32x512xf32> -> vector<32x512xf32>
    %172 = arith.addf %166, %171 : vector<32x512xf32>
    %c0_154 = arith.constant 0 : index
    %c0_155 = arith.constant 0 : index
    %c513 = arith.constant 513 : index
    %173 = vector.load %arg1[%c0_154, %c0_155, %c513] : memref<1x16x1280xbf16, #tpu.memory_space<vmem>>, vector<1x16x512xbf16>
    %174 = vector.shape_cast %173 : vector<1x16x512xbf16> to vector<16x512xbf16>
    %c1_156 = arith.constant 1 : index
    %c0_157 = arith.constant 0 : index
    %c0_158 = arith.constant 0 : index
    %175 = vector.load %arg2[%c1_156, %c0_157, %c0_158] : memref<27x32x16xbf16, #tpu.memory_space<vmem>>, vector<1x32x16xbf16>
    %176 = vector.shape_cast %175 : vector<1x32x16xbf16> to vector<32x16xbf16>
    %cst_159 = arith.constant dense<0.000000e+00> : vector<32x512xf32>
    %177 = tpu.matmul %176, %174, %cst_159 {dimension_numbers = #tpu.dot_dimension_numbers<[1], [0], [0], [1], [0, 0, 1, 1], [], []>} : vector<32x16xbf16>, vector<16x512xbf16>, vector<32x512xf32> -> vector<32x512xf32>
    %178 = arith.addf %172, %177 : vector<32x512xf32>
    %c0_160 = arith.constant 0 : index
    %c0_161 = arith.constant 0 : index
    %c514 = arith.constant 514 : index
    %179 = vector.load %arg1[%c0_160, %c0_161, %c514] : memref<1x16x1280xbf16, #tpu.memory_space<vmem>>, vector<1x16x512xbf16>
    %180 = vector.shape_cast %179 : vector<1x16x512xbf16> to vector<16x512xbf16>
    %c2_162 = arith.constant 2 : index
    %c0_163 = arith.constant 0 : index
    %c0_164 = arith.constant 0 : index
    %181 = vector.load %arg2[%c2_162, %c0_163, %c0_164] : memref<27x32x16xbf16, #tpu.memory_space<vmem>>, vector<1x32x16xbf16>
    %182 = vector.shape_cast %181 : vector<1x32x16xbf16> to vector<32x16xbf16>
    %cst_165 = arith.constant dense<0.000000e+00> : vector<32x512xf32>
    %183 = tpu.matmul %182, %180, %cst_165 {dimension_numbers = #tpu.dot_dimension_numbers<[1], [0], [0], [1], [0, 0, 1, 1], [], []>} : vector<32x16xbf16>, vector<16x512xbf16>, vector<32x512xf32> -> vector<32x512xf32>
    %184 = arith.addf %178, %183 : vector<32x512xf32>
    %c0_166 = arith.constant 0 : index
    %c0_167 = arith.constant 0 : index
    %c522 = arith.constant 522 : index
    %185 = vector.load %arg1[%c0_166, %c0_167, %c522] : memref<1x16x1280xbf16, #tpu.memory_space<vmem>>, vector<1x16x512xbf16>
    %186 = vector.shape_cast %185 : vector<1x16x512xbf16> to vector<16x512xbf16>
    %c3_168 = arith.constant 3 : index
    %c0_169 = arith.constant 0 : index
    %c0_170 = arith.constant 0 : index
    %187 = vector.load %arg2[%c3_168, %c0_169, %c0_170] : memref<27x32x16xbf16, #tpu.memory_space<vmem>>, vector<1x32x16xbf16>
    %188 = vector.shape_cast %187 : vector<1x32x16xbf16> to vector<32x16xbf16>
    %cst_171 = arith.constant dense<0.000000e+00> : vector<32x512xf32>
    %189 = tpu.matmul %188, %186, %cst_171 {dimension_numbers = #tpu.dot_dimension_numbers<[1], [0], [0], [1], [0, 0, 1, 1], [], []>} : vector<32x16xbf16>, vector<16x512xbf16>, vector<32x512xf32> -> vector<32x512xf32>
    %190 = arith.addf %184, %189 : vector<32x512xf32>
    %c0_172 = arith.constant 0 : index
    %c0_173 = arith.constant 0 : index
    %c523 = arith.constant 523 : index
    %191 = vector.load %arg1[%c0_172, %c0_173, %c523] : memref<1x16x1280xbf16, #tpu.memory_space<vmem>>, vector<1x16x512xbf16>
    %192 = vector.shape_cast %191 : vector<1x16x512xbf16> to vector<16x512xbf16>
    %c4_174 = arith.constant 4 : index
    %c0_175 = arith.constant 0 : index
    %c0_176 = arith.constant 0 : index
    %193 = vector.load %arg2[%c4_174, %c0_175, %c0_176] : memref<27x32x16xbf16, #tpu.memory_space<vmem>>, vector<1x32x16xbf16>
    %194 = vector.shape_cast %193 : vector<1x32x16xbf16> to vector<32x16xbf16>
    %cst_177 = arith.constant dense<0.000000e+00> : vector<32x512xf32>
    %195 = tpu.matmul %194, %192, %cst_177 {dimension_numbers = #tpu.dot_dimension_numbers<[1], [0], [0], [1], [0, 0, 1, 1], [], []>} : vector<32x16xbf16>, vector<16x512xbf16>, vector<32x512xf32> -> vector<32x512xf32>
    %196 = arith.addf %190, %195 : vector<32x512xf32>
    %c0_178 = arith.constant 0 : index
    %c0_179 = arith.constant 0 : index
    %c524 = arith.constant 524 : index
    %197 = vector.load %arg1[%c0_178, %c0_179, %c524] : memref<1x16x1280xbf16, #tpu.memory_space<vmem>>, vector<1x16x512xbf16>
    %198 = vector.shape_cast %197 : vector<1x16x512xbf16> to vector<16x512xbf16>
    %c5_180 = arith.constant 5 : index
    %c0_181 = arith.constant 0 : index
    %c0_182 = arith.constant 0 : index
    %199 = vector.load %arg2[%c5_180, %c0_181, %c0_182] : memref<27x32x16xbf16, #tpu.memory_space<vmem>>, vector<1x32x16xbf16>
    %200 = vector.shape_cast %199 : vector<1x32x16xbf16> to vector<32x16xbf16>
    %cst_183 = arith.constant dense<0.000000e+00> : vector<32x512xf32>
    %201 = tpu.matmul %200, %198, %cst_183 {dimension_numbers = #tpu.dot_dimension_numbers<[1], [0], [0], [1], [0, 0, 1, 1], [], []>} : vector<32x16xbf16>, vector<16x512xbf16>, vector<32x512xf32> -> vector<32x512xf32>
    %202 = arith.addf %196, %201 : vector<32x512xf32>
    %c0_184 = arith.constant 0 : index
    %c0_185 = arith.constant 0 : index
    %c532 = arith.constant 532 : index
    %203 = vector.load %arg1[%c0_184, %c0_185, %c532] : memref<1x16x1280xbf16, #tpu.memory_space<vmem>>, vector<1x16x512xbf16>
    %204 = vector.shape_cast %203 : vector<1x16x512xbf16> to vector<16x512xbf16>
    %c6_186 = arith.constant 6 : index
    %c0_187 = arith.constant 0 : index
    %c0_188 = arith.constant 0 : index
    %205 = vector.load %arg2[%c6_186, %c0_187, %c0_188] : memref<27x32x16xbf16, #tpu.memory_space<vmem>>, vector<1x32x16xbf16>
    %206 = vector.shape_cast %205 : vector<1x32x16xbf16> to vector<32x16xbf16>
    %cst_189 = arith.constant dense<0.000000e+00> : vector<32x512xf32>
    %207 = tpu.matmul %206, %204, %cst_189 {dimension_numbers = #tpu.dot_dimension_numbers<[1], [0], [0], [1], [0, 0, 1, 1], [], []>} : vector<32x16xbf16>, vector<16x512xbf16>, vector<32x512xf32> -> vector<32x512xf32>
    %208 = arith.addf %202, %207 : vector<32x512xf32>
    %c0_190 = arith.constant 0 : index
    %c0_191 = arith.constant 0 : index
    %c533 = arith.constant 533 : index
    %209 = vector.load %arg1[%c0_190, %c0_191, %c533] : memref<1x16x1280xbf16, #tpu.memory_space<vmem>>, vector<1x16x512xbf16>
    %210 = vector.shape_cast %209 : vector<1x16x512xbf16> to vector<16x512xbf16>
    %c7_192 = arith.constant 7 : index
    %c0_193 = arith.constant 0 : index
    %c0_194 = arith.constant 0 : index
    %211 = vector.load %arg2[%c7_192, %c0_193, %c0_194] : memref<27x32x16xbf16, #tpu.memory_space<vmem>>, vector<1x32x16xbf16>
    %212 = vector.shape_cast %211 : vector<1x32x16xbf16> to vector<32x16xbf16>
    %cst_195 = arith.constant dense<0.000000e+00> : vector<32x512xf32>
    %213 = tpu.matmul %212, %210, %cst_195 {dimension_numbers = #tpu.dot_dimension_numbers<[1], [0], [0], [1], [0, 0, 1, 1], [], []>} : vector<32x16xbf16>, vector<16x512xbf16>, vector<32x512xf32> -> vector<32x512xf32>
    %214 = arith.addf %208, %213 : vector<32x512xf32>
    %c0_196 = arith.constant 0 : index
    %c0_197 = arith.constant 0 : index
    %c534 = arith.constant 534 : index
    %215 = vector.load %arg1[%c0_196, %c0_197, %c534] : memref<1x16x1280xbf16, #tpu.memory_space<vmem>>, vector<1x16x512xbf16>
    %216 = vector.shape_cast %215 : vector<1x16x512xbf16> to vector<16x512xbf16>
    %c8_198 = arith.constant 8 : index
    %c0_199 = arith.constant 0 : index
    %c0_200 = arith.constant 0 : index
    %217 = vector.load %arg2[%c8_198, %c0_199, %c0_200] : memref<27x32x16xbf16, #tpu.memory_space<vmem>>, vector<1x32x16xbf16>
    %218 = vector.shape_cast %217 : vector<1x32x16xbf16> to vector<32x16xbf16>
    %cst_201 = arith.constant dense<0.000000e+00> : vector<32x512xf32>
    %219 = tpu.matmul %218, %216, %cst_201 {dimension_numbers = #tpu.dot_dimension_numbers<[1], [0], [0], [1], [0, 0, 1, 1], [], []>} : vector<32x16xbf16>, vector<16x512xbf16>, vector<32x512xf32> -> vector<32x512xf32>
    %220 = arith.addf %214, %219 : vector<32x512xf32>
    %c0_202 = arith.constant 0 : index
    %c0_203 = arith.constant 0 : index
    %c612 = arith.constant 612 : index
    %221 = vector.load %arg1[%c0_202, %c0_203, %c612] : memref<1x16x1280xbf16, #tpu.memory_space<vmem>>, vector<1x16x512xbf16>
    %222 = vector.shape_cast %221 : vector<1x16x512xbf16> to vector<16x512xbf16>
    %c9_204 = arith.constant 9 : index
    %c0_205 = arith.constant 0 : index
    %c0_206 = arith.constant 0 : index
    %223 = vector.load %arg2[%c9_204, %c0_205, %c0_206] : memref<27x32x16xbf16, #tpu.memory_space<vmem>>, vector<1x32x16xbf16>
    %224 = vector.shape_cast %223 : vector<1x32x16xbf16> to vector<32x16xbf16>
    %cst_207 = arith.constant dense<0.000000e+00> : vector<32x512xf32>
    %225 = tpu.matmul %224, %222, %cst_207 {dimension_numbers = #tpu.dot_dimension_numbers<[1], [0], [0], [1], [0, 0, 1, 1], [], []>} : vector<32x16xbf16>, vector<16x512xbf16>, vector<32x512xf32> -> vector<32x512xf32>
    %226 = arith.addf %220, %225 : vector<32x512xf32>
    %c0_208 = arith.constant 0 : index
    %c0_209 = arith.constant 0 : index
    %c613 = arith.constant 613 : index
    %227 = vector.load %arg1[%c0_208, %c0_209, %c613] : memref<1x16x1280xbf16, #tpu.memory_space<vmem>>, vector<1x16x512xbf16>
    %228 = vector.shape_cast %227 : vector<1x16x512xbf16> to vector<16x512xbf16>
    %c10_210 = arith.constant 10 : index
    %c0_211 = arith.constant 0 : index
    %c0_212 = arith.constant 0 : index
    %229 = vector.load %arg2[%c10_210, %c0_211, %c0_212] : memref<27x32x16xbf16, #tpu.memory_space<vmem>>, vector<1x32x16xbf16>
    %230 = vector.shape_cast %229 : vector<1x32x16xbf16> to vector<32x16xbf16>
    %cst_213 = arith.constant dense<0.000000e+00> : vector<32x512xf32>
    %231 = tpu.matmul %230, %228, %cst_213 {dimension_numbers = #tpu.dot_dimension_numbers<[1], [0], [0], [1], [0, 0, 1, 1], [], []>} : vector<32x16xbf16>, vector<16x512xbf16>, vector<32x512xf32> -> vector<32x512xf32>
    %232 = arith.addf %226, %231 : vector<32x512xf32>
    %c0_214 = arith.constant 0 : index
    %c0_215 = arith.constant 0 : index
    %c614 = arith.constant 614 : index
    %233 = vector.load %arg1[%c0_214, %c0_215, %c614] : memref<1x16x1280xbf16, #tpu.memory_space<vmem>>, vector<1x16x512xbf16>
    %234 = vector.shape_cast %233 : vector<1x16x512xbf16> to vector<16x512xbf16>
    %c11_216 = arith.constant 11 : index
    %c0_217 = arith.constant 0 : index
    %c0_218 = arith.constant 0 : index
    %235 = vector.load %arg2[%c11_216, %c0_217, %c0_218] : memref<27x32x16xbf16, #tpu.memory_space<vmem>>, vector<1x32x16xbf16>
    %236 = vector.shape_cast %235 : vector<1x32x16xbf16> to vector<32x16xbf16>
    %cst_219 = arith.constant dense<0.000000e+00> : vector<32x512xf32>
    %237 = tpu.matmul %236, %234, %cst_219 {dimension_numbers = #tpu.dot_dimension_numbers<[1], [0], [0], [1], [0, 0, 1, 1], [], []>} : vector<32x16xbf16>, vector<16x512xbf16>, vector<32x512xf32> -> vector<32x512xf32>
    %238 = arith.addf %232, %237 : vector<32x512xf32>
    %c0_220 = arith.constant 0 : index
    %c0_221 = arith.constant 0 : index
    %c622 = arith.constant 622 : index
    %239 = vector.load %arg1[%c0_220, %c0_221, %c622] : memref<1x16x1280xbf16, #tpu.memory_space<vmem>>, vector<1x16x512xbf16>
    %240 = vector.shape_cast %239 : vector<1x16x512xbf16> to vector<16x512xbf16>
    %c12_222 = arith.constant 12 : index
    %c0_223 = arith.constant 0 : index
    %c0_224 = arith.constant 0 : index
    %241 = vector.load %arg2[%c12_222, %c0_223, %c0_224] : memref<27x32x16xbf16, #tpu.memory_space<vmem>>, vector<1x32x16xbf16>
    %242 = vector.shape_cast %241 : vector<1x32x16xbf16> to vector<32x16xbf16>
    %cst_225 = arith.constant dense<0.000000e+00> : vector<32x512xf32>
    %243 = tpu.matmul %242, %240, %cst_225 {dimension_numbers = #tpu.dot_dimension_numbers<[1], [0], [0], [1], [0, 0, 1, 1], [], []>} : vector<32x16xbf16>, vector<16x512xbf16>, vector<32x512xf32> -> vector<32x512xf32>
    %244 = arith.addf %238, %243 : vector<32x512xf32>
    %c0_226 = arith.constant 0 : index
    %c0_227 = arith.constant 0 : index
    %c623 = arith.constant 623 : index
    %245 = vector.load %arg1[%c0_226, %c0_227, %c623] : memref<1x16x1280xbf16, #tpu.memory_space<vmem>>, vector<1x16x512xbf16>
    %246 = vector.shape_cast %245 : vector<1x16x512xbf16> to vector<16x512xbf16>
    %c13_228 = arith.constant 13 : index
    %c0_229 = arith.constant 0 : index
    %c0_230 = arith.constant 0 : index
    %247 = vector.load %arg2[%c13_228, %c0_229, %c0_230] : memref<27x32x16xbf16, #tpu.memory_space<vmem>>, vector<1x32x16xbf16>
    %248 = vector.shape_cast %247 : vector<1x32x16xbf16> to vector<32x16xbf16>
    %cst_231 = arith.constant dense<0.000000e+00> : vector<32x512xf32>
    %249 = tpu.matmul %248, %246, %cst_231 {dimension_numbers = #tpu.dot_dimension_numbers<[1], [0], [0], [1], [0, 0, 1, 1], [], []>} : vector<32x16xbf16>, vector<16x512xbf16>, vector<32x512xf32> -> vector<32x512xf32>
    %250 = arith.addf %244, %249 : vector<32x512xf32>
    %c0_232 = arith.constant 0 : index
    %c0_233 = arith.constant 0 : index
    %c624 = arith.constant 624 : index
    %251 = vector.load %arg1[%c0_232, %c0_233, %c624] : memref<1x16x1280xbf16, #tpu.memory_space<vmem>>, vector<1x16x512xbf16>
    %252 = vector.shape_cast %251 : vector<1x16x512xbf16> to vector<16x512xbf16>
    %c14_234 = arith.constant 14 : index
    %c0_235 = arith.constant 0 : index
    %c0_236 = arith.constant 0 : index
    %253 = vector.load %arg2[%c14_234, %c0_235, %c0_236] : memref<27x32x16xbf16, #tpu.memory_space<vmem>>, vector<1x32x16xbf16>
    %254 = vector.shape_cast %253 : vector<1x32x16xbf16> to vector<32x16xbf16>
    %cst_237 = arith.constant dense<0.000000e+00> : vector<32x512xf32>
    %255 = tpu.matmul %254, %252, %cst_237 {dimension_numbers = #tpu.dot_dimension_numbers<[1], [0], [0], [1], [0, 0, 1, 1], [], []>} : vector<32x16xbf16>, vector<16x512xbf16>, vector<32x512xf32> -> vector<32x512xf32>
    %256 = arith.addf %250, %255 : vector<32x512xf32>
    %c0_238 = arith.constant 0 : index
    %c0_239 = arith.constant 0 : index
    %c632 = arith.constant 632 : index
    %257 = vector.load %arg1[%c0_238, %c0_239, %c632] : memref<1x16x1280xbf16, #tpu.memory_space<vmem>>, vector<1x16x512xbf16>
    %258 = vector.shape_cast %257 : vector<1x16x512xbf16> to vector<16x512xbf16>
    %c15_240 = arith.constant 15 : index
    %c0_241 = arith.constant 0 : index
    %c0_242 = arith.constant 0 : index
    %259 = vector.load %arg2[%c15_240, %c0_241, %c0_242] : memref<27x32x16xbf16, #tpu.memory_space<vmem>>, vector<1x32x16xbf16>
    %260 = vector.shape_cast %259 : vector<1x32x16xbf16> to vector<32x16xbf16>
    %cst_243 = arith.constant dense<0.000000e+00> : vector<32x512xf32>
    %261 = tpu.matmul %260, %258, %cst_243 {dimension_numbers = #tpu.dot_dimension_numbers<[1], [0], [0], [1], [0, 0, 1, 1], [], []>} : vector<32x16xbf16>, vector<16x512xbf16>, vector<32x512xf32> -> vector<32x512xf32>
    %262 = arith.addf %256, %261 : vector<32x512xf32>
    %c0_244 = arith.constant 0 : index
    %c0_245 = arith.constant 0 : index
    %c633 = arith.constant 633 : index
    %263 = vector.load %arg1[%c0_244, %c0_245, %c633] : memref<1x16x1280xbf16, #tpu.memory_space<vmem>>, vector<1x16x512xbf16>
    %264 = vector.shape_cast %263 : vector<1x16x512xbf16> to vector<16x512xbf16>
    %c16_246 = arith.constant 16 : index
    %c0_247 = arith.constant 0 : index
    %c0_248 = arith.constant 0 : index
    %265 = vector.load %arg2[%c16_246, %c0_247, %c0_248] : memref<27x32x16xbf16, #tpu.memory_space<vmem>>, vector<1x32x16xbf16>
    %266 = vector.shape_cast %265 : vector<1x32x16xbf16> to vector<32x16xbf16>
    %cst_249 = arith.constant dense<0.000000e+00> : vector<32x512xf32>
    %267 = tpu.matmul %266, %264, %cst_249 {dimension_numbers = #tpu.dot_dimension_numbers<[1], [0], [0], [1], [0, 0, 1, 1], [], []>} : vector<32x16xbf16>, vector<16x512xbf16>, vector<32x512xf32> -> vector<32x512xf32>
    %268 = arith.addf %262, %267 : vector<32x512xf32>
    %c0_250 = arith.constant 0 : index
    %c0_251 = arith.constant 0 : index
    %c634 = arith.constant 634 : index
    %269 = vector.load %arg1[%c0_250, %c0_251, %c634] : memref<1x16x1280xbf16, #tpu.memory_space<vmem>>, vector<1x16x512xbf16>
    %270 = vector.shape_cast %269 : vector<1x16x512xbf16> to vector<16x512xbf16>
    %c17_252 = arith.constant 17 : index
    %c0_253 = arith.constant 0 : index
    %c0_254 = arith.constant 0 : index
    %271 = vector.load %arg2[%c17_252, %c0_253, %c0_254] : memref<27x32x16xbf16, #tpu.memory_space<vmem>>, vector<1x32x16xbf16>
    %272 = vector.shape_cast %271 : vector<1x32x16xbf16> to vector<32x16xbf16>
    %cst_255 = arith.constant dense<0.000000e+00> : vector<32x512xf32>
    %273 = tpu.matmul %272, %270, %cst_255 {dimension_numbers = #tpu.dot_dimension_numbers<[1], [0], [0], [1], [0, 0, 1, 1], [], []>} : vector<32x16xbf16>, vector<16x512xbf16>, vector<32x512xf32> -> vector<32x512xf32>
    %274 = arith.addf %268, %273 : vector<32x512xf32>
    %c0_256 = arith.constant 0 : index
    %c0_257 = arith.constant 0 : index
    %c712 = arith.constant 712 : index
    %275 = vector.load %arg1[%c0_256, %c0_257, %c712] : memref<1x16x1280xbf16, #tpu.memory_space<vmem>>, vector<1x16x512xbf16>
    %276 = vector.shape_cast %275 : vector<1x16x512xbf16> to vector<16x512xbf16>
    %c18_258 = arith.constant 18 : index
    %c0_259 = arith.constant 0 : index
    %c0_260 = arith.constant 0 : index
    %277 = vector.load %arg2[%c18_258, %c0_259, %c0_260] : memref<27x32x16xbf16, #tpu.memory_space<vmem>>, vector<1x32x16xbf16>
    %278 = vector.shape_cast %277 : vector<1x32x16xbf16> to vector<32x16xbf16>
    %cst_261 = arith.constant dense<0.000000e+00> : vector<32x512xf32>
    %279 = tpu.matmul %278, %276, %cst_261 {dimension_numbers = #tpu.dot_dimension_numbers<[1], [0], [0], [1], [0, 0, 1, 1], [], []>} : vector<32x16xbf16>, vector<16x512xbf16>, vector<32x512xf32> -> vector<32x512xf32>
    %280 = arith.addf %274, %279 : vector<32x512xf32>
    %c0_262 = arith.constant 0 : index
    %c0_263 = arith.constant 0 : index
    %c713 = arith.constant 713 : index
    %281 = vector.load %arg1[%c0_262, %c0_263, %c713] : memref<1x16x1280xbf16, #tpu.memory_space<vmem>>, vector<1x16x512xbf16>
    %282 = vector.shape_cast %281 : vector<1x16x512xbf16> to vector<16x512xbf16>
    %c19_264 = arith.constant 19 : index
    %c0_265 = arith.constant 0 : index
    %c0_266 = arith.constant 0 : index
    %283 = vector.load %arg2[%c19_264, %c0_265, %c0_266] : memref<27x32x16xbf16, #tpu.memory_space<vmem>>, vector<1x32x16xbf16>
    %284 = vector.shape_cast %283 : vector<1x32x16xbf16> to vector<32x16xbf16>
    %cst_267 = arith.constant dense<0.000000e+00> : vector<32x512xf32>
    %285 = tpu.matmul %284, %282, %cst_267 {dimension_numbers = #tpu.dot_dimension_numbers<[1], [0], [0], [1], [0, 0, 1, 1], [], []>} : vector<32x16xbf16>, vector<16x512xbf16>, vector<32x512xf32> -> vector<32x512xf32>
    %286 = arith.addf %280, %285 : vector<32x512xf32>
    %c0_268 = arith.constant 0 : index
    %c0_269 = arith.constant 0 : index
    %c714 = arith.constant 714 : index
    %287 = vector.load %arg1[%c0_268, %c0_269, %c714] : memref<1x16x1280xbf16, #tpu.memory_space<vmem>>, vector<1x16x512xbf16>
    %288 = vector.shape_cast %287 : vector<1x16x512xbf16> to vector<16x512xbf16>
    %c20_270 = arith.constant 20 : index
    %c0_271 = arith.constant 0 : index
    %c0_272 = arith.constant 0 : index
    %289 = vector.load %arg2[%c20_270, %c0_271, %c0_272] : memref<27x32x16xbf16, #tpu.memory_space<vmem>>, vector<1x32x16xbf16>
    %290 = vector.shape_cast %289 : vector<1x32x16xbf16> to vector<32x16xbf16>
    %cst_273 = arith.constant dense<0.000000e+00> : vector<32x512xf32>
    %291 = tpu.matmul %290, %288, %cst_273 {dimension_numbers = #tpu.dot_dimension_numbers<[1], [0], [0], [1], [0, 0, 1, 1], [], []>} : vector<32x16xbf16>, vector<16x512xbf16>, vector<32x512xf32> -> vector<32x512xf32>
    %292 = arith.addf %286, %291 : vector<32x512xf32>
    %c0_274 = arith.constant 0 : index
    %c0_275 = arith.constant 0 : index
    %c722 = arith.constant 722 : index
    %293 = vector.load %arg1[%c0_274, %c0_275, %c722] : memref<1x16x1280xbf16, #tpu.memory_space<vmem>>, vector<1x16x512xbf16>
    %294 = vector.shape_cast %293 : vector<1x16x512xbf16> to vector<16x512xbf16>
    %c21_276 = arith.constant 21 : index
    %c0_277 = arith.constant 0 : index
    %c0_278 = arith.constant 0 : index
    %295 = vector.load %arg2[%c21_276, %c0_277, %c0_278] : memref<27x32x16xbf16, #tpu.memory_space<vmem>>, vector<1x32x16xbf16>
    %296 = vector.shape_cast %295 : vector<1x32x16xbf16> to vector<32x16xbf16>
    %cst_279 = arith.constant dense<0.000000e+00> : vector<32x512xf32>
    %297 = tpu.matmul %296, %294, %cst_279 {dimension_numbers = #tpu.dot_dimension_numbers<[1], [0], [0], [1], [0, 0, 1, 1], [], []>} : vector<32x16xbf16>, vector<16x512xbf16>, vector<32x512xf32> -> vector<32x512xf32>
    %298 = arith.addf %292, %297 : vector<32x512xf32>
    %c0_280 = arith.constant 0 : index
    %c0_281 = arith.constant 0 : index
    %c723 = arith.constant 723 : index
    %299 = vector.load %arg1[%c0_280, %c0_281, %c723] : memref<1x16x1280xbf16, #tpu.memory_space<vmem>>, vector<1x16x512xbf16>
    %300 = vector.shape_cast %299 : vector<1x16x512xbf16> to vector<16x512xbf16>
    %c22_282 = arith.constant 22 : index
    %c0_283 = arith.constant 0 : index
    %c0_284 = arith.constant 0 : index
    %301 = vector.load %arg2[%c22_282, %c0_283, %c0_284] : memref<27x32x16xbf16, #tpu.memory_space<vmem>>, vector<1x32x16xbf16>
    %302 = vector.shape_cast %301 : vector<1x32x16xbf16> to vector<32x16xbf16>
    %cst_285 = arith.constant dense<0.000000e+00> : vector<32x512xf32>
    %303 = tpu.matmul %302, %300, %cst_285 {dimension_numbers = #tpu.dot_dimension_numbers<[1], [0], [0], [1], [0, 0, 1, 1], [], []>} : vector<32x16xbf16>, vector<16x512xbf16>, vector<32x512xf32> -> vector<32x512xf32>
    %304 = arith.addf %298, %303 : vector<32x512xf32>
    %c0_286 = arith.constant 0 : index
    %c0_287 = arith.constant 0 : index
    %c724 = arith.constant 724 : index
    %305 = vector.load %arg1[%c0_286, %c0_287, %c724] : memref<1x16x1280xbf16, #tpu.memory_space<vmem>>, vector<1x16x512xbf16>
    %306 = vector.shape_cast %305 : vector<1x16x512xbf16> to vector<16x512xbf16>
    %c23_288 = arith.constant 23 : index
    %c0_289 = arith.constant 0 : index
    %c0_290 = arith.constant 0 : index
    %307 = vector.load %arg2[%c23_288, %c0_289, %c0_290] : memref<27x32x16xbf16, #tpu.memory_space<vmem>>, vector<1x32x16xbf16>
    %308 = vector.shape_cast %307 : vector<1x32x16xbf16> to vector<32x16xbf16>
    %cst_291 = arith.constant dense<0.000000e+00> : vector<32x512xf32>
    %309 = tpu.matmul %308, %306, %cst_291 {dimension_numbers = #tpu.dot_dimension_numbers<[1], [0], [0], [1], [0, 0, 1, 1], [], []>} : vector<32x16xbf16>, vector<16x512xbf16>, vector<32x512xf32> -> vector<32x512xf32>
    %310 = arith.addf %304, %309 : vector<32x512xf32>
    %c0_292 = arith.constant 0 : index
    %c0_293 = arith.constant 0 : index
    %c732 = arith.constant 732 : index
    %311 = vector.load %arg1[%c0_292, %c0_293, %c732] : memref<1x16x1280xbf16, #tpu.memory_space<vmem>>, vector<1x16x512xbf16>
    %312 = vector.shape_cast %311 : vector<1x16x512xbf16> to vector<16x512xbf16>
    %c24_294 = arith.constant 24 : index
    %c0_295 = arith.constant 0 : index
    %c0_296 = arith.constant 0 : index
    %313 = vector.load %arg2[%c24_294, %c0_295, %c0_296] : memref<27x32x16xbf16, #tpu.memory_space<vmem>>, vector<1x32x16xbf16>
    %314 = vector.shape_cast %313 : vector<1x32x16xbf16> to vector<32x16xbf16>
    %cst_297 = arith.constant dense<0.000000e+00> : vector<32x512xf32>
    %315 = tpu.matmul %314, %312, %cst_297 {dimension_numbers = #tpu.dot_dimension_numbers<[1], [0], [0], [1], [0, 0, 1, 1], [], []>} : vector<32x16xbf16>, vector<16x512xbf16>, vector<32x512xf32> -> vector<32x512xf32>
    %316 = arith.addf %310, %315 : vector<32x512xf32>
    %c0_298 = arith.constant 0 : index
    %c0_299 = arith.constant 0 : index
    %c733 = arith.constant 733 : index
    %317 = vector.load %arg1[%c0_298, %c0_299, %c733] : memref<1x16x1280xbf16, #tpu.memory_space<vmem>>, vector<1x16x512xbf16>
    %318 = vector.shape_cast %317 : vector<1x16x512xbf16> to vector<16x512xbf16>
    %c25_300 = arith.constant 25 : index
    %c0_301 = arith.constant 0 : index
    %c0_302 = arith.constant 0 : index
    %319 = vector.load %arg2[%c25_300, %c0_301, %c0_302] : memref<27x32x16xbf16, #tpu.memory_space<vmem>>, vector<1x32x16xbf16>
    %320 = vector.shape_cast %319 : vector<1x32x16xbf16> to vector<32x16xbf16>
    %cst_303 = arith.constant dense<0.000000e+00> : vector<32x512xf32>
    %321 = tpu.matmul %320, %318, %cst_303 {dimension_numbers = #tpu.dot_dimension_numbers<[1], [0], [0], [1], [0, 0, 1, 1], [], []>} : vector<32x16xbf16>, vector<16x512xbf16>, vector<32x512xf32> -> vector<32x512xf32>
    %322 = arith.addf %316, %321 : vector<32x512xf32>
    %c0_304 = arith.constant 0 : index
    %c0_305 = arith.constant 0 : index
    %c734 = arith.constant 734 : index
    %323 = vector.load %arg1[%c0_304, %c0_305, %c734] : memref<1x16x1280xbf16, #tpu.memory_space<vmem>>, vector<1x16x512xbf16>
    %324 = vector.shape_cast %323 : vector<1x16x512xbf16> to vector<16x512xbf16>
    %c26_306 = arith.constant 26 : index
    %c0_307 = arith.constant 0 : index
    %c0_308 = arith.constant 0 : index
    %325 = vector.load %arg2[%c26_306, %c0_307, %c0_308] : memref<27x32x16xbf16, #tpu.memory_space<vmem>>, vector<1x32x16xbf16>
    %326 = vector.shape_cast %325 : vector<1x32x16xbf16> to vector<32x16xbf16>
    %cst_309 = arith.constant dense<0.000000e+00> : vector<32x512xf32>
    %327 = tpu.matmul %326, %324, %cst_309 {dimension_numbers = #tpu.dot_dimension_numbers<[1], [0], [0], [1], [0, 0, 1, 1], [], []>} : vector<32x16xbf16>, vector<16x512xbf16>, vector<32x512xf32> -> vector<32x512xf32>
    %328 = arith.addf %322, %327 : vector<32x512xf32>
    %c0_310 = arith.constant 0 : index
    %c0_311 = arith.constant 0 : index
    %c512_312 = arith.constant 512 : index
    %329 = vector.load %arg3[%c0_310, %c0_311, %c512_312] : memref<1x32x1024xf32, #tpu.memory_space<vmem>>, vector<1x32x512xf32>
    %330 = vector.shape_cast %329 : vector<1x32x512xf32> to vector<32x512xf32>
    %331 = vector.shape_cast %328 : vector<32x512xf32> to vector<1x32x512xf32>
    tpu.vector_store %arg3[%c0_310, %c0_311, %c512_312], %331 {strides = array<i32>} : memref<1x32x1024xf32, #tpu.memory_space<vmem>>, vector<1x32x512xf32>,
    return
  }
  func.func @transform_0(%arg0: i32) -> (i32, i32, i32) {
    %c0_i32 = arith.constant 0 : i32
    %c0_i32_0 = arith.constant 0 : i32
    %c0_i32_1 = arith.constant 0 : i32
    return %arg0, %c0_i32, %c0_i32_0 : i32, i32, i32
  }
  func.func @transform_1(%arg0: i32) -> (i32, i32, i32) {
    %c0_i32 = arith.constant 0 : i32
    %c0_i32_0 = arith.constant 0 : i32
    %c0_i32_1 = arith.constant 0 : i32
    %c0_i32_2 = arith.constant 0 : i32
    return %c0_i32, %c0_i32_0, %c0_i32_1 : i32, i32, i32
  }
  func.func @transform_2(%arg0: i32) -> (i32, i32, i32) {
    %c0_i32 = arith.constant 0 : i32
    %c0_i32_0 = arith.constant 0 : i32
    %c0_i32_1 = arith.constant 0 : i32
    return %arg0, %c0_i32, %c0_i32_0 : i32, i32, i32
  }
}

</mosaic_0001>

<bundles_post_ra>
// kernel: tpu_custom_call.1
= control target key start
LH: loop header
LB: loop body
LE: loop exit
PB: predicated region body
PF: predicated region fallthrough
CT: control target
= control target key end

     0   :  { %7 = vsyncpa [#allocation3], 0  ;;  %s12386_s0 = inlined_call_operand.vmem [shape: bf16[2,16,1280], index: 0, kind: input, shape index: {}]   ;;  %s12387_s1 = inlined_call_operand.vmem [shape: bf16[27,32,16], index: 1, kind: input, shape index: {}]   ;;  %s12388_s2 = inlined_call_operand.hbm [shape: f32[2,32,1024], index: 2, kind: output, shape index: {}]  }
   0x1   :  { %9 = vsyncpa [#allocation3 + $0x1], 0  ;;  %s10670_s9 = smov 0   ;;  %s10672_s10 = smov 0  }
   0x2   :  { %s10674_s11 = smov 0   ;;  %s10676_s12 = smov 0  }
   0x3 LB: > { %s10691_s13 = sadd.s32 4294967295, %s10623_s12   ;;  %s8960_s14 = sadd.s32 4294967294, %s10623_s12   ;;  %s10623_s12 = sphi %s10676_s12, %s12480_s12   ;;  %s10619_s11 = sphi %s10674_s11, %s12479_s11   ;;  %s10615_s10 = sphi %s10672_s10, %s12478_s10   ;;  %s10611_s9 = sphi %s10670_s9, %s12477_s9  }
   0x4   : > { %s10695_s15 = sadd.s32 1, %s10623_s12   ;;  %s69_s16 = sadd.s32 1, %s10619_s11 }
   0x5   : > { %s66_s17 = ssub.s32 %s10623_s12, %s10695_s15  ;;  %p79_p0 = scmp.ne.s32.totalorder %s10619_s11, %s10615_s10 }
   0x6   : > { %p67_p1 = scmp.eq.s32.totalorder %s66_s17, 0  ;;  %p80_p2 = scmp.eq.s32.totalorder %s10691_s13, 1 }
   0x7   : > { %p85_p3 = scmp.ne.s32.totalorder %s10615_s10, %s10611_s9  ;;  %p86_p4 = scmp.eq.s32.totalorder %s8960_s14, 1 }
   0x8   : > { %s10706_s18 = scalar_select %p67_p1, %s10619_s11, %s69_s16  }
   0x9   : > { %p10708_p5 = por %p80_p2, %p79_p0  ;;  %p10712_p6 = por %p86_p4, %p85_p3 }
   0xa   : > { %p8963_p7 = scmp.ge.s32.totalorder %s10623_s12, 1  ;;  %p115_p8 = scmp.lt.s32.totalorder %s10623_s12, 3 }
   0xc   : > { %p116_p9 = pnand %p8963_p7, %p115_p8 }
   0xd   : > { %p137_p10 = scmp.lt.s32.totalorder (!%p116_p9), %s10691_s13, 1  ;;  %v10625_v0 = vmov (!%p116_p9), 0   ;;  %s10626_s26 = smov (!%p116_p9), 127   ;;  %vm199_vm0 = vcmask (!%p116_p9), 1039360   ;;  %v10432_v13 = vld [vmem:[%s12387_s1 + $0x10] sm:$0xff] (!%p116_p9)   ;;  %vm208_vm1 = vcmask (!%p116_p9), 130048  }
   0xe   : > { %119 = sbr.rel (%p116_p9) target bundleno = 1241 (0x4d9), region = 28  ;;  %300 = vmatprep.mubr.bf16.mxu1 (!%p116_p9), %v10625_v0  ;;  %247 = vmatprep.mubr.bf16.mxu0 (!%p116_p9), %v10625_v0  ;;  %s10627_s27 = smov (!%p116_p9), 126   ;;  %vm472_vm2 = vcmask (!%p116_p9), 1031168   ;;  %v10433_v19 = vld [vmem:[%s12387_s1 + $0x18] sm:$0xff] (!%p116_p9)   ;;  %v10434_v26 = vld [vmem:[%s12387_s1] sm:$0xff] (!%p116_p9)   ;;  %vm634_vm3 = vcmask (!%p116_p9), 965632  }
   0xf   : > { %s10628_s28 = smov (!%p116_p9), 118   ;;  %s10629_s29 = smov (!%p116_p9), 117   ;;  %v10435_v34 = vld [vmem:[%s12387_s1 + $0x8] sm:$0xff] (!%p116_p9)   ;;  %v10436_v37 = vld [vmem:[%s12387_s1 + $0x20] sm:$0xff] (!%p116_p9)   ;;  %vm796_vm4 = vcmask (!%p116_p9), 957440   ;;  %v10438_v49 = vld [vmem:[%s12387_s1 + $0x30] sm:$0xff] (!%p116_p9)  }
  0x10   : > { %s10630_s30 = smov (!%p116_p9), 116   ;;  %s10631_s3 = smov (!%p116_p9), 108   ;;  %v10437_v45 = vld [vmem:[%s12387_s1 + $0x28] sm:$0xff] (!%p116_p9)   ;;  %vm958_vm5 = vcmask (!%p116_p9), 949248   ;;  %v10439_v61 = vld [vmem:[%s12387_s1 + $0x38] sm:$0xff] (!%p116_p9)   ;;  %vm1120_vm6 = vcmask (!%p116_p9), 883712  }
  0x11   : > { %s10632_s4 = smov (!%p116_p9), 107   ;;  %s10633_s5 = smov (!%p116_p9), 106   ;;  %vm1282_vm7 = vcmask (!%p116_p9), 875520   ;;  %vm1444_vm8 = vcmask (!%p116_p9), 867328   ;;  %vm1606_vm9 = vcmask (!%p116_p9), 228352   ;;  %vm1768_vm10 = vcmask (!%p116_p9), 220160  }
  0x12   : > { %s10634_s6 = smov (!%p116_p9), 28   ;;  %s10635_s7 = smov (!%p116_p9), 27   ;;  %vm1930_vm11 = vcmask (!%p116_p9), 211968   ;;  %vm2092_vm12 = vcmask (!%p116_p9), 146432   ;;  %vm2254_vm13 = vcmask (!%p116_p9), 138240   ;;  %vm12413_vm14 = vcmask (!%p116_p9), 64512  }
  0x13   : > { %s10636_s8 = smov (!%p116_p9), 26   ;;  %s10637_s14 = smov (!%p116_p9), 18   ;;  %vm12414_vm15 = vcmask (!%p116_p9), 56320  }
  0x14   : > { %s12407_s24 = smov (!%p116_p9), 16   ;;  %s12391_s17 = smov (!%p116_p9), 7  }
  0x15   : > { %s138_s21 = scalar_select %p137_p10, %s10691_s13, 1 }
  0x16   : > { %s12411_s23 = smov 35   ;;  %s12433_s16 = smov 45  }
  0x17   : > { %s10356_s22 = smul.u32 80, %s138_s21  ;;  %s10638_s21 = smov 17  }
  0x19   : > { %s10725_s25 = scalar_lea.vmem %s12386_s0, %s10356_s22  ;;  %s12389_s22 = smov 8  }
  0x1a   : > { %v10728_v1 = vld [vmem:[%s10725_s25 + $0xc] ss:$40 sps:$4 sm:$0xff]   ;;  %v10736_v3 = vld [vmem:[%s10725_s25 + $0x10] ss:$40 sps:$4 sm:$0xff]   ;;  %v10744_v5 = vld [vmem:[%s10725_s25] ss:$40 sps:$4 sm:$0xff]  }
  0x1b   : > { %v10731_v2 = vld [vmem:[%s10725_s25 + $0x4] ss:$40 sps:$4 sm:$0xff]   ;;  %195 = vrot.lane.b32.xlu1 %v10728_v1, %s10626_s26  ;;  %v10741_v4 = vld [vmem:[%s10725_s25 + $0x8] ss:$40 sps:$4 sm:$0xff]   ;;  %v11000_v60 = vld [vmem:[%s10725_s25 + $0x14] ss:$40 sps:$4 sm:$0xff]  }
  0x1c   : > { %191 = vrot.lane.b32.xlu0 %v10731_v2, %s10626_s26  ;;  %v10966_v48 = vld [vmem:[%s10725_s25 + $0x8] ss:$40 sps:$4 sm:$0xff]   ;;  %v10986_v55 = vld [vmem:[%s10725_s25 + $0xc] ss:$40 sps:$4 sm:$0xff]  }
  0x1d   : > { %v10978_v52 = vld [vmem:[%s10725_s25 + $0x10] ss:$40 sps:$4 sm:$0xff]   ;;  %v10992_v56 = vld [vmem:[%s10725_s25 + $0x4] ss:$40 sps:$4 sm:$0xff]  }
  0x1f   : > { %197 = vrot.lane.b32.xlu1 %v10736_v3, %s10626_s26 }
  0x20   : > { %193 = vrot.lane.b32.xlu0 %v10741_v4, %s10626_s26 }
  0x23   : > { %464 = vrot.lane.b32.xlu1 %v10731_v2, %s10627_s27 }
  0x24   : > { %189 = vrot.lane.b32.xlu0 %v10744_v5, %s10626_s26 }
  0x27   : > { %468 = vrot.lane.b32.xlu1 %v10728_v1, %s10627_s27 }
  0x28   : > { %466 = vrot.lane.b32.xlu0 %v10741_v4, %s10627_s27 }
  0x2b   : > { %462 = vrot.lane.b32.xlu1 %v10744_v5, %s10627_s27 }
  0x2c   : > { %470 = vrot.lane.b32.xlu0 %v10736_v3, %s10627_s27 }
  0x2f   : > { %628 = vrot.lane.b32.xlu1 %v10741_v4, %s10628_s28 }
  0x30   : > { %626 = vrot.lane.b32.xlu0 %v10731_v2, %s10628_s28 }
  0x33   : > { %632 = vrot.lane.b32.xlu1 %v10736_v3, %s10628_s28 }
  0x34   : > { %630 = vrot.lane.b32.xlu0 %v10728_v1, %s10628_s28 }
  0x37   : > { %788 = vrot.lane.b32.xlu1 %v10731_v2, %s10629_s29 }
  0x38   : > { %624 = vrot.lane.b32.xlu0 %v10744_v5, %s10628_s28 }
  0x3b   : > { %792 = vrot.lane.b32.xlu1 %v10728_v1, %s10629_s29 }
  0x3c   : > { %790 = vrot.lane.b32.xlu0 %v10741_v4, %s10629_s29 }
  0x3f   : > { %786 = vrot.lane.b32.xlu1 %v10744_v5, %s10629_s29 }
  0x40   : > { %794 = vrot.lane.b32.xlu0 %v10736_v3, %s10629_s29 }
  0x43   : > { %952 = vrot.lane.b32.xlu1 %v10741_v4, %s10630_s30 }
  0x44   : > { %950 = vrot.lane.b32.xlu0 %v10731_v2, %s10630_s30 }
  0x47   : > { %956 = vrot.lane.b32.xlu1 %v10736_v3, %s10630_s30 }
  0x48   : > { %954 = vrot.lane.b32.xlu0 %v10728_v1, %s10630_s30 }
  0x4b   : > { %1112 = vrot.lane.b32.xlu1 %v10731_v2, %s10631_s3 }
  0x4c   : > { %948 = vrot.lane.b32.xlu0 %v10744_v5, %s10630_s30 }
  0x4f   : > { %1116 = vrot.lane.b32.xlu1 %v10728_v1, %s10631_s3 }
  0x50   : > { %1114 = vrot.lane.b32.xlu0 %v10741_v4, %s10631_s3 }
  0x53   : > { %1110 = vrot.lane.b32.xlu1 %v10744_v5, %s10631_s3 }
  0x54   : > { %1118 = vrot.lane.b32.xlu0 %v10736_v3, %s10631_s3 }
  0x57   : > { %1276 = vrot.lane.b32.xlu1 %v10741_v4, %s10632_s4 }
  0x58   : > { %1274 = vrot.lane.b32.xlu0 %v10731_v2, %s10632_s4 }
  0x5b   : > { %1280 = vrot.lane.b32.xlu1 %v10736_v3, %s10632_s4 }
  0x5c   : > { %1278 = vrot.lane.b32.xlu0 %v10728_v1, %s10632_s4 }
  0x5f   : > { %1436 = vrot.lane.b32.xlu1 %v10731_v2, %s10633_s5 }
  0x60   : > { %1272 = vrot.lane.b32.xlu0 %v10744_v5, %s10632_s4 }
  0x63   : > { %1440 = vrot.lane.b32.xlu1 %v10728_v1, %s10633_s5 }
  0x64   : > { %1438 = vrot.lane.b32.xlu0 %v10741_v4, %s10633_s5 }
  0x67   : > { %1434 = vrot.lane.b32.xlu1 %v10744_v5, %s10633_s5 }
  0x68   : > { %1442 = vrot.lane.b32.xlu0 %v10736_v3, %s10633_s5 }
  0x6b   : > { %1600 = vrot.lane.b32.xlu1 %v10741_v4, %s10634_s6 }
  0x6c   : > { %1598 = vrot.lane.b32.xlu0 %v10731_v2, %s10634_s6 }
  0x6f   : > { %1604 = vrot.lane.b32.xlu1 %v10736_v3, %s10634_s6 }
  0x70   : > { %1602 = vrot.lane.b32.xlu0 %v10728_v1, %s10634_s6 }
  0x73   : > { %1760 = vrot.lane.b32.xlu1 %v10731_v2, %s10635_s7 }
  0x74   : > { %1596 = vrot.lane.b32.xlu0 %v10744_v5, %s10634_s6 }
  0x77   : > { %1764 = vrot.lane.b32.xlu1 %v10728_v1, %s10635_s7 }
  0x78   : > { %1762 = vrot.lane.b32.xlu0 %v10741_v4, %s10635_s7 }
  0x7b   : > { %1758 = vrot.lane.b32.xlu1 %v10744_v5, %s10635_s7 }
  0x7c   : > { %1766 = vrot.lane.b32.xlu0 %v10736_v3, %s10635_s7 }
  0x7f   : > { %1924 = vrot.lane.b32.xlu1 %v10741_v4, %s10636_s8 }
  0x80   : > { %1922 = vrot.lane.b32.xlu0 %v10731_v2, %s10636_s8 }
  0x83   : > { %1928 = vrot.lane.b32.xlu1 %v10736_v3, %s10636_s8 }
  0x84   : > { %1926 = vrot.lane.b32.xlu0 %v10728_v1, %s10636_s8 }
  0x87   : > { %2084 = vrot.lane.b32.xlu1 %v10731_v2, %s10637_s14 }
  0x88   : > { %1920 = vrot.lane.b32.xlu0 %v10744_v5, %s10636_s8 }
  0x8b   : > { %2088 = vrot.lane.b32.xlu1 %v10728_v1, %s10637_s14 }
  0x8c   : > { %2086 = vrot.lane.b32.xlu0 %v10741_v4, %s10637_s14 }
  0x8d   : > { %v196_v6 = vpop.permute.xlu1 %195 }
  0x8e   : > { %v192_v7 = vpop.permute.xlu0 %191 }
  0x8f   : > { %2082 = vrot.lane.b32.xlu1 %v10744_v5, %s10637_s14 }
  0x90   : > { %2090 = vrot.lane.b32.xlu0 %v10736_v3, %s10637_s14 }
  0x91   : > { %v198_v8 = vpop.permute.xlu1 %197 }
  0x92   : > { %v194_v9 = vpop.permute.xlu0 %193  ;;  %v203_v10 = vsel %vm199_vm0, %v196_v6, %v198_v8 }
  0x93   : > { %v201_v11 = vsel %vm199_vm0, %v192_v7, %v194_v9  ;;  %268 = vmatprep.subr.bf16.mxu1 %v203_v10  ;;  %v202_v12 = vsel %vm199_vm0, %v194_v9, %v196_v6  ;;  %2248 = vrot.lane.b32.xlu1 %v10741_v4, %s10638_s21  ;;  %v10441_v9 = vld [vmem:[%s12387_s1 + $0x48] sm:$0xff]  }
  0x94   : > { %215 = vmatprep.subr.bf16.mxu0 %v201_v11  ;;  %269 = vmatpush1.bf16.msra.mxu1 %v202_v12  ;;  %v10442_v12 = vld [vmem:[%s12387_s1 + $0x50] sm:$0xff]  }
  0x95   : > { %v465_v14 = vpop.permute.xlu1 %464  ;;  %394 = vmatprep.subr.bf16.mxu1 %v10728_v1  ;;  %2246 = vrot.lane.b32.xlu0 %v10731_v2, %s10638_s21 }
  0x96   : > { %v190_v15 = vpop.permute.xlu0 %189 }
  0x97   : > { %8979 = vmatmul.mubr.msk.bf16.vlgmr.msra.gmra.mrb[0].mxu1 %vm208_vm1, %v10432_v13  ;;  %v200_v16 = vsel %vm199_vm0, %v190_v15, %v192_v7  ;;  %2252 = vrot.lane.b32.xlu1 %v10736_v3, %s10638_s21 }
  0x98   : > { %216 = vmatpush1.bf16.msra.mxu0 %v200_v16  ;;  %395 = vmatpush1.bf16.msra.mxu1 %v10741_v4 }
  0x99   : > { %341 = vmatprep.subr.bf16.mxu0 %v10731_v2  ;;  %v469_v17 = vpop.permute.xlu1 %468  ;;  %310 = vmatprep.mubr.bf16.mxu1 %v10625_v0 }
  0x9a   : > { %v467_v18 = vpop.permute.xlu0 %466  ;;  %2250 = vrot.lane.b32.xlu0 %v10728_v1, %s10638_s21 }
  0x9b   : > { %8977 = vmatmul.mubr.msk.bf16.vlgmr.msra.gmra.mrb[0].mxu0 %vm208_vm1, %v10432_v13  ;;  %v474_v20 = vsel %vm472_vm2, %v465_v14, %v467_v18  ;;  %2408 = vrot.lane.b32.xlu1 %v10731_v2, %s12407_s24  ;;  %v475_v27 = vsel %vm472_vm2, %v467_v18, %v469_v17 }
  0x9c   : > { %342 = vmatpush1.bf16.msra.mxu0 %v10744_v5  ;;  %257 = vmatprep.mubr.bf16.mxu0 %v10625_v0 }
  0x9d   : > { %v463_v21 = vpop.permute.xlu1 %462  ;;  %487 = vmatprep.subr.bf16.mxu0 %v474_v20  ;;  %v10443_v20 = vld [vmem:[%s12387_s1 + $0x58] sm:$0xff]  }
  0x9e   : > { %v471_v22 = vpop.permute.xlu0 %470  ;;  %2244 = vrot.lane.b32.xlu0 %v10744_v5, %s10638_s21  ;;  %v473_v31 = vsel %vm472_vm2, %v463_v21, %v465_v14 }
  0x9f   : > { %8980 = vmatmul.mubr.msk.bf16.gmra.mrb[4].mxu1 %vm208_vm1, %v10433_v19  ;;  %v476_v23 = vsel %vm472_vm2, %v469_v17, %v471_v22  ;;  %2412 = vrot.lane.b32.xlu1 %v10728_v1, %s12407_s24 }
  0xa0   : > { %426 = vmatprep.mubr.bf16.mxu1 %v10625_v0  ;;  %540 = vmatprep.subr.bf16.mxu1 %v476_v23  ;;  %v10444_v23 = vld [vmem:[%s12387_s1 + $0x60] sm:$0xff]  }
  0xa1   : > { %v629_v24 = vpop.permute.xlu1 %628 }
  0xa2   : > { %v627_v25 = vpop.permute.xlu0 %626  ;;  %2410 = vrot.lane.b32.xlu0 %v10741_v4, %s12407_s24 }
  0xa3   : > { %8978 = vmatmul.mubr.msk.bf16.gmra.mrb[4].mxu0 %vm208_vm1, %v10433_v19  ;;  %2406 = vrot.lane.b32.xlu1 %v10744_v5, %s12407_s24  ;;  %v636_v33 = vsel %vm634_vm3, %v627_v25, %v629_v24 }
  0xa4   : > { %373 = vmatprep.mubr.bf16.mxu0 %v10625_v0 }
  0xa5   : > { %v633_v28 = vpop.permute.xlu1 %632 }
  0xa6   : > { %v631_v29 = vpop.permute.xlu0 %630  ;;  %2414 = vrot.lane.b32.xlu0 %v10736_v3, %s12407_s24  ;;  %s10651_s24 = smov 34  }
  0xa7   : > { %8985 = vmatmul.mubr.msk.bf16.vlgmr.msra.gmra.mrb[0].mxu1 %vm208_vm1, %v10434_v26  ;;  %v638_v30 = vsel %vm634_vm3, %v631_v29, %v633_v28  ;;  %2572 = vrot.lane.b32.xlu1 %v10741_v4, %s12389_s22  ;;  %v637_v40 = vsel %vm634_vm3, %v629_v24, %v631_v29 }
  0xa8   : > { %541 = vmatpush1.bf16.msra.mxu1 %v475_v27  ;;  %436 = vmatprep.mubr.bf16.mxu1 %v10625_v0 }
  0xa9   : > { %702 = vmatprep.subr.bf16.mxu1 %v638_v30  ;;  %v789_v35 = vpop.permute.xlu1 %788 }
  0xaa   : > { %v625_v32 = vpop.permute.xlu0 %624  ;;  %2570 = vrot.lane.b32.xlu0 %v10731_v2, %s12389_s22 }
  0xab   : > { %8983 = vmatmul.mubr.msk.bf16.vlgmr.msra.gmra.mrb[0].mxu0 %vm208_vm1, %v10434_v26  ;;  %2576 = vrot.lane.b32.xlu1 %v10736_v3, %s12389_s22  ;;  %v635_v42 = vsel %vm634_vm3, %v625_v32, %v627_v25 }
  0xac   : > { %488 = vmatpush1.bf16.msra.mxu0 %v473_v31  ;;  %383 = vmatprep.mubr.bf16.mxu0 %v10625_v0  ;;  %v10445_v31 = vld [vmem:[%s12387_s1 + $0x68] sm:$0xff]  }
  0xad   : > { %649 = vmatprep.subr.bf16.mxu0 %v636_v33  ;;  %v793_v38 = vpop.permute.xlu1 %792 }
  0xae   : > { %v791_v36 = vpop.permute.xlu0 %790  ;;  %2574 = vrot.lane.b32.xlu0 %v10728_v1, %s12389_s22 }
  0xaf   : > { %8986 = vmatmul.mubr.msk.bf16.gmra.mrb[4].mxu1 %vm208_vm1, %v10435_v34  ;;  %2732 = vrot.lane.b32.xlu1 %v10731_v2, %s12391_s17  ;;  %v798_v44 = vsel %vm796_vm4, %v789_v35, %v791_v36  ;;  %v799_v53 = vsel %vm796_vm4, %v791_v36, %v793_v38 }
  0xb0   : > { %572 = vmatprep.mubr.bf16.mxu1 %v10625_v0 }
  0xb1   : > { %v787_v43 = vpop.permute.xlu1 %786 }
  0xb2   : > { %2568 = vrot.lane.b32.xlu0 %v10744_v5, %s12389_s22  ;;  %v795_v39 = vpop.permute.xlu0 %794  ;;  %s12393_s22 = smov 6   ;;  %v797_v57 = vsel %vm796_vm4, %v787_v43, %v789_v35 }
  0xb3   : > { %8984 = vmatmul.mubr.msk.bf16.gmra.mrb[4].mxu0 %vm208_vm1, %v10435_v34  ;;  %2736 = vrot.lane.b32.xlu1 %v10728_v1, %s12391_s17  ;;  %v800_v41 = vsel %vm796_vm4, %v793_v38, %v795_v39  ;;  %v10446_v34 = vld [vmem:[%s12387_s1 + $0x70] sm:$0xff]  }
  0xb4   : > { %519 = vmatprep.mubr.bf16.mxu0 %v10625_v0 }
  0xb5   : > { %v953_v47 = vpop.permute.xlu1 %952 }
  0xb6   : > { %2734 = vrot.lane.b32.xlu0 %v10741_v4, %s12391_s17  ;;  %v951_v46 = vpop.permute.xlu0 %950 }
  0xb7   : > { %8995 = vmatmul.mubr.msk.bf16.vlgmr.msra.gmra.mrb[0].mxu1 %vm208_vm1, %v10436_v37  ;;  %2730 = vrot.lane.b32.xlu1 %v10744_v5, %s12391_s17  ;;  %v960_v59 = vsel %vm958_vm5, %v951_v46, %v953_v47 }
  0xb8   : > { %703 = vmatpush1.bf16.msra.mxu1 %v637_v40  ;;  %582 = vmatprep.mubr.bf16.mxu1 %v10625_v0 }
  0xb9   : > { %864 = vmatprep.subr.bf16.mxu1 %v800_v41  ;;  %v957_v51 = vpop.permute.xlu1 %956 }
  0xba   : > { %2738 = vrot.lane.b32.xlu0 %v10736_v3, %s12391_s17  ;;  %v955_v50 = vpop.permute.xlu0 %954  ;;  %s12395_s17 = smov 56  }
  0xbb   : > { %8993 = vmatmul.mubr.msk.bf16.vlgmr.msra.gmra.mrb[0].mxu0 %vm208_vm1, %v10436_v37  ;;  %2896 = vrot.lane.b32.xlu1 %v10741_v4, %s12393_s22  ;;  %v962_v54 = vsel %vm958_vm5, %v955_v50, %v957_v51  ;;  %v961_v4 = vsel %vm958_vm5, %v953_v47, %v955_v50 }
  0xbc   : > { %650 = vmatpush1.bf16.msra.mxu0 %v635_v42  ;;  %529 = vmatprep.mubr.bf16.mxu0 %v10625_v0  ;;  %v10447_v42 = vld [vmem:[%s12387_s1 + $0x78] sm:$0xff]  }
  0xbd   : > { %811 = vmatprep.subr.bf16.mxu0 %v798_v44  ;;  %v1113_v62 = vpop.permute.xlu1 %1112 }
  0xbe   : > { %2894 = vrot.lane.b32.xlu0 %v10731_v2, %s12393_s22  ;;  %v949_v58 = vpop.permute.xlu0 %948 }
  0xbf   : > { %8996 = vmatmul.mubr.msk.bf16.gmra.mrb[4].mxu1 %vm208_vm1, %v10437_v45  ;;  %2900 = vrot.lane.b32.xlu1 %v10736_v3, %s12393_s22  ;;  %v959_v6 = vsel %vm958_vm5, %v949_v58, %v951_v46 }
  0xc0   : > { %734 = vmatprep.mubr.bf16.mxu1 %v10625_v0 }
  0xc1   : > { %v1117_v2 = vpop.permute.xlu1 %1116 }
  0xc2   : > { %2898 = vrot.lane.b32.xlu0 %v10728_v1, %s12393_s22  ;;  %v1115_v63 = vpop.permute.xlu0 %1114  ;;  %v10440_v1 = vld [vmem:[%s12387_s1 + $0x40] sm:$0xff]  }
  0xc3   : > { %8994 = vmatmul.mubr.msk.bf16.gmra.mrb[4].mxu0 %vm208_vm1, %v10437_v45  ;;  %3083 = vrot.lane.b32.xlu1 %v10966_v48, %s12395_s17  ;;  %v1122_v8 = vsel %vm1120_vm6, %v1113_v62, %v1115_v63  ;;  %v1123_v15 = vsel %vm1120_vm6, %v1115_v63, %v1117_v2  ;;  %v10448_v45 = vld [vmem:[%s12387_s1 + $0x80] sm:$0xff]  }
  0xc4   : > { %681 = vmatprep.mubr.bf16.mxu0 %v10625_v0 }
  0xc5   : > { %v1111_v7 = vpop.permute.xlu1 %1110 }
  0xc6   : > { %2892 = vrot.lane.b32.xlu0 %v10744_v5, %s12393_s22  ;;  %s12397_s22 = smov 55   ;;  %v1119_v3 = vpop.permute.xlu0 %1118  ;;  %v1121_v17 = vsel %vm1120_vm6, %v1111_v7, %v1113_v62 }
  0xc7   : > { %9005 = vmatmul.mubr.msk.bf16.vlgmr.msra.gmra.mrb[0].mxu1 %vm208_vm1, %v10438_v49  ;;  %3087 = vrot.lane.b32.xlu1 %v10978_v52, %s12395_s17  ;;  %v1124_v5 = vsel %vm1120_vm6, %v1117_v2, %v1119_v3 }
  0xc8   : > { %865 = vmatpush1.bf16.msra.mxu1 %v799_v53  ;;  %744 = vmatprep.mubr.bf16.mxu1 %v10625_v0 }
  0xc9   : > { %1026 = vmatprep.subr.bf16.mxu1 %v962_v54  ;;  %v1277_v11 = vpop.permute.xlu1 %1276 }
  0xca   : > { %3085 = vrot.lane.b32.xlu0 %v10986_v55, %s12395_s17  ;;  %v1275_v10 = vpop.permute.xlu0 %1274 }
  0xcb   : > { %9003 = vmatmul.mubr.msk.bf16.vlgmr.msra.gmra.mrb[0].mxu0 %vm208_vm1, %v10438_v49  ;;  %3081 = vrot.lane.b32.xlu1 %v10992_v56, %s12395_s17  ;;  %v1284_v19 = vsel %vm1282_vm7, %v1275_v10, %v1277_v11 }
  0xcc   : > { %812 = vmatpush1.bf16.msra.mxu0 %v797_v57  ;;  %691 = vmatprep.mubr.bf16.mxu0 %v10625_v0  ;;  %v10449_v57 = vld [vmem:[%s12387_s1 + $0x88] sm:$0xff]  }
  0xcd   : > { %973 = vmatprep.subr.bf16.mxu0 %v960_v59  ;;  %v1281_v14 = vpop.permute.xlu1 %1280 }
  0xce   : > { %3089 = vrot.lane.b32.xlu0 %v11000_v60, %s12395_s17  ;;  %s12399_s17 = smov 54   ;;  %v1279_v13 = vpop.permute.xlu0 %1278 }
  0xcf   : > { %9006 = vmatmul.mubr.msk.bf16.gmra.mrb[4].mxu1 %vm208_vm1, %v10439_v61  ;;  %3247 = vrot.lane.b32.xlu1 %v10986_v55, %s12397_s22  ;;  %v1286_v16 = vsel %vm1282_vm7, %v1279_v13, %v1281_v14  ;;  %v1285_v26 = vsel %vm1282_vm7, %v1277_v11, %v1279_v13  ;;  %v10460_v13 = vld [vmem:[%s12387_s1 + $0xa8] sm:$0xff]   ;;  %v11223_v14 = vld [vmem:[%s10725_s25 + $0x1c] ss:$40 sps:$4 sm:$0xff]  }
  0xd0   : > { %896 = vmatprep.mubr.bf16.mxu1 %v10625_v0 }
  0xd1   : > { %v1437_v21 = vpop.permute.xlu1 %1436 }
  0xd2   : > { %3245 = vrot.lane.b32.xlu0 %v10966_v48, %s12397_s22  ;;  %v1273_v18 = vpop.permute.xlu0 %1272 }
  0xd3   : > { %9004 = vmatmul.mubr.msk.bf16.gmra.mrb[4].mxu0 %vm208_vm1, %v10439_v61  ;;  %3251 = vrot.lane.b32.xlu1 %v11000_v60, %s12397_s22  ;;  %v1283_v28 = vsel %vm1282_vm7, %v1273_v18, %v1275_v10  ;;  %v10452_v61 = vld [vmem:[%s12387_s1 + $0x90] sm:$0xff]  }
  0xd4   : > { %843 = vmatprep.mubr.bf16.mxu0 %v10625_v0  ;;  %v11233_v18 = vld [vmem:[%s10725_s25 + $0x10] ss:$40 sps:$4 sm:$0xff]  }
  0xd5   : > { %v1441_v24 = vpop.permute.xlu1 %1440 }
  0xd6   : > { %3249 = vrot.lane.b32.xlu0 %v10978_v52, %s12397_s22  ;;  %v1439_v22 = vpop.permute.xlu0 %1438 }
  0xd7   : > { %9015 = vmatmul.mubr.msk.bf16.vlgmr.msra.gmra.mrb[0].mxu1 %vm208_vm1, %v10440_v1  ;;  %3407 = vrot.lane.b32.xlu1 %v10966_v48, %s12399_s17  ;;  %v1446_v30 = vsel %vm1444_vm8, %v1437_v21, %v1439_v22  ;;  %v1447_v37 = vsel %vm1444_vm8, %v1439_v22, %v1441_v24 }
  0xd8   : > { %1027 = vmatpush1.bf16.msra.mxu1 %v961_v4  ;;  %906 = vmatprep.mubr.bf16.mxu1 %v10625_v0 }
  0xd9   : > { %1188 = vmatprep.subr.bf16.mxu1 %v1124_v5  ;;  %v1435_v29 = vpop.permute.xlu1 %1434 }
  0xda   : > { %3243 = vrot.lane.b32.xlu0 %v10992_v56, %s12397_s22  ;;  %s12401_s22 = smov 46   ;;  %v1443_v25 = vpop.permute.xlu0 %1442  ;;  %v1445_v39 = vsel %vm1444_vm8, %v1435_v29, %v1437_v21 }
  0xdb   : > { %9013 = vmatmul.mubr.msk.bf16.vlgmr.msra.gmra.mrb[0].mxu0 %vm208_vm1, %v10440_v1  ;;  %3411 = vrot.lane.b32.xlu1 %v10978_v52, %s12399_s17  ;;  %v1448_v27 = vsel %vm1444_vm8, %v1441_v24, %v1443_v25 }
  0xdc   : > { %974 = vmatpush1.bf16.msra.mxu0 %v959_v6  ;;  %853 = vmatprep.mubr.bf16.mxu0 %v10625_v0 }
  0xdd   : > { %1135 = vmatprep.subr.bf16.mxu0 %v1122_v8  ;;  %v1601_v33 = vpop.permute.xlu1 %1600  ;;  %v11206_v8 = vld [vmem:[%s10725_s25 + $0x14] ss:$40 sps:$4 sm:$0xff]  }
  0xde   : > { %3409 = vrot.lane.b32.xlu0 %v10986_v55, %s12399_s17  ;;  %v1599_v32 = vpop.permute.xlu0 %1598 }
  0xdf   : > { %9016 = vmatmul.mubr.msk.bf16.gmra.mrb[4].mxu1 %vm208_vm1, %v10441_v9  ;;  %3405 = vrot.lane.b32.xlu1 %v10992_v56, %s12399_s17  ;;  %v1608_v41 = vsel %vm1606_vm9, %v1599_v32, %v1601_v33 }
  0xe0   : > { %1058 = vmatprep.mubr.bf16.mxu1 %v10625_v0 }
  0xe1   : > { %v1605_v36 = vpop.permute.xlu1 %1604 }
  0xe2   : > { %3413 = vrot.lane.b32.xlu0 %v11000_v60, %s12399_s17  ;;  %s12403_s17 = smov 45   ;;  %v1603_v35 = vpop.permute.xlu0 %1602 }
  0xe3   : > { %9014 = vmatmul.mubr.msk.bf16.gmra.mrb[4].mxu0 %vm208_vm1, %v10441_v9  ;;  %3571 = vrot.lane.b32.xlu1 %v10986_v55, %s12401_s22  ;;  %v1610_v38 = vsel %vm1606_vm9, %v1603_v35, %v1605_v36  ;;  %v1609_v49 = vsel %vm1606_vm9, %v1601_v33, %v1603_v35 }
  0xe4   : > { %1005 = vmatprep.mubr.bf16.mxu0 %v10625_v0 }
  0xe5   : > { %v1761_v43 = vpop.permute.xlu1 %1760 }
  0xe6   : > { %3569 = vrot.lane.b32.xlu0 %v10966_v48, %s12401_s22  ;;  %v1597_v40 = vpop.permute.xlu0 %1596 }
  0xe7   : > { %9025 = vmatmul.mubr.msk.bf16.vlgmr.msra.gmra.mrb[0].mxu1 %vm208_vm1, %v10442_v12  ;;  %3575 = vrot.lane.b32.xlu1 %v11000_v60, %s12401_s22  ;;  %v1607_v51 = vsel %vm1606_vm9, %v1597_v40, %v1599_v32 }
  0xe8   : > { %1189 = vmatpush1.bf16.msra.mxu1 %v1123_v15  ;;  %1068 = vmatprep.mubr.bf16.mxu1 %v10625_v0  ;;  %v11226_v15 = vld [vmem:[%s10725_s25 + $0x18] ss:$40 sps:$4 sm:$0xff]  }
  0xe9   : > { %1350 = vmatprep.subr.bf16.mxu1 %v1286_v16  ;;  %v1765_v46 = vpop.permute.xlu1 %1764 }
  0xea   : > { %3573 = vrot.lane.b32.xlu0 %v10978_v52, %s12401_s22  ;;  %v1763_v44 = vpop.permute.xlu0 %1762 }
  0xeb   : > { %9023 = vmatmul.mubr.msk.bf16.vlgmr.msra.gmra.mrb[0].mxu0 %vm208_vm1, %v10442_v12  ;;  %3731 = vrot.lane.b32.xlu1 %v10966_v48, %s12403_s17  ;;  %v1770_v54 = vsel %vm1768_vm10, %v1761_v43, %v1763_v44  ;;  %v1771_v1 = vsel %vm1768_vm10, %v1763_v44, %v1765_v46 }
  0xec   : > { %1136 = vmatpush1.bf16.msra.mxu0 %v1121_v17  ;;  %1015 = vmatprep.mubr.bf16.mxu0 %v10625_v0 }
  0xed   : > { %1297 = vmatprep.subr.bf16.mxu0 %v1284_v19  ;;  %v1759_v53 = vpop.permute.xlu1 %1758  ;;  %v11237_v19 = vld [vmem:[%s10725_s25 + $0x20] ss:$40 sps:$4 sm:$0xff]  }
  0xee   : > { %3567 = vrot.lane.b32.xlu0 %v10992_v56, %s12401_s22  ;;  %s12405_s22 = smov 44   ;;  %v1767_v47 = vpop.permute.xlu0 %1766  ;;  %v1769_v3 = vsel %vm1768_vm10, %v1759_v53, %v1761_v43 }
  0xef   : > { %9026 = vmatmul.mubr.msk.bf16.gmra.mrb[4].mxu1 %vm208_vm1, %v10443_v20  ;;  %3735 = vrot.lane.b32.xlu1 %v10978_v52, %s12403_s17  ;;  %v1772_v50 = vsel %vm1768_vm10, %v1765_v46, %v1767_v47 }
  0xf0   : > { %1220 = vmatprep.mubr.bf16.mxu1 %v10625_v0 }
  0xf1   : > { %v1925_v59 = vpop.permute.xlu1 %1924 }
  0xf2   : > { %3733 = vrot.lane.b32.xlu0 %v10986_v55, %s12403_s17  ;;  %v1923_v58 = vpop.permute.xlu0 %1922 }
  0xf3   : > { %9024 = vmatmul.mubr.msk.bf16.gmra.mrb[4].mxu0 %vm208_vm1, %v10443_v20  ;;  %3729 = vrot.lane.b32.xlu1 %v10992_v56, %s12403_s17  ;;  %v10461_v20 = vld [vmem:[%s12387_s1 + $0xb0] sm:$0xff]  }
  0xf4   : > { %1167 = vmatprep.mubr.bf16.mxu0 %v10625_v0 }
  0xf5   : > { %v1929_v63 = vpop.permute.xlu1 %1928 }
  0xf6   : > { %3737 = vrot.lane.b32.xlu0 %v11000_v60, %s12403_s17  ;;  %s12409_s17 = smov 36   ;;  %v1927_v62 = vpop.permute.xlu0 %1926 }
  0xf7   : > { %9035 = vmatmul.mubr.msk.bf16.vlgmr.msra.gmra.mrb[0].mxu1 %vm208_vm1, %v10444_v23  ;;  %3895 = vrot.lane.b32.xlu1 %v10986_v55, %s12405_s22  ;;  %v1934_v2 = vsel %vm1930_vm11, %v1927_v62, %v1929_v63  ;;  %v1933_v9 = vsel %vm1930_vm11, %v1925_v59, %v1927_v62 }
  0xf8   : > { %1351 = vmatpush1.bf16.msra.mxu1 %v1285_v26  ;;  %1230 = vmatprep.mubr.bf16.mxu1 %v10625_v0 }
  0xf9   : > { %1512 = vmatprep.subr.bf16.mxu1 %v1448_v27  ;;  %v2085_v5 = vpop.permute.xlu1 %2084 }
  0xfa   : > { %3893 = vrot.lane.b32.xlu0 %v10966_v48, %s12405_s22  ;;  %v1921_v4 = vpop.permute.xlu0 %1920 }
  0xfb   : > { %9033 = vmatmul.mubr.msk.bf16.vlgmr.msra.gmra.mrb[0].mxu0 %vm208_vm1, %v10444_v23  ;;  %3899 = vrot.lane.b32.xlu1 %v11000_v60, %s12405_s22  ;;  %v1931_v10 = vsel %vm1930_vm11, %v1921_v4, %v1923_v58 }
  0xfc   : > { %1298 = vmatpush1.bf16.msra.mxu0 %v1283_v28  ;;  %1177 = vmatprep.mubr.bf16.mxu0 %v10625_v0  ;;  %v10462_v28 = vld [vmem:[%s12387_s1 + $0xb8] sm:$0xff]  }
  0xfd   : > { %1459 = vmatprep.subr.bf16.mxu0 %v1446_v30 }
  0xfe   : > { %3897 = vrot.lane.b32.xlu0 %v10978_v52, %s12405_s22  ;;  %v2087_v6 = vpop.permute.xlu0 %2086 }
  0xff   : > { %9036 = vmatmul.mubr.msk.bf16.gmra.mrb[4].mxu1 %vm208_vm1, %v10445_v31  ;;  %4055 = vrot.lane.b32.xlu1 %v10966_v48, %s12409_s17  ;;  %v2094_v12 = vsel %vm2092_vm12, %v2085_v5, %v2087_v6 }
 0x100   : > { %1382 = vmatprep.mubr.bf16.mxu1 %v10625_v0 }
 0x102   : > { %3891 = vrot.lane.b32.xlu0 %v10992_v56, %s12405_s22  ;;  %v2091_v7 = vpop.permute.xlu0 %2090 }
 0x103   : > { %9034 = vmatmul.mubr.msk.bf16.gmra.mrb[4].mxu0 %vm208_vm1, %v10445_v31  ;;  %4059 = vrot.lane.b32.xlu1 %v10978_v52, %s12409_s17  ;;  %v10463_v31 = vld [vmem:[%s12387_s1 + $0xc0] sm:$0xff]  }
 0x104   : > { %1329 = vmatprep.mubr.bf16.mxu0 %v10625_v0 }
 0x106   : > { %4057 = vrot.lane.b32.xlu0 %v10986_v55, %s12409_s17 }
 0x107   : > { %9045 = vmatmul.mubr.msk.bf16.vlgmr.msra.gmra.mrb[0].mxu1 %vm208_vm1, %v10446_v34  ;;  %4053 = vrot.lane.b32.xlu1 %v10992_v56, %s12409_s17  ;;  %v2247_v16 = vpop.permute.xlu0 %2246 }
 0x108   : > { %1513 = vmatpush1.bf16.msra.mxu1 %v1447_v37  ;;  %1392 = vmatprep.mubr.bf16.mxu1 %v10625_v0 }
 0x109   : > { %1674 = vmatprep.subr.bf16.mxu1 %v1610_v38 }
 0x10a   : > { %4061 = vrot.lane.b32.xlu0 %v11000_v60, %s12409_s17  ;;  %s9523_s17 = sshll.u32 %s10691_s13, 12 }
 0x10b   : > { %9043 = vmatmul.mubr.msk.bf16.vlgmr.msra.gmra.mrb[0].mxu0 %vm208_vm1, %v10446_v34  ;;  %4219 = vrot.lane.b32.xlu1 %v10986_v55, %s12411_s23 }
 0x10c   : > { %1460 = vmatpush1.bf16.msra.mxu0 %v1445_v39  ;;  %1339 = vmatprep.mubr.bf16.mxu0 %v10625_v0  ;;  %v2251_v21 = vpop.permute.xlu0 %2250  ;;  %v10464_v39 = vld [vmem:[%s12387_s1 + $0xc8] sm:$0xff]  }
 0x10d   : > { %1621 = vmatprep.subr.bf16.mxu0 %v1608_v41 }
 0x10e   : > { %4217 = vrot.lane.b32.xlu0 %v10966_v48, %s12411_s23 }
 0x10f   : > { %9046 = vmatmul.mubr.msk.bf16.gmra.mrb[4].mxu1 %vm208_vm1, %v10447_v42  ;;  %4223 = vrot.lane.b32.xlu1 %v11000_v60, %s12411_s23 }
 0x110   : > { %1544 = vmatprep.mubr.bf16.mxu1 %v10625_v0  ;;  %v2245_v26 = vpop.permute.xlu0 %2244 }
 0x111   : > { %v2255_v36 = vsel %vm2254_vm13, %v2245_v26, %v2247_v16 }
 0x112   : > { %4221 = vrot.lane.b32.xlu0 %v10978_v52, %s12411_s23 }
 0x113   : > { %9044 = vmatmul.mubr.msk.bf16.gmra.mrb[4].mxu0 %vm208_vm1, %v10447_v42  ;;  %4379 = vrot.lane.b32.xlu1 %v10966_v48, %s10651_s24  ;;  %v1932_v48 = vsel %vm1930_vm11, %v1923_v58, %v1925_v59  ;;  %v10465_v42 = vld [vmem:[%s12387_s1 + $0xd0] sm:$0xff]  }
 0x114   : > { %1491 = vmatprep.mubr.bf16.mxu0 %v10625_v0  ;;  %v2411_v30 = vpop.permute.xlu0 %2410 }
 0x116   : > { %4215 = vrot.lane.b32.xlu0 %v10992_v56, %s12411_s23  ;;  %s12428_s23 = smov 6  }
 0x117   : > { %9055 = vmatmul.mubr.msk.bf16.vlgmr.msra.gmra.mrb[0].mxu1 %vm208_vm1, %v10448_v45  ;;  %4383 = vrot.lane.b32.xlu1 %v10978_v52, %s10651_s24  ;;  %v10459_v52 = vld [vmem:[%s12387_s1 + $0xa0] sm:$0xff]  }
 0x118   : > { %1675 = vmatpush1.bf16.msra.mxu1 %v1609_v49  ;;  %1554 = vmatprep.mubr.bf16.mxu1 %v10625_v0  ;;  %v2415_v33 = vpop.permute.xlu0 %2414 }
 0x119   : > { %1836 = vmatprep.subr.bf16.mxu1 %v1772_v50 }
 0x11a   : > { %4381 = vrot.lane.b32.xlu0 %v10986_v55, %s10651_s24  ;;  %v10457_v55 = vld [vmem:[%s12387_s1 + $0x98] sm:$0xff]  }
 0x11b   : > { %9053 = vmatmul.mubr.msk.bf16.vlgmr.msra.gmra.mrb[0].mxu0 %vm208_vm1, %v10448_v45  ;;  %4377 = vrot.lane.b32.xlu1 %v10992_v56, %s10651_s24 }
 0x11c   : > { %1622 = vmatpush1.bf16.msra.mxu0 %v1607_v51  ;;  %1501 = vmatprep.mubr.bf16.mxu0 %v10625_v0  ;;  %v2571_v40 = vpop.permute.xlu0 %2570  ;;  %v10466_v51 = vld [vmem:[%s12387_s1 + $0xd8] sm:$0xff]  }
 0x11d   : > { %1783 = vmatprep.subr.bf16.mxu0 %v1770_v54 }
 0x11e   : > { %4385 = vrot.lane.b32.xlu0 %v11000_v60, %s10651_s24  ;;  %v2089_v60 = vpop.permute.xlu1 %2088 }
 0x11f   : > { %9056 = vmatmul.mubr.msk.bf16.gmra.mrb[4].mxu1 %vm208_vm1, %v10449_v57  ;;  %v2096_v56 = vsel %vm2092_vm12, %v2089_v60, %v2091_v7  ;;  %4589 = vrot.lane.b32.xlu1 %v11226_v15, %s10626_s26  ;;  %v2095_v23 = vsel %vm2092_vm12, %v2087_v6, %v2089_v60 }
 0x120   : > { %1706 = vmatprep.mubr.bf16.mxu1 %v10625_v0  ;;  %v2575_v43 = vpop.permute.xlu0 %2574 }
 0x122   : > { %4587 = vrot.lane.b32.xlu0 %v11206_v8, %s10626_s26  ;;  %v2083_v11 = vpop.permute.xlu1 %2082 }
 0x123   : > { %9054 = vmatmul.mubr.msk.bf16.gmra.mrb[4].mxu0 %vm208_vm1, %v10449_v57  ;;  %4593 = vrot.lane.b32.xlu1 %v11237_v19, %s10626_s26  ;;  %v2093_v25 = vsel %vm2092_vm12, %v2083_v11, %v2085_v5  ;;  %v10467_v57 = vld [vmem:[%s12387_s1 + $0xe0] sm:$0xff]  }
 0x124   : > { %1653 = vmatprep.mubr.bf16.mxu0 %v10625_v0  ;;  %v2569_v49 = vpop.permute.xlu0 %2568 }
 0x125   : > { %v2579_v63 = vsel %vm12413_vm14, %v2569_v49, %v2571_v40  ;;  %v10482_v49 = vld [vmem:[%s12387_s1 + $0x128] sm:$0xff]  }
 0x126   : > { %v2249_v17 = vpop.permute.xlu1 %2248  ;;  %4591 = vrot.lane.b32.xlu0 %v11223_v14, %s10626_s26 }
 0x127   : > { %9065 = vmatmul.mubr.msk.bf16.vlgmr.msra.gmra.mrb[0].mxu1 %vm208_vm1, %v10452_v61  ;;  %4857 = vrot.lane.b32.xlu1 %v11206_v8, %s10627_s27  ;;  %v2256_v27 = vsel %vm2254_vm13, %v2247_v16, %v2249_v17  ;;  %v2257_v34 = vsel %vm2254_vm13, %v2249_v17, %v2251_v21 }
 0x128   : > { %1837 = vmatpush1.bf16.msra.mxu1 %v1771_v1  ;;  %1716 = vmatprep.mubr.bf16.mxu1 %v10625_v0  ;;  %v2735_v54 = vpop.permute.xlu0 %2734 }
 0x129   : > { %1998 = vmatprep.subr.bf16.mxu1 %v1934_v2 }
 0x12a   : > { %4585 = vrot.lane.b32.xlu0 %v11233_v18, %s10626_s26  ;;  %v2253_v22 = vpop.permute.xlu1 %2252  ;;  %s12427_s26 = smov 7  }
 0x12b   : > { %9063 = vmatmul.mubr.msk.bf16.vlgmr.msra.gmra.mrb[0].mxu0 %vm208_vm1, %v10452_v61  ;;  %v2258_v24 = vsel %vm2254_vm13, %v2251_v21, %v2253_v22  ;;  %4861 = vrot.lane.b32.xlu1 %v11223_v14, %s10627_s27 }
 0x12c   : > { %1784 = vmatpush1.bf16.msra.mxu0 %v1769_v3  ;;  %1663 = vmatprep.mubr.bf16.mxu0 %v10625_v0  ;;  %v2739_v59 = vpop.permute.xlu0 %2738  ;;  %v10468_v3 = vld [vmem:[%s12387_s1 + $0xe8] sm:$0xff]  }
 0x12d   : > { %1945 = vmatprep.subr.bf16.mxu0 %v1932_v48 }
 0x12e   : > { %4859 = vrot.lane.b32.xlu0 %v11226_v15, %s10627_s27  ;;  %v2409_v29 = vpop.permute.xlu1 %2408 }
 0x12f   : > { %9066 = vmatmul.mubr.msk.bf16.gmra.mrb[4].mxu1 %vm208_vm1, %v10457_v55  ;;  %4855 = vrot.lane.b32.xlu1 %v11233_v18, %s10627_s27  ;;  %v2418_v38 = vsel %vm208_vm1, %v2409_v29, %v2411_v30 }
 0x130   : > { %1868 = vmatprep.mubr.bf16.mxu1 %v10625_v0  ;;  %v2895_v4 = vpop.permute.xlu0 %2894 }
 0x132   : > { %4863 = vrot.lane.b32.xlu0 %v11237_v19, %s10627_s27  ;;  %v2413_v32 = vpop.permute.xlu1 %2412  ;;  %s12425_s27 = smov 16  }
 0x133   : > { %9064 = vmatmul.mubr.msk.bf16.gmra.mrb[4].mxu0 %vm208_vm1, %v10457_v55  ;;  %5019 = vrot.lane.b32.xlu1 %v11226_v15, %s10628_s28  ;;  %v2420_v35 = vsel %vm208_vm1, %v2413_v32, %v2415_v33  ;;  %v2419_v45 = vsel %vm208_vm1, %v2411_v30, %v2413_v32  ;;  %v10469_v55 = vld [vmem:[%s12387_s1 + $0xf0] sm:$0xff]  }
 0x134   : > { %1815 = vmatprep.mubr.bf16.mxu0 %v10625_v0  ;;  %v2899_v5 = vpop.permute.xlu0 %2898 }
 0x136   : > { %5017 = vrot.lane.b32.xlu0 %v11206_v8, %s10628_s28  ;;  %v2407_v37 = vpop.permute.xlu1 %2406 }
 0x137   : > { %9075 = vmatmul.mubr.msk.bf16.vlgmr.msra.gmra.mrb[0].mxu1 %vm208_vm1, %v10459_v52  ;;  %5023 = vrot.lane.b32.xlu1 %v11237_v19, %s10628_s28  ;;  %v2417_v47 = vsel %vm208_vm1, %v2407_v37, %v2409_v29 }
 0x138   : > { %1999 = vmatpush1.bf16.msra.mxu1 %v1933_v9  ;;  %1878 = vmatprep.mubr.bf16.mxu1 %v10625_v0  ;;  %v2893_v9 = vpop.permute.xlu0 %2892 }
 0x139   : > { %2160 = vmatprep.subr.bf16.mxu1 %v2096_v56 }
 0x13a   : > { %5021 = vrot.lane.b32.xlu0 %v11223_v14, %s10628_s28  ;;  %v2573_v41 = vpop.permute.xlu1 %2572 }
 0x13b   : > { %9073 = vmatmul.mubr.msk.bf16.vlgmr.msra.gmra.mrb[0].mxu0 %vm208_vm1, %v10459_v52  ;;  %5177 = vrot.lane.b32.xlu1 %v11206_v8, %s10629_s29  ;;  %v2580_v50 = vsel %vm12413_vm14, %v2571_v40, %v2573_v41  ;;  %v2581_v61 = vsel %vm12413_vm14, %v2573_v41, %v2575_v43 }
 0x13c   : > { %1946 = vmatpush1.bf16.msra.mxu0 %v1931_v10  ;;  %1825 = vmatprep.mubr.bf16.mxu0 %v10625_v0  ;;  %v10470_v10 = vld [vmem:[%s12387_s1 + $0xf8] sm:$0xff]  }
 0x13d   : > { %2107 = vmatprep.subr.bf16.mxu0 %v2094_v12  ;;  %v3086_v12 = vpop.permute.xlu0 %3085 }
 0x13e   : > { %5015 = vrot.lane.b32.xlu0 %v11233_v18, %s10628_s28  ;;  %v2577_v44 = vpop.permute.xlu1 %2576  ;;  %s10652_s28 = smov [#allocation2]  }
 0x13f   : > { %9076 = vmatmul.mubr.msk.bf16.gmra.mrb[4].mxu1 %vm208_vm1, %v10460_v13  ;;  %5181 = vrot.lane.b32.xlu1 %v11223_v14, %s10629_s29  ;;  %v2582_v46 = vsel %vm12413_vm14, %v2575_v43, %v2577_v44  ;;  %vm12415_vm14 = vcmask 48128  }
 0x140   : > { %2030 = vmatprep.mubr.bf16.mxu1 %v10625_v0  ;;  %v2903_v22 = vsel %vm12415_vm14, %v2893_v9, %v2895_v4 }
 0x141   : > { %v3090_v17 = vpop.permute.xlu0 %3089 }
 0x142   : > { %5179 = vrot.lane.b32.xlu0 %v11226_v15, %s10629_s29  ;;  %v2733_v53 = vpop.permute.xlu1 %2732 }
 0x143   : > { %9074 = vmatmul.mubr.msk.bf16.gmra.mrb[4].mxu0 %vm208_vm1, %v10460_v13  ;;  %5175 = vrot.lane.b32.xlu1 %v11233_v18, %s10629_s29  ;;  %v2742_v2 = vsel %vm12414_vm15, %v2733_v53, %v2735_v54  ;;  %v10471_v13 = vld [vmem:[%s12387_s1 + $0x100] sm:$0xff]  }
 0x144   : > { %1977 = vmatprep.mubr.bf16.mxu0 %v10625_v0 }
 0x145   : > { %v3246_v26 = vpop.permute.xlu0 %3245 }
 0x146   : > { %5183 = vrot.lane.b32.xlu0 %v11237_v19, %s10629_s29  ;;  %v2737_v58 = vpop.permute.xlu1 %2736  ;;  %s12429_s29 = smov 56  }
 0x147   : > { %9085 = vmatmul.mubr.msk.bf16.vlgmr.msra.gmra.mrb[0].mxu1 %vm208_vm1, %v10461_v20  ;;  %5339 = vrot.lane.b32.xlu1 %v11226_v15, %s10630_s30  ;;  %v2744_v62 = vsel %vm12414_vm15, %v2737_v58, %v2739_v59  ;;  %v2743_v52 = vsel %vm12414_vm15, %v2735_v54, %v2737_v58 }
 0x148   : > { %2161 = vmatpush1.bf16.msra.mxu1 %v2095_v23  ;;  %2040 = vmatprep.mubr.bf16.mxu1 %v10625_v0 }
 0x149   : > { %2322 = vmatprep.subr.bf16.mxu1 %v2258_v24  ;;  %v3250_v29 = vpop.permute.xlu0 %3249 }
 0x14a   : > { %5337 = vrot.lane.b32.xlu0 %v11206_v8, %s10630_s30  ;;  %v2731_v1 = vpop.permute.xlu1 %2730 }
 0x14b   : > { %9083 = vmatmul.mubr.msk.bf16.vlgmr.msra.gmra.mrb[0].mxu0 %vm208_vm1, %v10461_v20  ;;  %5343 = vrot.lane.b32.xlu1 %v11237_v19, %s10630_s30  ;;  %v2741_v7 = vsel %vm12414_vm15, %v2731_v1, %v2733_v53  ;;  %vm12416_vm15 = vcmask 457728   ;;  %v10484_v53 = vld [vmem:[%s12387_s1 + $0x130] sm:$0xff]  }
 0x14c   : > { %2108 = vmatpush1.bf16.msra.mxu0 %v2093_v25  ;;  %1987 = vmatprep.mubr.bf16.mxu0 %v10625_v0  ;;  %v10472_v25 = vld [vmem:[%s12387_s1 + $0x108] sm:$0xff]  }
 0x14d   : > { %2269 = vmatprep.subr.bf16.mxu0 %v2256_v27 }
 0x14e   : > { %5341 = vrot.lane.b32.xlu0 %v11223_v14, %s10630_s30  ;;  %v2897_v48 = vpop.permute.xlu1 %2896 }
 0x14f   : > { %9086 = vmatmul.mubr.msk.bf16.gmra.mrb[4].mxu1 %vm208_vm1, %v10462_v28  ;;  %5497 = vrot.lane.b32.xlu1 %v11206_v8, %s10631_s3  ;;  %v2904_v56 = vsel %vm12415_vm14, %v2895_v4, %v2897_v48  ;;  %v2905_v20 = vsel %vm12415_vm14, %v2897_v48, %v2899_v5 }
 0x150   : > { %2192 = vmatprep.mubr.bf16.mxu1 %v10625_v0 }
 0x152   : > { %5335 = vrot.lane.b32.xlu0 %v11233_v18, %s10630_s30  ;;  %v2901_v6 = vpop.permute.xlu1 %2900 }
 0x153   : > { %9084 = vmatmul.mubr.msk.bf16.gmra.mrb[4].mxu0 %vm208_vm1, %v10462_v28  ;;  %5501 = vrot.lane.b32.xlu1 %v11223_v14, %s10631_s3  ;;  %v2906_v60 = vsel %vm12415_vm14, %v2899_v5, %v2901_v6  ;;  %v10473_v28 = vld [vmem:[%s12387_s1 + $0x110] sm:$0xff]   ;;  %vm12417_vm14 = vcmask 449536  }
 0x154   : > { %2139 = vmatprep.mubr.bf16.mxu0 %v10625_v0 }
 0x156   : > { %5499 = vrot.lane.b32.xlu0 %v11226_v15, %s10631_s3  ;;  %v3084_v11 = vpop.permute.xlu1 %3083 }
 0x157   : > { %9095 = vmatmul.mubr.msk.bf16.vlgmr.msra.gmra.mrb[0].mxu1 %vm208_vm1, %v10463_v31  ;;  %5495 = vrot.lane.b32.xlu1 %v11233_v18, %s10631_s3  ;;  %v3093_v24 = vsel %vm12416_vm15, %v3084_v11, %v3086_v12 }
 0x158   : > { %2323 = vmatpush1.bf16.msra.mxu1 %v2257_v34  ;;  %2202 = vmatprep.mubr.bf16.mxu1 %v10625_v0  ;;  %v3244_v34 = vpop.permute.xlu0 %3243 }
 0x159   : > { %2484 = vmatprep.subr.bf16.mxu1 %v2420_v35 }
 0x15a   : > { %5503 = vrot.lane.b32.xlu0 %v11237_v19, %s10631_s3  ;;  %v3088_v16 = vpop.permute.xlu1 %3087  ;;  %s12436_s3 = smov 35  }
 0x15b   : > { %9093 = vmatmul.mubr.msk.bf16.vlgmr.msra.gmra.mrb[0].mxu0 %vm208_vm1, %v10463_v31  ;;  %5659 = vrot.lane.b32.xlu1 %v11226_v15, %s10632_s4  ;;  %v3095_v21 = vsel %vm12416_vm15, %v3088_v16, %v3090_v17  ;;  %v3094_v31 = vsel %vm12416_vm15, %v3086_v12, %v3088_v16  ;;  %v10488_v17 = vld [vmem:[%s12387_s1 + $0x150] sm:$0xff]  }
 0x15c   : > { %2270 = vmatpush1.bf16.msra.mxu0 %v2255_v36  ;;  %2149 = vmatprep.mubr.bf16.mxu0 %v10625_v0  ;;  %v10474_v36 = vld [vmem:[%s12387_s1 + $0x118] sm:$0xff]  }
 0x15d   : > { %2431 = vmatprep.subr.bf16.mxu0 %v2418_v38  ;;  %v3410_v38 = vpop.permute.xlu0 %3409 }
 0x15e   : > { %5657 = vrot.lane.b32.xlu0 %v11206_v8, %s10632_s4  ;;  %v3082_v23 = vpop.permute.xlu1 %3081 }
 0x15f   : > { %9096 = vmatmul.mubr.msk.bf16.gmra.mrb[4].mxu1 %vm208_vm1, %v10464_v39  ;;  %5663 = vrot.lane.b32.xlu1 %v11237_v19, %s10632_s4  ;;  %v3092_v33 = vsel %vm12416_vm15, %v3082_v23, %v3084_v11  ;;  %vm12418_vm15 = vcmask 441344   ;;  %v10489_v23 = vld [vmem:[%s12387_s1 + $0x158] sm:$0xff]  }
 0x160   : > { %2354 = vmatprep.mubr.bf16.mxu1 %v10625_v0 }
 0x161   : > { %v3414_v41 = vpop.permute.xlu0 %3413 }
 0x162   : > { %5661 = vrot.lane.b32.xlu0 %v11223_v14, %s10632_s4  ;;  %v3248_v27 = vpop.permute.xlu1 %3247 }
 0x163   : > { %9094 = vmatmul.mubr.msk.bf16.gmra.mrb[4].mxu0 %vm208_vm1, %v10464_v39  ;;  %5817 = vrot.lane.b32.xlu1 %v11206_v8, %s10633_s5  ;;  %v3255_v35 = vsel %vm12417_vm14, %v3246_v26, %v3248_v27  ;;  %v10477_v39 = vld [vmem:[%s12387_s1 + $0x120] sm:$0xff]  }
 0x164   : > { %2301 = vmatprep.mubr.bf16.mxu0 %v10625_v0 }
 0x165   : > { %v11495_v44 = vpop.permute.xlu0 %3569 }
 0x166   : > { %5655 = vrot.lane.b32.xlu0 %v11233_v18, %s10632_s4  ;;  %v3252_v30 = vpop.permute.xlu1 %3251  ;;  %s12426_s4 = smov 8  }
 0x167   : > { %9105 = vmatmul.mubr.msk.bf16.vlgmr.msra.gmra.mrb[0].mxu1 %vm208_vm1, %v10465_v42  ;;  %5821 = vrot.lane.b32.xlu1 %v11223_v14, %s10633_s5  ;;  %v3257_v32 = vsel %vm12417_vm14, %v3250_v29, %v3252_v30 }
 0x168   : > { %2485 = vmatpush1.bf16.msra.mxu1 %v2419_v45  ;;  %2364 = vmatprep.mubr.bf16.mxu1 %v10625_v0  ;;  %v3254_v45 = vsel %vm12417_vm14, %v3244_v34, %v3246_v26 }
 0x169   : > { %2646 = vmatprep.subr.bf16.mxu1 %v2582_v46 }
 0x16a   : > { %5819 = vrot.lane.b32.xlu0 %v11226_v15, %s10633_s5  ;;  %v3408_v37 = vpop.permute.xlu1 %3407 }
 0x16b   : > { %9103 = vmatmul.mubr.msk.bf16.vlgmr.msra.gmra.mrb[0].mxu0 %vm208_vm1, %v10465_v42  ;;  %5815 = vrot.lane.b32.xlu1 %v11233_v18, %s10633_s5  ;;  %v3256_v42 = vsel %vm12417_vm14, %v3248_v27, %v3250_v29  ;;  %vm12419_vm14 = vcmask 375808  }
 0x16c   : > { %2432 = vmatpush1.bf16.msra.mxu0 %v2417_v47  ;;  %2311 = vmatprep.mubr.bf16.mxu0 %v10625_v0  ;;  %v3417_v47 = vsel %vm12418_vm15, %v3408_v37, %v3410_v38 }
 0x16d   : > { %2593 = vmatprep.subr.bf16.mxu0 %v2580_v50 }
 0x16e   : > { %5823 = vrot.lane.b32.xlu0 %v11237_v19, %s10633_s5  ;;  %v3412_v40 = vpop.permute.xlu1 %3411 }
 0x16f   : > { %9106 = vmatmul.mubr.msk.bf16.gmra.mrb[4].mxu1 %vm208_vm1, %v10466_v51  ;;  %5979 = vrot.lane.b32.xlu1 %v11226_v15, %s10634_s6  ;;  %v3419_v43 = vsel %vm12418_vm15, %v3412_v40, %v3414_v41  ;;  %v3418_v58 = vsel %vm12418_vm15, %v3410_v38, %v3412_v40 }
 0x170   : > { %2516 = vmatprep.mubr.bf16.mxu1 %v10625_v0 }
 0x172   : > { %5977 = vrot.lane.b32.xlu0 %v11206_v8, %s10634_s6  ;;  %v3406_v46 = vpop.permute.xlu1 %3405 }
 0x173   : > { %9104 = vmatmul.mubr.msk.bf16.gmra.mrb[4].mxu0 %vm208_vm1, %v10466_v51  ;;  %5983 = vrot.lane.b32.xlu1 %v11237_v19, %s10634_s6  ;;  %v3574_v51 = vpop.permute.xlu0 %3573 }
 0x174   : > { %2463 = vmatprep.mubr.bf16.mxu0 %v10625_v0 }
 0x176   : > { %5981 = vrot.lane.b32.xlu0 %v11223_v14, %s10634_s6  ;;  %v3572_v50 = vpop.permute.xlu1 %3571 }
 0x177   : > { %9115 = vmatmul.mubr.msk.bf16.vlgmr.msra.gmra.mrb[0].mxu1 %vm208_vm1, %v10467_v57  ;;  %6137 = vrot.lane.b32.xlu1 %v11206_v8, %s10635_s7  ;;  %v3579_v1 = vsel %vm12419_vm14, %v11495_v44, %v3572_v50  ;;  %v3580_v6 = vsel %vm12419_vm14, %v3572_v50, %v3574_v51 }
 0x178   : > { %2647 = vmatpush1.bf16.msra.mxu1 %v2581_v61  ;;  %2526 = vmatprep.mubr.bf16.mxu1 %v10625_v0 }
 0x179   : > { %2808 = vmatprep.subr.bf16.mxu1 %v2744_v62 }
 0x17a   : > { %5975 = vrot.lane.b32.xlu0 %v11233_v18, %s10634_s6  ;;  %v3576_v54 = vpop.permute.xlu1 %3575 }
 0x17b   : > { %9113 = vmatmul.mubr.msk.bf16.vlgmr.msra.gmra.mrb[0].mxu0 %vm208_vm1, %v10467_v57  ;;  %6141 = vrot.lane.b32.xlu1 %v11223_v14, %s10635_s7  ;;  %v3568_v57 = vpop.permute.xlu0 %3567  ;;  %v3581_v59 = vsel %vm12419_vm14, %v3574_v51, %v3576_v54 }
 0x17c   : > { %2594 = vmatpush1.bf16.msra.mxu0 %v2579_v63  ;;  %2473 = vmatprep.mubr.bf16.mxu0 %v10625_v0  ;;  %v3416_v63 = vsel %vm12418_vm15, %v3406_v46, %v3408_v37  ;;  %vm12420_vm15 = vcmask 367616   ;;  %v3578_v9 = vsel %vm12419_vm14, %v3568_v57, %v11495_v44  ;;  %vm12421_vm14 = vcmask 359424   ;;  %v10494_v46 = vld [vmem:[%s12387_s1 + $0x180] sm:$0xff]  }
 0x17d   : > { %2755 = vmatprep.subr.bf16.mxu0 %v2742_v2  ;;  %v10485_v2 = vld [vmem:[%s12387_s1 + $0x138] sm:$0xff]  }
 0x17e   : > { %6139 = vrot.lane.b32.xlu0 %v11226_v15, %s10635_s7  ;;  %v11531_v61 = vpop.permute.xlu1 %3731 }
 0x17f   : > { %9116 = vmatmul.mubr.msk.bf16.gmra.mrb[4].mxu1 %vm208_vm1, %v10468_v3  ;;  %6135 = vrot.lane.b32.xlu1 %v11233_v18, %s10635_s7  ;;  %v3734_v62 = vpop.permute.xlu0 %3733 }
 0x180   : > { %2678 = vmatprep.mubr.bf16.mxu1 %v10625_v0 }
 0x182   : > { %6143 = vrot.lane.b32.xlu0 %v11237_v19, %s10635_s7 }
 0x183   : > { %9114 = vmatmul.mubr.msk.bf16.gmra.mrb[4].mxu0 %vm208_vm1, %v10468_v3  ;;  %6299 = vrot.lane.b32.xlu1 %v11226_v15, %s10636_s8  ;;  %v3736_v3 = vpop.permute.xlu1 %3735  ;;  %v3738_v4 = vpop.permute.xlu0 %3737 }
 0x184   : > { %2625 = vmatprep.mubr.bf16.mxu0 %v10625_v0 }
 0x186   : > { %6297 = vrot.lane.b32.xlu0 %v11206_v8, %s10636_s8 }
 0x187   : > { %9125 = vmatmul.mubr.msk.bf16.vlgmr.msra.gmra.mrb[0].mxu1 %vm208_vm1, %v10469_v55  ;;  %6303 = vrot.lane.b32.xlu1 %v11237_v19, %s10636_s8  ;;  %v11551_v48 = vpop.permute.xlu0 %3893  ;;  %v3730_v5 = vpop.permute.xlu1 %3729 }
 0x188   : > { %2809 = vmatpush1.bf16.msra.mxu1 %v2743_v52  ;;  %2688 = vmatprep.mubr.bf16.mxu1 %v10625_v0  ;;  %v3743_v52 = vsel %vm12420_vm15, %v3736_v3, %v3738_v4 }
 0x189   : > { %2970 = vmatprep.subr.bf16.mxu1 %v2906_v60 }
 0x18a   : > { %6301 = vrot.lane.b32.xlu0 %v11223_v14, %s10636_s8 }
 0x18b   : > { %9123 = vmatmul.mubr.msk.bf16.vlgmr.msra.gmra.mrb[0].mxu0 %vm208_vm1, %v10469_v55  ;;  %6457 = vrot.lane.b32.xlu1 %v11206_v8, %s10637_s14  ;;  %v10486_v55 = vld [vmem:[%s12387_s1 + $0x140] sm:$0xff]   ;;  %v3898_v60 = vpop.permute.xlu0 %3897 }
 0x18c   : > { %2756 = vmatpush1.bf16.msra.mxu0 %v2741_v7  ;;  %2635 = vmatprep.mubr.bf16.mxu0 %v10625_v0  ;;  %v3896_v7 = vpop.permute.xlu1 %3895 }
 0x18d   : > { %2917 = vmatprep.subr.bf16.mxu0 %v2904_v56  ;;  %v3741_v56 = vsel %vm12420_vm15, %v11531_v61, %v3734_v62  ;;  %v3904_v27 = vsel %vm12421_vm14, %v3896_v7, %v3898_v60 }
 0x18e   : > { %6295 = vrot.lane.b32.xlu0 %v11233_v18, %s10636_s8  ;;  %s12435_s8 = smov 36  }
 0x18f   : > { %9126 = vmatmul.mubr.msk.bf16.gmra.mrb[4].mxu1 %vm208_vm1, %v10470_v10  ;;  %6461 = vrot.lane.b32.xlu1 %v11223_v14, %s10637_s14  ;;  %v3892_v11 = vpop.permute.xlu0 %3891 }
 0x190   : > { %2840 = vmatprep.mubr.bf16.mxu1 %v10625_v0  ;;  %v3900_v12 = vpop.permute.xlu1 %3899  ;;  %v3902_v29 = vsel %vm12421_vm14, %v3892_v11, %v11551_v48 }
 0x192   : > { %6459 = vrot.lane.b32.xlu0 %v11226_v15, %s10637_s14 }
 0x193   : > { %9124 = vmatmul.mubr.msk.bf16.gmra.mrb[4].mxu0 %vm208_vm1, %v10470_v10  ;;  %6455 = vrot.lane.b32.xlu1 %v11233_v18, %s10637_s14  ;;  %v10487_v10 = vld [vmem:[%s12387_s1 + $0x148] sm:$0xff]   ;;  %v4058_v16 = vpop.permute.xlu0 %4057 }
 0x194   : > { %2787 = vmatprep.mubr.bf16.mxu0 %v10625_v0 }
 0x196   : > { %6463 = vrot.lane.b32.xlu0 %v11237_v19, %s10637_s14  ;;  %s12431_s14 = smov 54  }
 0x197   : > { %9135 = vmatmul.mubr.msk.bf16.vlgmr.msra.gmra.mrb[0].mxu1 %vm208_vm1, %v10471_v13  ;;  %6619 = vrot.lane.b32.xlu1 %v11226_v15, %s10638_s21  ;;  %v4062_v26 = vpop.permute.xlu0 %4061 }
 0x198   : > { %2971 = vmatpush1.bf16.msra.mxu1 %v2905_v20  ;;  %2850 = vmatprep.mubr.bf16.mxu1 %v10625_v0  ;;  %v3742_v20 = vsel %vm12420_vm15, %v3734_v62, %v3736_v3  ;;  %v10496_v62 = vld [vmem:[%s12387_s1 + $0x190] sm:$0xff]  }
 0x199   : > { %3159 = vmatprep.subr.bf16.mxu1 %v3095_v21  ;;  %v3905_v21 = vsel %vm12421_vm14, %v3898_v60, %v3900_v12 }
 0x19a   : > { %6617 = vrot.lane.b32.xlu0 %v11206_v8, %s10638_s21 }
 0x19b   : > { %9133 = vmatmul.mubr.msk.bf16.vlgmr.msra.gmra.mrb[0].mxu0 %vm208_vm1, %v10471_v13  ;;  %6623 = vrot.lane.b32.xlu1 %v11237_v19, %s10638_s21  ;;  %v4056_v13 = vpop.permute.xlu1 %4055 }
 0x19c   : > { %2918 = vmatpush1.bf16.msra.mxu0 %v2903_v22  ;;  %2797 = vmatprep.mubr.bf16.mxu0 %v10625_v0  ;;  %v3903_v22 = vsel %vm12421_vm14, %v11551_v48, %v3896_v7  ;;  %vm4225_vm14 = vcmask 285696   ;;  %v10499_v7 = vld [vmem:[%s12387_s1 + $0x1a8] sm:$0xff]  }
 0x19d   : > { %3106 = vmatprep.subr.bf16.mxu0 %v3093_v24  ;;  %v10490_v24 = vld [vmem:[%s12387_s1 + $0x160] sm:$0xff]  }
 0x19e   : > { %6621 = vrot.lane.b32.xlu0 %v11223_v14, %s10638_s21 }
 0x19f   : > { %9136 = vmatmul.mubr.msk.bf16.gmra.mrb[4].mxu1 %vm208_vm1, %v10472_v25  ;;  %6777 = vrot.lane.b32.xlu1 %v11206_v8, %s12425_s27 }
 0x1a0   : > { %3002 = vmatprep.mubr.bf16.mxu1 %v10625_v0 }
 0x1a2   : > { %6615 = vrot.lane.b32.xlu0 %v11233_v18, %s10638_s21  ;;  %s12432_s21 = smov 46  }
 0x1a3   : > { %9134 = vmatmul.mubr.msk.bf16.gmra.mrb[4].mxu0 %vm208_vm1, %v10472_v25  ;;  %6781 = vrot.lane.b32.xlu1 %v11223_v14, %s12425_s27  ;;  %v4060_v25 = vpop.permute.xlu1 %4059 }
 0x1a4   : > { %2949 = vmatprep.mubr.bf16.mxu0 %v10625_v0 }
 0x1a6   : > { %6779 = vrot.lane.b32.xlu0 %v11226_v15, %s12425_s27 }
 0x1a7   : > { %9145 = vmatmul.mubr.msk.bf16.vlgmr.msra.gmra.mrb[0].mxu1 %vm208_vm1, %v10473_v28  ;;  %6775 = vrot.lane.b32.xlu1 %v11233_v18, %s12425_s27  ;;  %v4054_v30 = vpop.permute.xlu1 %4053 }
 0x1a8   : > { %3160 = vmatpush1.bf16.msra.mxu1 %v3094_v31  ;;  %3012 = vmatprep.mubr.bf16.mxu1 %v10625_v0 }
 0x1a9   : > { %3321 = vmatprep.subr.bf16.mxu1 %v3257_v32  ;;  %v10491_v32 = vld [vmem:[%s12387_s1 + $0x168] sm:$0xff]  }
 0x1aa   : > { %6783 = vrot.lane.b32.xlu0 %v11237_v19, %s12425_s27  ;;  %s12336_s27 = scalar_lea.hbm %s12388_s2, %s9523_s17 }
 0x1ab   : > { %9143 = vmatmul.mubr.msk.bf16.vlgmr.msra.gmra.mrb[0].mxu0 %vm208_vm1, %v10473_v28  ;;  %6939 = vrot.lane.b32.xlu1 %v11226_v15, %s12426_s4  ;;  %v4220_v34 = vpop.permute.xlu1 %4219 }
 0x1ac   : > { %3107 = vmatpush1.bf16.msra.mxu0 %v3092_v33  ;;  %2959 = vmatprep.mubr.bf16.mxu0 %v10625_v0  ;;  %v4218_v33 = vpop.permute.xlu0 %4217 }
 0x1ad   : > { %3268 = vmatprep.subr.bf16.mxu0 %v3255_v35  ;;  %v10492_v35 = vld [vmem:[%s12387_s1 + $0x170] sm:$0xff]  }
 0x1ae   : > { %6937 = vrot.lane.b32.xlu0 %v11206_v8, %s12426_s4 }
 0x1af   : > { %9146 = vmatmul.mubr.msk.bf16.gmra.mrb[4].mxu1 %vm208_vm1, %v10474_v36  ;;  %6943 = vrot.lane.b32.xlu1 %v11237_v19, %s12426_s4  ;;  %v4224_v37 = vpop.permute.xlu1 %4223 }
 0x1b0   : > { %3191 = vmatprep.mubr.bf16.mxu1 %v10625_v0 }
 0x1b2   : > { %6941 = vrot.lane.b32.xlu0 %v11223_v14, %s12426_s4 }
 0x1b3   : > { %9144 = vmatmul.mubr.msk.bf16.gmra.mrb[4].mxu0 %vm208_vm1, %v10474_v36  ;;  %7097 = vrot.lane.b32.xlu1 %v11206_v8, %s12427_s26  ;;  %v4222_v36 = vpop.permute.xlu0 %4221  ;;  %v4380_v44 = vpop.permute.xlu1 %4379 }
 0x1b4   : > { %3138 = vmatprep.mubr.bf16.mxu0 %v10625_v0  ;;  %v4228_v50 = vsel %vm4225_vm14, %v4220_v34, %v4222_v36 }
 0x1b6   : > { %6935 = vrot.lane.b32.xlu0 %v11233_v18, %s12426_s4  ;;  %s134_s4 = sand.u32 1, %s10615_s10  }
 0x1b7   : > { %9160 = vmatmul.mubr.msk.bf16.vlgmr.msra.gmra.mrb[0].mxu1 %vm208_vm1, %v10477_v39  ;;  %7101 = vrot.lane.b32.xlu1 %v11223_v14, %s12427_s26  ;;  %v4216_v41 = vpop.permute.xlu0 %4215  ;;  %s8964_s5 = sshll.u32 %s134_s4, 8  ;;  %s12345_s13 = scalar_lea.sflag [#allocation3], %s134_s4 }
 0x1b8   : > { %3322 = vmatpush1.bf16.msra.mxu1 %v3256_v42  ;;  %3201 = vmatprep.mubr.bf16.mxu1 %v10625_v0  ;;  %v4227_v42 = vsel %vm4225_vm14, %v4218_v33, %v4220_v34  ;;  %v10504_v34 = vld [vmem:[%s12387_s1 + $0x20] sm:$0xff]  }
 0x1b9   : > { %3483 = vmatprep.subr.bf16.mxu1 %v3419_v43  ;;  %v10493_v43 = vld [vmem:[%s12387_s1 + $0x178] sm:$0xff]  }
 0x1ba   : > { %7099 = vrot.lane.b32.xlu0 %v11226_v15, %s12427_s26 }
 0x1bb   : > { %9158 = vmatmul.mubr.msk.bf16.vlgmr.msra.gmra.mrb[0].mxu0 %vm208_vm1, %v10477_v39  ;;  %7095 = vrot.lane.b32.xlu1 %v11233_v18, %s12427_s26  ;;  %v4229_v39 = vsel %vm4225_vm14, %v4222_v36, %v4224_v37 }
 0x1bc   : > { %3269 = vmatpush1.bf16.msra.mxu0 %v3254_v45  ;;  %3148 = vmatprep.mubr.bf16.mxu0 %v10625_v0  ;;  %v4382_v45 = vpop.permute.xlu0 %4381 }
 0x1bd   : > { %3430 = vmatprep.subr.bf16.mxu0 %v3417_v47  ;;  %v4384_v47 = vpop.permute.xlu1 %4383 }
 0x1be   : > { %7103 = vrot.lane.b32.xlu0 %v11237_v19, %s12427_s26  ;;  %s12042_s26 = scalar_lea.vmem [#allocation2], %s8964_s5 }
 0x1bf   : > { %9161 = vmatmul.mubr.msk.bf16.gmra.mrb[4].mxu1 %vm208_vm1, %v10482_v49  ;;  %7259 = vrot.lane.b32.xlu1 %v11226_v15, %s12428_s23 }
 0x1c0   : > { %3353 = vmatprep.mubr.bf16.mxu1 %v10625_v0 }
 0x1c1   : > { %v4378_v54 = vpop.permute.xlu1 %4377 }
 0x1c2   : > { %7257 = vrot.lane.b32.xlu0 %v11206_v8, %s12428_s23 }
 0x1c3   : > { %9159 = vmatmul.mubr.msk.bf16.gmra.mrb[4].mxu0 %vm208_vm1, %v10482_v49  ;;  %7263 = vrot.lane.b32.xlu1 %v11237_v19, %s12428_s23  ;;  %v3740_v19 = vsel %vm12420_vm15, %v3730_v5, %v11531_v61  ;;  %vm12422_vm15 = vcmask 293888   ;;  %v4386_v49 = vpop.permute.xlu0 %4385  ;;  %v10498_v5 = vld [vmem:[%s12387_s1 + $0x1a0] sm:$0xff]  }
 0x1c4   : > { %3300 = vmatprep.mubr.bf16.mxu0 %v10625_v0  ;;  %v4067_v28 = vsel %vm12422_vm15, %v4060_v25, %v4062_v26  ;;  %v4065_v31 = vsel %vm12422_vm15, %v4056_v13, %v4058_v16  ;;  %v4066_v38 = vsel %vm12422_vm15, %v4058_v16, %v4060_v25  ;;  %v4064_v40 = vsel %vm12422_vm15, %v4054_v30, %v4056_v13  ;;  %v10501_v16 = vld [vmem:[%s12387_s1 + $0x18] sm:$0xff]  }
 0x1c5   : > { %vm4387_vm15 = vcmask 277504  }
 0x1c6   : > { %7261 = vrot.lane.b32.xlu0 %v11223_v14, %s12428_s23  ;;  %v4391_v51 = vsel %vm4387_vm15, %v4384_v47, %v4386_v49  ;;  %v4389_v57 = vsel %vm4387_vm15, %v4380_v44, %v4382_v45  ;;  %v4388_v4 = vsel %vm4387_vm15, %v4378_v54, %v4380_v44 }
 0x1c7   : > { %9170 = vmatmul.mubr.msk.bf16.vlgmr.msra.gmra.mrb[0].mxu1 %vm208_vm1, %v10484_v53  ;;  %v4588_v61 = vpop.permute.xlu0 %4587 }
 0x1c8   : > { %3484 = vmatpush1.bf16.msra.mxu1 %v3418_v58  ;;  %3363 = vmatprep.mubr.bf16.mxu1 %v10625_v0  ;;  %v10495_v58 = vld [vmem:[%s12387_s1 + $0x188] sm:$0xff]  }
 0x1c9   : > { %3645 = vmatprep.subr.bf16.mxu1 %v3581_v59  ;;  %v4590_v59 = vpop.permute.xlu1 %4589 }
 0x1ca   : > { %7255 = vrot.lane.b32.xlu0 %v11233_v18, %s12428_s23  ;;  %v4596_v48 = vsel %vm199_vm0, %v4588_v61, %v4590_v59  ;;  %s12434_s23 = smov 44  }
 0x1cb   : > { %9168 = vmatmul.mubr.msk.bf16.vlgmr.msra.gmra.mrb[0].mxu0 %vm208_vm1, %v10484_v53  ;;  %v4226_v53 = vsel %vm4225_vm14, %v4216_v41, %v4218_v33  ;;  %v11758_v33 = vld [vmem:[%s10725_s25 + $0x24] ss:$40 sps:$4 sm:$0xff]  }
 0x1cc   : > { %3431 = vmatpush1.bf16.msra.mxu0 %v3416_v63  ;;  %3310 = vmatprep.mubr.bf16.mxu0 %v10625_v0 }
 0x1cd   : > { %3592 = vmatprep.subr.bf16.mxu0 %v3579_v1  ;;  %v4594_v63 = vpop.permute.xlu1 %4593  ;;  %v4390_v1 = vsel %vm4387_vm15, %v4382_v45, %v4384_v47  ;;  %v10506_v45 = vld [vmem:[%s12387_s1 + $0x30] sm:$0xff]  }
 0x1cf   : > { %9171 = vmatmul.mubr.msk.bf16.gmra.mrb[4].mxu1 %vm208_vm1, %v10485_v2 }
 0x1d0   : > { %3515 = vmatprep.mubr.bf16.mxu1 %v10625_v0 }
 0x1d3   : > { %9169 = vmatmul.mubr.msk.bf16.gmra.mrb[4].mxu0 %vm208_vm1, %v10485_v2  ;;  %v4592_v2 = vpop.permute.xlu0 %4591 }
 0x1d4   : > { %3462 = vmatprep.mubr.bf16.mxu0 %v10625_v0  ;;  %v4598_v3 = vsel %vm199_vm0, %v4592_v2, %v4594_v63 }
 0x1d7   : > { %9180 = vmatmul.mubr.msk.bf16.vlgmr.msra.gmra.mrb[0].mxu1 %vm208_vm1, %v10486_v55 }
 0x1d8   : > { %3646 = vmatpush1.bf16.msra.mxu1 %v3580_v6  ;;  %3525 = vmatprep.mubr.bf16.mxu1 %v10625_v0  ;;  %v4597_v6 = vsel %vm199_vm0, %v4590_v59, %v4592_v2 }
 0x1d9   : > { %3807 = vmatprep.subr.bf16.mxu1 %v3743_v52  ;;  %v4586_v52 = vpop.permute.xlu0 %4585 }
 0x1da   : > { %v4595_v60 = vsel %vm199_vm0, %v4586_v52, %v4588_v61  ;;  %v10508_v61 = vld [vmem:[%s12387_s1 + $0x40] sm:$0xff]   ;;  %v10510_v52 = vld [vmem:[%s12387_s1 + $0x50] sm:$0xff]   ;;  %vm12437_vm0 = vcmask 64512  }
 0x1db   : > { %9178 = vmatmul.mubr.msk.bf16.vlgmr.msra.gmra.mrb[0].mxu0 %vm208_vm1, %v10486_v55  ;;  %v10497_v55 = vld [vmem:[%s12387_s1 + $0x198] sm:$0xff]  }
 0x1dc   : > { %3593 = vmatpush1.bf16.msra.mxu0 %v3578_v9  ;;  %3472 = vmatprep.mubr.bf16.mxu0 %v10625_v0  ;;  %v4858_v9 = vpop.permute.xlu1 %4857 }
 0x1dd   : > { %3754 = vmatprep.subr.bf16.mxu0 %v3741_v56  ;;  %v4860_v56 = vpop.permute.xlu0 %4859 }
 0x1de   : > { %v4866_v13 = vsel %vm472_vm2, %v4858_v9, %v4860_v56 }
 0x1df   : > { %9181 = vmatmul.mubr.msk.bf16.gmra.mrb[4].mxu1 %vm208_vm1, %v10487_v10 }
 0x1e0   : > { %3677 = vmatprep.mubr.bf16.mxu1 %v10625_v0 }
 0x1e1   : > { %v4864_v11 = vpop.permute.xlu0 %4863 }
 0x1e3   : > { %9179 = vmatmul.mubr.msk.bf16.gmra.mrb[4].mxu0 %vm208_vm1, %v10487_v10  ;;  %v4862_v10 = vpop.permute.xlu1 %4861 }
 0x1e4   : > { %3624 = vmatprep.mubr.bf16.mxu0 %v10625_v0  ;;  %v4868_v12 = vsel %vm472_vm2, %v4862_v10, %v4864_v11 }
 0x1e7   : > { %9190 = vmatmul.mubr.msk.bf16.vlgmr.msra.gmra.mrb[0].mxu1 %vm208_vm1, %v10488_v17 }
 0x1e8   : > { %3808 = vmatpush1.bf16.msra.mxu1 %v3742_v20  ;;  %3687 = vmatprep.mubr.bf16.mxu1 %v10625_v0  ;;  %v10502_v20 = vld [vmem:[%s12387_s1] sm:$0xff]  }
 0x1e9   : > { %3969 = vmatprep.subr.bf16.mxu1 %v3905_v21 }
 0x1eb   : > { %9188 = vmatmul.mubr.msk.bf16.vlgmr.msra.gmra.mrb[0].mxu0 %vm208_vm1, %v10488_v17  ;;  %v5018_v17 = vpop.permute.xlu0 %5017 }
 0x1ec   : > { %3755 = vmatpush1.bf16.msra.mxu0 %v3740_v19  ;;  %3634 = vmatprep.mubr.bf16.mxu0 %v10625_v0 }
 0x1ed   : > { %3916 = vmatprep.subr.bf16.mxu0 %v3903_v22  ;;  %v11727_v22 = vld [vmem:[%s10725_s25 + $0x18] ss:$40 sps:$4 sm:$0xff]  }
 0x1ee   : > { %7444 = vrot.lane.b32.xlu1 %v11727_v22, %s12429_s29 }
 0x1ef   : > { %9191 = vmatmul.mubr.msk.bf16.gmra.mrb[4].mxu1 %vm208_vm1, %v10489_v23  ;;  %v5022_v21 = vpop.permute.xlu0 %5021 }
 0x1f0   : > { %3839 = vmatprep.mubr.bf16.mxu1 %v10625_v0 }
 0x1f3   : > { %9189 = vmatmul.mubr.msk.bf16.gmra.mrb[4].mxu0 %vm208_vm1, %v10489_v23  ;;  %v5016_v25 = vpop.permute.xlu0 %5015 }
 0x1f4   : > { %3786 = vmatprep.mubr.bf16.mxu0 %v10625_v0 }
 0x1f7   : > { %9200 = vmatmul.mubr.msk.bf16.vlgmr.msra.gmra.mrb[0].mxu1 %vm208_vm1, %v10490_v24 }
 0x1f8   : > { %3970 = vmatpush1.bf16.msra.mxu1 %v3904_v27  ;;  %3849 = vmatprep.mubr.bf16.mxu1 %v10625_v0  ;;  %v10503_v27 = vld [vmem:[%s12387_s1 + $0x8] sm:$0xff]  }
 0x1f9   : > { %4131 = vmatprep.subr.bf16.mxu1 %v4067_v28  ;;  %v11744_v28 = vld [vmem:[%s10725_s25 + $0x20] ss:$40 sps:$4 sm:$0xff]  }
 0x1fa   : > { %7448 = vrot.lane.b32.xlu1 %v11744_v28, %s12429_s29 }
 0x1fb   : > { %9198 = vmatmul.mubr.msk.bf16.vlgmr.msra.gmra.mrb[0].mxu0 %vm208_vm1, %v10490_v24 }
 0x1fc   : > { %3917 = vmatpush1.bf16.msra.mxu0 %v3902_v29  ;;  %3796 = vmatprep.mubr.bf16.mxu0 %v10625_v0  ;;  %v11747_v29 = vld [vmem:[%s10725_s25 + $0x1c] ss:$40 sps:$4 sm:$0xff]  }
 0x1fd   : > { %4078 = vmatprep.subr.bf16.mxu0 %v4065_v31  ;;  %v5180_v31 = vpop.permute.xlu0 %5179  ;;  %7446 = vrot.lane.b32.xlu0 %v11747_v29, %s12429_s29 }
 0x1ff   : > { %9201 = vmatmul.mubr.msk.bf16.gmra.mrb[4].mxu1 %vm208_vm1, %v10491_v32 }
 0x200   : > { %4001 = vmatprep.mubr.bf16.mxu1 %v10625_v0 }
 0x201   : > { %7450 = vrot.lane.b32.xlu0 %v11758_v33, %s12429_s29  ;;  %v5184_v36 = vpop.permute.xlu0 %5183 }
 0x203   : > { %9199 = vmatmul.mubr.msk.bf16.gmra.mrb[4].mxu0 %vm208_vm1, %v10491_v32  ;;  %v11754_v32 = vld [vmem:[%s10725_s25 + $0x14] ss:$40 sps:$4 sm:$0xff]   ;;  %s12430_s25 = smov 55  }
 0x204   : > { %3948 = vmatprep.mubr.bf16.mxu0 %v10625_v0  ;;  %7442 = vrot.lane.b32.xlu1 %v11754_v32, %s12429_s29 }
 0x205   : > { %7604 = vrot.lane.b32.xlu0 %v11727_v22, %s12430_s25 }
 0x207   : > { %9210 = vmatmul.mubr.msk.bf16.vlgmr.msra.gmra.mrb[0].mxu1 %vm208_vm1, %v10492_v35 }
 0x208   : > { %4132 = vmatpush1.bf16.msra.mxu1 %v4066_v38  ;;  %4011 = vmatprep.mubr.bf16.mxu1 %v10625_v0 }
 0x209   : > { %4293 = vmatprep.subr.bf16.mxu1 %v4229_v39  ;;  %7606 = vrot.lane.b32.xlu1 %v11747_v29, %s12430_s25  ;;  %v5025_v39 = vsel %vm634_vm3, %v5016_v25, %v5018_v17 }
 0x20a   : > { %7608 = vrot.lane.b32.xlu0 %v11744_v28, %s12430_s25 }
 0x20b   : > { %9208 = vmatmul.mubr.msk.bf16.vlgmr.msra.gmra.mrb[0].mxu0 %vm208_vm1, %v10492_v35 }
 0x20c   : > { %4079 = vmatpush1.bf16.msra.mxu0 %v4064_v40  ;;  %3958 = vmatprep.mubr.bf16.mxu0 %v10625_v0 }
 0x20d   : > { %4240 = vmatprep.subr.bf16.mxu0 %v4227_v42  ;;  %7610 = vrot.lane.b32.xlu1 %v11758_v33, %s12430_s25  ;;  %v10505_v42 = vld [vmem:[%s12387_s1 + $0x28] sm:$0xff]  }
 0x20e   : > { %7602 = vrot.lane.b32.xlu0 %v11754_v32, %s12430_s25 }
 0x20f   : > { %9211 = vmatmul.mubr.msk.bf16.gmra.mrb[4].mxu1 %vm208_vm1, %v10493_v43 }
 0x210   : > { %4163 = vmatprep.mubr.bf16.mxu1 %v10625_v0 }
 0x211   : > { %7764 = vrot.lane.b32.xlu1 %v11727_v22, %s12431_s14 }
 0x212   : > { %7766 = vrot.lane.b32.xlu0 %v11747_v29, %s12431_s14 }
 0x213   : > { %9209 = vmatmul.mubr.msk.bf16.gmra.mrb[4].mxu0 %vm208_vm1, %v10493_v43  ;;  %v5338_v43 = vpop.permute.xlu0 %5337 }
 0x214   : > { %4110 = vmatprep.mubr.bf16.mxu0 %v10625_v0 }
 0x215   : > { %7768 = vrot.lane.b32.xlu1 %v11744_v28, %s12431_s14 }
 0x216   : > { %7770 = vrot.lane.b32.xlu0 %v11758_v33, %s12431_s14 }
 0x217   : > { %9220 = vmatmul.mubr.msk.bf16.vlgmr.msra.gmra.mrb[0].mxu1 %vm208_vm1, %v10494_v46 }
 0x218   : > { %4294 = vmatpush1.bf16.msra.mxu1 %v4228_v50  ;;  %4173 = vmatprep.mubr.bf16.mxu1 %v10625_v0 }
 0x219   : > { %4455 = vmatprep.subr.bf16.mxu1 %v4391_v51  ;;  %7762 = vrot.lane.b32.xlu1 %v11754_v32, %s12431_s14 }
 0x21a   : > { %7924 = vrot.lane.b32.xlu0 %v11727_v22, %s12432_s21 }
 0x21b   : > { %9218 = vmatmul.mubr.msk.bf16.vlgmr.msra.gmra.mrb[0].mxu0 %vm208_vm1, %v10494_v46  ;;  %v5342_v46 = vpop.permute.xlu0 %5341 }
 0x21c   : > { %4241 = vmatpush1.bf16.msra.mxu0 %v4226_v53  ;;  %4120 = vmatprep.mubr.bf16.mxu0 %v10625_v0 }
 0x21d   : > { %4402 = vmatprep.subr.bf16.mxu0 %v4389_v57  ;;  %7926 = vrot.lane.b32.xlu1 %v11747_v29, %s12432_s21  ;;  %v10507_v57 = vld [vmem:[%s12387_s1 + $0x38] sm:$0xff]  }
 0x21e   : > { %7928 = vrot.lane.b32.xlu0 %v11744_v28, %s12432_s21 }
 0x21f   : > { %9221 = vmatmul.mubr.msk.bf16.gmra.mrb[4].mxu1 %vm208_vm1, %v10495_v58  ;;  %v5336_v53 = vpop.permute.xlu0 %5335 }
 0x220   : > { %4325 = vmatprep.mubr.bf16.mxu1 %v10625_v0 }
 0x221   : > { %7930 = vrot.lane.b32.xlu1 %v11758_v33, %s12432_s21 }
 0x222   : > { %7922 = vrot.lane.b32.xlu0 %v11754_v32, %s12432_s21 }
 0x223   : > { %9219 = vmatmul.mubr.msk.bf16.gmra.mrb[4].mxu0 %vm208_vm1, %v10495_v58  ;;  %v5500_v59 = vpop.permute.xlu0 %5499 }
 0x224   : > { %4272 = vmatprep.mubr.bf16.mxu0 %v10625_v0 }
 0x225   : > { %8084 = vrot.lane.b32.xlu1 %v11727_v22, %s12433_s16 }
 0x226   : > { %8086 = vrot.lane.b32.xlu0 %v11747_v29, %s12433_s16 }
 0x227   : > { %9230 = vmatmul.mubr.msk.bf16.vlgmr.msra.gmra.mrb[0].mxu1 %vm208_vm1, %v10496_v62  ;;  %v5504_v63 = vpop.permute.xlu0 %5503 }
 0x228   : > { %4456 = vmatpush1.bf16.msra.mxu1 %v4390_v1  ;;  %4335 = vmatprep.mubr.bf16.mxu1 %v10625_v0 }
 0x229   : > { %4662 = vmatprep.subr.bf16.mxu1 %v4598_v3  ;;  %v5345_v3 = vsel %vm958_vm5, %v5336_v53, %v5338_v43 }
 0x22a   : > { %8090 = vrot.lane.b32.xlu0 %v11758_v33, %s12433_s16 }
 0x22b   : > { %9228 = vmatmul.mubr.msk.bf16.vlgmr.msra.gmra.mrb[0].mxu0 %vm208_vm1, %v10496_v62 }
 0x22c   : > { %4403 = vmatpush1.bf16.msra.mxu0 %v4388_v4  ;;  %4282 = vmatprep.mubr.bf16.mxu0 %v10625_v0 }
 0x22d   : > { %4609 = vmatprep.subr.bf16.mxu0 %v4596_v48 }
 0x22e   : > { %8244 = vrot.lane.b32.xlu0 %v11727_v22, %s12434_s23 }
 0x22f   : > { %9231 = vmatmul.mubr.msk.bf16.gmra.mrb[4].mxu1 %vm208_vm1, %v10497_v55 }
 0x230   : > { %4487 = vmatprep.mubr.bf16.mxu1 %v10625_v0 }
 0x232   : > { %8248 = vrot.lane.b32.xlu0 %v11744_v28, %s12434_s23 }
 0x233   : > { %9229 = vmatmul.mubr.msk.bf16.gmra.mrb[4].mxu0 %vm208_vm1, %v10497_v55  ;;  %v10509_v55 = vld [vmem:[%s12387_s1 + $0x48] sm:$0xff]  }
 0x234   : > { %4434 = vmatprep.mubr.bf16.mxu0 %v10625_v0 }
 0x236   : > { %8242 = vrot.lane.b32.xlu0 %v11754_v32, %s12434_s23 }
 0x237   : > { %9240 = vmatmul.mubr.msk.bf16.vlgmr.msra.gmra.mrb[0].mxu1 %vm208_vm1, %v10498_v5 }
 0x238   : > { %4663 = vmatpush1.bf16.msra.mxu1 %v4597_v6  ;;  %4497 = vmatprep.mubr.bf16.mxu1 %v10625_v0 }
 0x239   : > { %4788 = vmatprep.subr.bf16.mxu1 %v11223_v14  ;;  %v10500_v14 = vld [vmem:[%s12387_s1 + $0x10] sm:$0xff]  }
 0x23a   : > { %8406 = vrot.lane.b32.xlu0 %v11747_v29, %s12435_s8 }
 0x23b   : > { %9238 = vmatmul.mubr.msk.bf16.vlgmr.msra.gmra.mrb[0].mxu0 %vm208_vm1, %v10498_v5  ;;  %v5658_v5 = vpop.permute.xlu0 %5657 }
 0x23c   : > { %4610 = vmatpush1.bf16.msra.mxu0 %v4595_v60  ;;  %4444 = vmatprep.mubr.bf16.mxu0 %v10625_v0 }
 0x23d   : > { %4735 = vmatprep.subr.bf16.mxu0 %v11206_v8  ;;  %v4856_v8 = vpop.permute.xlu1 %4855  ;;  %8088 = vrot.lane.b32.xlu1 %v11744_v28, %s12433_s16 }
 0x23e   : > { %v4865_v24 = vsel %vm472_vm2, %v4856_v8, %v4858_v9  ;;  %8410 = vrot.lane.b32.xlu0 %v11758_v33, %s12435_s8 }
 0x23f   : > { %9241 = vmatmul.mubr.msk.bf16.gmra.mrb[4].mxu1 %vm208_vm1, %v10499_v7  ;;  %v5662_v60 = vpop.permute.xlu0 %5661 }
 0x240   : > { %4694 = vmatprep.mubr.bf16.mxu1 %v10625_v0 }
 0x242   : > { %8564 = vrot.lane.b32.xlu0 %v11727_v22, %s12436_s3 }
 0x243   : > { %9239 = vmatmul.mubr.msk.bf16.gmra.mrb[4].mxu0 %vm208_vm1, %v10499_v7 }
 0x244   : > { %4641 = vmatprep.mubr.bf16.mxu0 %v10625_v0 }
 0x246   : > { %8568 = vrot.lane.b32.xlu0 %v11744_v28, %s12436_s3 }
 0x247   : > { %9255 = vmatmul.mubr.msk.bf16.vlgmr.msra.gmra.mrb[8].mxu1 %vm208_vm1, %v10500_v14 }
 0x248   : > { %4789 = vmatpush1.bf16.msra.mxu1 %v11226_v15  ;;  %4704 = vmatprep.mubr.bf16.mxu1 %v10625_v0  ;;  %v5020_v15 = vpop.permute.xlu1 %5019 }
 0x249   : > { %4932 = vmatprep.subr.bf16.mxu1 %v4868_v12  ;;  %v5026_v26 = vsel %vm634_vm3, %v5018_v17, %v5020_v15  ;;  %v5027_v37 = vsel %vm634_vm3, %v5020_v15, %v5022_v21  ;;  %8082 = vrot.lane.b32.xlu1 %v11754_v32, %s12433_s16  ;;  %v10511_v12 = vld [vmem:[%s12387_s1 + $0x58] sm:$0xff]  }
 0x24a   : > { %8562 = vrot.lane.b32.xlu0 %v11754_v32, %s12436_s3 }
 0x24b   : > { %9253 = vmatmul.mubr.msk.bf16.vlgmr.msra.gmra.mrb[8].mxu0 %vm208_vm1, %v10500_v14 }
 0x24c   : > { %4736 = vmatpush1.bf16.msra.mxu0 %v11233_v18  ;;  %4651 = vmatprep.mubr.bf16.mxu0 %v10625_v0  ;;  %v5024_v19 = vpop.permute.xlu1 %5023  ;;  %v4867_v18 = vsel %vm472_vm2, %v4860_v56, %v4862_v10  ;;  %v5656_v10 = vpop.permute.xlu0 %5655  ;;  %vm12438_vm2 = vmmov %vm12437_vm0 }
 0x24d   : > { %4879 = vmatprep.subr.bf16.mxu0 %v4866_v13  ;;  %v5028_v23 = vsel %vm634_vm3, %v5022_v21, %v5024_v19  ;;  %8246 = vrot.lane.b32.xlu1 %v11747_v29, %s12434_s23  ;;  %v5665_v19 = vsel %vm1282_vm7, %v5656_v10, %v5658_v5  ;;  %vm12439_vm3 = vmmov %vm12437_vm0 }
 0x24e   : > { %8726 = vrot.lane.b32.xlu0 %v11747_v29, %s10651_s24 }
 0x24f   : > { %9256 = vmatmul.mubr.msk.bf16.gmra.mrb[12].mxu1 %vm208_vm1, %v10501_v16 }
 0x250   : > { %4820 = vmatprep.mubr.bf16.mxu1 %v10625_v0  ;;  %v5178_v30 = vpop.permute.xlu1 %5177  ;;  %v5820_v13 = vpop.permute.xlu0 %5819 }
 0x251   : > { %v5186_v41 = vsel %vm796_vm4, %v5178_v30, %v5180_v31  ;;  %8250 = vrot.lane.b32.xlu1 %v11758_v33, %s12434_s23 }
 0x252   : > { %8730 = vrot.lane.b32.xlu0 %v11758_v33, %s10651_s24 }
 0x253   : > { %9254 = vmatmul.mubr.msk.bf16.gmra.mrb[12].mxu0 %vm208_vm1, %v10501_v16  ;;  %v10512_v16 = vld [vmem:[%s12387_s1 + $0x60] sm:$0xff]  }
 0x254   : > { %4767 = vmatprep.mubr.bf16.mxu0 %v10625_v0  ;;  %v5182_v35 = vpop.permute.xlu1 %5181  ;;  %v5824_v15 = vpop.permute.xlu0 %5823 }
 0x255   : > { %v5188_v38 = vsel %vm796_vm4, %v5182_v35, %v5184_v36  ;;  %v5187_v49 = vsel %vm796_vm4, %v5180_v31, %v5182_v35  ;;  %8404 = vrot.lane.b32.xlu1 %v11727_v22, %s12435_s8 }
 0x257   : > { %9261 = vmatmul.mubr.msk.bf16.vlgmr.msra.gmra.mrb[8].mxu1 %vm208_vm1, %v10502_v20 }
 0x258   : > { %4933 = vmatpush1.bf16.msra.mxu1 %v4867_v18  ;;  %4830 = vmatprep.mubr.bf16.mxu1 %v10625_v0  ;;  %v5176_v40 = vpop.permute.xlu1 %5175  ;;  %v5978_v25 = vpop.permute.xlu0 %5977 }
 0x259   : > { %5092 = vmatprep.subr.bf16.mxu1 %v5028_v23  ;;  %v5185_v51 = vsel %vm796_vm4, %v5176_v40, %v5178_v30  ;;  %8408 = vrot.lane.b32.xlu1 %v11744_v28, %s12435_s8  ;;  %vm12440_vm4 = vcmask 56320  }
 0x25b   : > { %9259 = vmatmul.mubr.msk.bf16.vlgmr.msra.gmra.mrb[8].mxu0 %vm208_vm1, %v10502_v20 }
 0x25c   : > { %4880 = vmatpush1.bf16.msra.mxu0 %v4865_v24  ;;  %4777 = vmatprep.mubr.bf16.mxu0 %v10625_v0  ;;  %v5340_v44 = vpop.permute.xlu1 %5339  ;;  %v10513_v24 = vld [vmem:[%s12387_s1 + $0x68] sm:$0xff]  }
 0x25d   : > { %5039 = vmatprep.subr.bf16.mxu0 %v5026_v26  ;;  %v5346_v54 = vsel %vm958_vm5, %v5338_v43, %v5340_v44  ;;  %v5347_v1 = vsel %vm958_vm5, %v5340_v44, %v5342_v46  ;;  %8402 = vrot.lane.b32.xlu1 %v11754_v32, %s12435_s8 }
 0x25f   : > { %9262 = vmatmul.mubr.msk.bf16.gmra.mrb[12].mxu1 %vm208_vm1, %v10503_v27 }
 0x260   : > { %4964 = vmatprep.mubr.bf16.mxu1 %v10625_v0  ;;  %v5344_v47 = vpop.permute.xlu1 %5343 }
 0x261   : > { %v5348_v50 = vsel %vm958_vm5, %v5342_v46, %v5344_v47  ;;  %8566 = vrot.lane.b32.xlu1 %v11747_v29, %s12436_s3  ;;  %vm12441_vm5 = vmmov %vm12437_vm0 }
 0x263   : > { %9260 = vmatmul.mubr.msk.bf16.gmra.mrb[12].mxu0 %vm208_vm1, %v10503_v27  ;;  %v5982_v27 = vpop.permute.xlu0 %5981 }
 0x264   : > { %4911 = vmatprep.mubr.bf16.mxu0 %v10625_v0  ;;  %v5498_v58 = vpop.permute.xlu1 %5497 }
 0x265   : > { %v5506_v48 = vsel %vm1120_vm6, %v5498_v58, %v5500_v59  ;;  %8570 = vrot.lane.b32.xlu1 %v11758_v33, %s12436_s3  ;;  %s8898_s3 = sshll.u32 %s12042_s26, 4  ;;  %s12338_s3 = int_to_ptr.vmem [resolvable:$true] %s8898_s3 }
 0x266   : > { %s10561_s21 = scalar_lea.vmem %s12338_s3, 4096 }
 0x267   : > { %9271 = vmatmul.mubr.msk.bf16.vlgmr.msra.gmra.mrb[8].mxu1 %vm208_vm1, %v10504_v34  ;;  %p10562_p11 = scmp.ne.s32.totalorder %s12338_s3, %s10561_s21 }
 0x268   : > { %5093 = vmatpush1.bf16.msra.mxu1 %v5027_v37  ;;  %4974 = vmatprep.mubr.bf16.mxu1 %v10625_v0  ;;  %v5502_v62 = vpop.permute.xlu1 %5501  ;;  %v10516_v37 = vld [vmem:[%s12387_s1 + $0x80] sm:$0xff]  }
 0x269   : > { %5252 = vmatprep.subr.bf16.mxu1 %v5188_v38  ;;  %v5508_v2 = vsel %vm1120_vm6, %v5502_v62, %v5504_v63  ;;  %v5507_v9 = vsel %vm1120_vm6, %v5500_v59, %v5502_v62  ;;  %8724 = vrot.lane.b32.xlu1 %v11727_v22, %s10651_s24  ;;  %v10514_v22 = vld [vmem:[%s12387_s1 + $0x70] sm:$0xff]   ;;  %p10563_p12 = pnand %p10562_p11, %p10708_p5 }
 0x26b   : > { %9269 = vmatmul.mubr.msk.bf16.vlgmr.msra.gmra.mrb[8].mxu0 %vm208_vm1, %v10504_v34  ;;  %v10515_v34 = vld [vmem:[%s12387_s1 + $0x78] sm:$0xff]   ;;  %p10564_p13 = pneg %p10563_p12 }
 0x26c   : > { %5040 = vmatpush1.bf16.msra.mxu0 %v5025_v39  ;;  %4921 = vmatprep.mubr.bf16.mxu0 %v10625_v0  ;;  %v5496_v4 = vpop.permute.xlu1 %5495 }
 0x26d   : > { %5199 = vmatprep.subr.bf16.mxu0 %v5186_v41  ;;  %v5505_v14 = vsel %vm1120_vm6, %v5496_v4, %v5498_v58  ;;  %8728 = vrot.lane.b32.xlu1 %v11744_v28, %s10651_s24  ;;  %vm12442_vm6 = vmmov %vm12440_vm4 }
 0x26f   : > { %9272 = vmatmul.mubr.msk.bf16.gmra.mrb[12].mxu1 %vm208_vm1, %v10505_v42 }
 0x270   : > { %5124 = vmatprep.mubr.bf16.mxu1 %v10625_v0  ;;  %v5660_v6 = vpop.permute.xlu1 %5659 }
 0x271   : > { %v5666_v11 = vsel %vm1282_vm7, %v5658_v5, %v5660_v6  ;;  %v5667_v20 = vsel %vm1282_vm7, %v5660_v6, %v5662_v60  ;;  %8722 = vrot.lane.b32.xlu1 %v11754_v32, %s10651_s24  ;;  %v5976_v32 = vpop.permute.xlu0 %5975  ;;  %s10565_s24 = sshll.u32 %s10652_s28, 4  ;;  %s10566_s24 = int_to_ptr.vmem [resolvable:$false] %s10565_s24 }
 0x272   : > { %s10567_s16 = scalar_lea.vmem %s10566_s24, 8192  ;;  %p10568_p0 = scmp.lt.s32.totalorder %s12338_s3, %s10566_s24 }
 0x273   : > { %9270 = vmatmul.mubr.msk.bf16.gmra.mrb[12].mxu0 %vm208_vm1, %v10505_v42  ;;  %v5985_v42 = vsel %vm1606_vm9, %v5976_v32, %v5978_v25  ;;  %p10569_p1 = scmp.lt.s32.totalorder %s10567_s16, %s10561_s21 }
 0x274   : > { %5071 = vmatprep.mubr.bf16.mxu0 %v10625_v0  ;;  %v5664_v7 = vpop.permute.xlu1 %5663 }
 0x275   : > { %v5668_v56 = vsel %vm1282_vm7, %v5662_v60, %v5664_v7  ;;  %v6140_v36 = vpop.permute.xlu0 %6139  ;;  %vm12443_vm7 = vmmov %vm12440_vm4  ;;  %p10570_p2 = por %p10569_p1, %p10568_p0 }
 0x277   : > { %9281 = vmatmul.mubr.msk.bf16.vlgmr.msra.gmra.mrb[8].mxu1 %vm208_vm1, %v10506_v45  ;;  %p10571_p3 = pnand %p10570_p2, %p10564_p13 }
 0x278   : > { %5253 = vmatpush1.bf16.msra.mxu1 %v5187_v49  ;;  %5134 = vmatprep.mubr.bf16.mxu1 %v10625_v0  ;;  %v5818_v8 = vpop.permute.xlu1 %5817  ;;  %v10520_v49 = vld [vmem:[%s12387_s1 + $0x90] sm:$0xff]  }
 0x279   : > { %5412 = vmatprep.subr.bf16.mxu1 %v5348_v50  ;;  %v5826_v23 = vsel %vm1444_vm8, %v5818_v8, %v5820_v13  ;;  %v6144_v39 = vpop.permute.xlu0 %6143 }
 0x27b   : > { %9279 = vmatmul.mubr.msk.bf16.vlgmr.msra.gmra.mrb[8].mxu0 %vm208_vm1, %v10506_v45  ;;  %v10517_v45 = vld [vmem:[%s12387_s1 + $0x88] sm:$0xff]  }
 0x27c   : > { %5200 = vmatpush1.bf16.msra.mxu0 %v5185_v51  ;;  %5081 = vmatprep.mubr.bf16.mxu0 %v10625_v0  ;;  %v5822_v17 = vpop.permute.xlu1 %5821 }
 0x27d   : > { %5359 = vmatprep.subr.bf16.mxu0 %v5346_v54  ;;  %v5828_v21 = vsel %vm1444_vm8, %v5822_v17, %v5824_v15  ;;  %v5827_v29 = vsel %vm1444_vm8, %v5820_v13, %v5822_v17  ;;  %v6298_v46 = vpop.permute.xlu0 %6297 }
 0x27f   : > { %9282 = vmatmul.mubr.msk.bf16.gmra.mrb[12].mxu1 %vm208_vm1, %v10507_v57 }
 0x280   : > { %5284 = vmatprep.mubr.bf16.mxu1 %v10625_v0  ;;  %v5816_v18 = vpop.permute.xlu1 %5815 }
 0x281   : > { %v5825_v31 = vsel %vm1444_vm8, %v5816_v18, %v5818_v8  ;;  %v6302_v50 = vpop.permute.xlu0 %6301  ;;  %vm12444_vm8 = vcmask 48128  }
 0x283   : > { %9280 = vmatmul.mubr.msk.bf16.gmra.mrb[12].mxu0 %vm208_vm1, %v10507_v57 }
 0x284   : > { %5231 = vmatprep.mubr.bf16.mxu0 %v10625_v0  ;;  %v5980_v26 = vpop.permute.xlu1 %5979 }
 0x285   : > { %v5986_v33 = vsel %vm1606_vm9, %v5978_v25, %v5980_v26  ;;  %v5987_v40 = vsel %vm1606_vm9, %v5980_v26, %v5982_v27  ;;  %v6296_v58 = vpop.permute.xlu0 %6295 }
 0x287   : > { %9291 = vmatmul.mubr.msk.bf16.vlgmr.msra.gmra.mrb[8].mxu1 %vm208_vm1, %v10508_v61 }
 0x288   : > { %5413 = vmatpush1.bf16.msra.mxu1 %v5347_v1  ;;  %5294 = vmatprep.mubr.bf16.mxu1 %v10625_v0  ;;  %v5984_v28 = vpop.permute.xlu1 %5983  ;;  %v10527_v1 = vld [vmem:[%s12387_s1 + $0xa0] sm:$0xff]  }
 0x289   : > { %5572 = vmatprep.subr.bf16.mxu1 %v5508_v2  ;;  %v5988_v30 = vsel %vm1606_vm9, %v5982_v27, %v5984_v28  ;;  %v6460_v63 = vpop.permute.xlu0 %6459  ;;  %v10532_v28 = vld [vmem:[%s12387_s1 + $0xc8] sm:$0xff]   ;;  %vm12445_vm9 = vmmov %vm12440_vm4 }
 0x28b   : > { %9289 = vmatmul.mubr.msk.bf16.vlgmr.msra.gmra.mrb[8].mxu0 %vm208_vm1, %v10508_v61  ;;  %v10525_v61 = vld [vmem:[%s12387_s1 + $0x98] sm:$0xff]  }
 0x28c   : > { %5360 = vmatpush1.bf16.msra.mxu0 %v5345_v3  ;;  %5241 = vmatprep.mubr.bf16.mxu0 %v10625_v0  ;;  %v6138_v35 = vpop.permute.xlu1 %6137 }
 0x28d   : > { %5519 = vmatprep.subr.bf16.mxu0 %v5506_v48  ;;  %v6146_v44 = vsel %vm1768_vm10, %v6138_v35, %v6140_v36  ;;  %v6464_v3 = vpop.permute.xlu0 %6463 }
 0x28f   : > { %9292 = vmatmul.mubr.msk.bf16.gmra.mrb[12].mxu1 %vm208_vm1, %v10509_v55 }
 0x290   : > { %5444 = vmatprep.mubr.bf16.mxu1 %v10625_v0  ;;  %v6142_v38 = vpop.permute.xlu1 %6141 }
 0x291   : > { %v6148_v41 = vsel %vm1768_vm10, %v6142_v38, %v6144_v39  ;;  %v6147_v53 = vsel %vm1768_vm10, %v6140_v36, %v6142_v38  ;;  %v6618_v60 = vpop.permute.xlu0 %6617 }
 0x293   : > { %9290 = vmatmul.mubr.msk.bf16.gmra.mrb[12].mxu0 %vm208_vm1, %v10509_v55  ;;  %v6305_v55 = vsel %vm1930_vm11, %v6296_v58, %v6298_v46 }
 0x294   : > { %5391 = vmatprep.mubr.bf16.mxu0 %v10625_v0  ;;  %v6136_v43 = vpop.permute.xlu1 %6135 }
 0x295   : > { %v6145_v57 = vsel %vm1768_vm10, %v6136_v43, %v6138_v35  ;;  %vm12446_vm10 = vmmov %vm12444_vm8 }
 0x297   : > { %9301 = vmatmul.mubr.msk.bf16.vlgmr.msra.gmra.mrb[8].mxu1 %vm208_vm1, %v10510_v52 }
 0x298   : > { %5573 = vmatpush1.bf16.msra.mxu1 %v5507_v9  ;;  %5454 = vmatprep.mubr.bf16.mxu1 %v10625_v0  ;;  %v6300_v47 = vpop.permute.xlu1 %6299  ;;  %v10529_v9 = vld [vmem:[%s12387_s1 + $0xb0] sm:$0xff]  }
 0x299   : > { %5732 = vmatprep.subr.bf16.mxu1 %v5668_v56  ;;  %v6306_v59 = vsel %vm1930_vm11, %v6298_v46, %v6300_v47  ;;  %v6307_v4 = vsel %vm1930_vm11, %v6300_v47, %v6302_v50  ;;  %v6622_v56 = vpop.permute.xlu0 %6621 }
 0x29b   : > { %9299 = vmatmul.mubr.msk.bf16.vlgmr.msra.gmra.mrb[8].mxu0 %vm208_vm1, %v10510_v52  ;;  %v10528_v52 = vld [vmem:[%s12387_s1 + $0xa8] sm:$0xff]  }
 0x29c   : > { %5520 = vmatpush1.bf16.msra.mxu0 %v5505_v14  ;;  %5401 = vmatprep.mubr.bf16.mxu0 %v10625_v0  ;;  %v6304_v51 = vpop.permute.xlu1 %6303 }
 0x29d   : > { %5679 = vmatprep.subr.bf16.mxu0 %v5666_v11  ;;  %v6308_v54 = vsel %vm1930_vm11, %v6302_v50, %v6304_v51  ;;  %v6616_v8 = vpop.permute.xlu0 %6615  ;;  %vm12447_vm11 = vmmov %vm12444_vm8 }
 0x29f   : > { %9302 = vmatmul.mubr.msk.bf16.gmra.mrb[12].mxu1 %vm208_vm1, %v10511_v12 }
 0x2a0   : > { %5604 = vmatprep.mubr.bf16.mxu1 %v10625_v0  ;;  %v6458_v62 = vpop.permute.xlu1 %6457 }
 0x2a1   : > { %v6466_v6 = vsel %vm2092_vm12, %v6458_v62, %v6460_v63  ;;  %v6780_v15 = vpop.permute.xlu0 %6779 }
 0x2a3   : > { %9300 = vmatmul.mubr.msk.bf16.gmra.mrb[12].mxu0 %vm208_vm1, %v10511_v12 }
 0x2a4   : > { %5551 = vmatprep.mubr.bf16.mxu0 %v10625_v0  ;;  %v6462_v2 = vpop.permute.xlu1 %6461 }
 0x2a5   : > { %v6468_v48 = vsel %vm2092_vm12, %v6462_v2, %v6464_v3  ;;  %v6467_v10 = vsel %vm2092_vm12, %v6460_v63, %v6462_v2 }
 0x2a7   : > { %9311 = vmatmul.mubr.msk.bf16.vlgmr.msra.gmra.mrb[8].mxu1 %vm208_vm1, %v10512_v16 }
 0x2a8   : > { %5733 = vmatpush1.bf16.msra.mxu1 %v5667_v20  ;;  %5614 = vmatprep.mubr.bf16.mxu1 %v10625_v0  ;;  %v6456_v5 = vpop.permute.xlu1 %6455  ;;  %v10531_v20 = vld [vmem:[%s12387_s1 + $0xc0] sm:$0xff]  }
 0x2a9   : > { %5892 = vmatprep.subr.bf16.mxu1 %v5828_v21  ;;  %v6465_v12 = vsel %vm2092_vm12, %v6456_v5, %v6458_v62  ;;  %vm12448_vm12 = vcmask 457728  }
 0x2ab   : > { %9309 = vmatmul.mubr.msk.bf16.vlgmr.msra.gmra.mrb[8].mxu0 %vm208_vm1, %v10512_v16  ;;  %v10530_v16 = vld [vmem:[%s12387_s1 + $0xb8] sm:$0xff]  }
 0x2ac   : > { %5680 = vmatpush1.bf16.msra.mxu0 %v5665_v19  ;;  %5561 = vmatprep.mubr.bf16.mxu0 %v10625_v0  ;;  %v6620_v7 = vpop.permute.xlu1 %6619  ;;  %v6784_v19 = vpop.permute.xlu0 %6783 }
 0x2ad   : > { %5839 = vmatprep.subr.bf16.mxu0 %v5826_v23  ;;  %v6626_v13 = vsel %vm2254_vm13, %v6618_v60, %v6620_v7  ;;  %v6627_v18 = vsel %vm2254_vm13, %v6620_v7, %v6622_v56 }
 0x2af   : > { %9312 = vmatmul.mubr.msk.bf16.gmra.mrb[12].mxu1 %vm208_vm1, %v10513_v24 }
 0x2b0   : > { %5764 = vmatprep.mubr.bf16.mxu1 %v10625_v0  ;;  %v6624_v14 = vpop.permute.xlu1 %6623 }
 0x2b1   : > { %v6628_v11 = vsel %vm2254_vm13, %v6622_v56, %v6624_v14 }
 0x2b3   : > { %9310 = vmatmul.mubr.msk.bf16.gmra.mrb[12].mxu0 %vm208_vm1, %v10513_v24  ;;  %v6625_v24 = vsel %vm2254_vm13, %v6616_v8, %v6618_v60  ;;  %vm12449_vm13 = vmmov %vm12444_vm8 }
 0x2b4   : > { %5711 = vmatprep.mubr.bf16.mxu0 %v10625_v0  ;;  %v12023_v17 = vpop.permute.xlu1 %6777 }
 0x2b7   : > { %9321 = vmatmul.mubr.msk.bf16.vlgmr.msra.gmra.mrb[8].mxu1 %vm208_vm1, %v10514_v22 }
 0x2b8   : > { %5893 = vmatpush1.bf16.msra.mxu1 %v5827_v29  ;;  %5774 = vmatprep.mubr.bf16.mxu1 %v10625_v0  ;;  %v6782_v21 = vpop.permute.xlu1 %6781 }
 0x2b9   : > { %6052 = vmatprep.subr.bf16.mxu1 %v5988_v30  ;;  %v6788_v23 = vsel %vm208_vm1, %v6782_v21, %v6784_v19  ;;  %v12051_v30 = vpop.permute.xlu0 %6937  ;;  %v6787_v43 = vsel %vm208_vm1, %v6780_v15, %v6782_v21 }
 0x2bb   : > { %9319 = vmatmul.mubr.msk.bf16.vlgmr.msra.gmra.mrb[8].mxu0 %vm208_vm1, %v10514_v22  ;;  %v6786_v22 = vsel %vm208_vm1, %v12023_v17, %v6780_v15 }
 0x2bc   : > { %5840 = vmatpush1.bf16.msra.mxu0 %v5825_v31  ;;  %5721 = vmatprep.mubr.bf16.mxu0 %v10625_v0  ;;  %v6776_v25 = vpop.permute.xlu1 %6775 }
 0x2bd   : > { %5999 = vmatprep.subr.bf16.mxu0 %v5986_v33  ;;  %v6942_v38 = vpop.permute.xlu0 %6941  ;;  %v6785_v50 = vsel %vm208_vm1, %v6776_v25, %v12023_v17 }
 0x2bf   : > { %9322 = vmatmul.mubr.msk.bf16.gmra.mrb[12].mxu1 %vm208_vm1, %v10515_v34 }
 0x2c0   : > { %5924 = vmatprep.mubr.bf16.mxu1 %v10625_v0  ;;  %v6940_v32 = vpop.permute.xlu1 %6939 }
 0x2c3   : > { %9320 = vmatmul.mubr.msk.bf16.gmra.mrb[12].mxu0 %vm208_vm1, %v10515_v34 }
 0x2c4   : > { %5871 = vmatprep.mubr.bf16.mxu0 %v10625_v0 }
 0x2c7   : > { %9331 = vmatmul.mubr.msk.bf16.vlgmr.msra.gmra.mrb[8].mxu1 %vm208_vm1, %v10516_v37 }
 0x2c8   : > { %6053 = vmatpush1.bf16.msra.mxu1 %v5987_v40  ;;  %5934 = vmatprep.mubr.bf16.mxu1 %v10625_v0  ;;  %v10533_v40 = vld [vmem:[%s12387_s1 + $0xd0] sm:$0xff]  }
 0x2c9   : > { %6212 = vmatprep.subr.bf16.mxu1 %v6148_v41  ;;  %v6944_v41 = vpop.permute.xlu1 %6943 }
 0x2ca   : > { %v6948_v46 = vsel %vm12437_vm0, %v6942_v38, %v6944_v41  ;;  %vm12450_vm0 = vmmov %vm12448_vm12 }
 0x2cb   : > { %9329 = vmatmul.mubr.msk.bf16.vlgmr.msra.gmra.mrb[8].mxu0 %vm208_vm1, %v10516_v37 }
 0x2cc   : > { %6000 = vmatpush1.bf16.msra.mxu0 %v5985_v42  ;;  %5881 = vmatprep.mubr.bf16.mxu0 %v10625_v0 }
 0x2cd   : > { %6159 = vmatprep.subr.bf16.mxu0 %v6146_v44  ;;  %v7098_v58 = vpop.permute.xlu1 %7097 }
 0x2cf   : > { %9332 = vmatmul.mubr.msk.bf16.gmra.mrb[12].mxu1 %vm208_vm1, %v10517_v45 }
 0x2d0   : > { %6084 = vmatprep.mubr.bf16.mxu1 %v10625_v0 }
 0x2d1   : > { %v7102_v62 = vpop.permute.xlu1 %7101 }
 0x2d3   : > { %9330 = vmatmul.mubr.msk.bf16.gmra.mrb[12].mxu0 %vm208_vm1, %v10517_v45 }
 0x2d4   : > { %6031 = vmatprep.mubr.bf16.mxu0 %v10625_v0 }
 0x2d7   : > { %9341 = vmatmul.mubr.msk.bf16.vlgmr.msra.gmra.mrb[8].mxu1 %vm208_vm1, %v10520_v49 }
 0x2d8   : > { %6213 = vmatpush1.bf16.msra.mxu1 %v6147_v53  ;;  %6094 = vmatprep.mubr.bf16.mxu1 %v10625_v0  ;;  %v6936_v53 = vpop.permute.xlu0 %6935 }
 0x2d9   : > { %6372 = vmatprep.subr.bf16.mxu1 %v6308_v54  ;;  %v6946_v54 = vsel %vm12438_vm2, %v12051_v30, %v6940_v32  ;;  %v6945_v3 = vsel %vm12441_vm5, %v6936_v53, %v12051_v30  ;;  %vm12451_vm2 = vmmov %vm12450_vm0 }
 0x2db   : > { %9339 = vmatmul.mubr.msk.bf16.vlgmr.msra.gmra.mrb[8].mxu0 %vm208_vm1, %v10520_v49 }
 0x2dc   : > { %6160 = vmatpush1.bf16.msra.mxu0 %v6145_v57  ;;  %6041 = vmatprep.mubr.bf16.mxu0 %v10625_v0  ;;  %v10534_v57 = vld [vmem:[%s12387_s1 + $0xd8] sm:$0xff]  }
 0x2dd   : > { %6319 = vmatprep.subr.bf16.mxu0 %v6306_v59  ;;  %v7100_v59 = vpop.permute.xlu0 %7099 }
 0x2df   : > { %9342 = vmatmul.mubr.msk.bf16.gmra.mrb[12].mxu1 %vm208_vm1, %v10525_v61 }
 0x2e0   : > { %6244 = vmatprep.mubr.bf16.mxu1 %v10625_v0 }
 0x2e1   : > { %v7104_v63 = vpop.permute.xlu0 %7103 }
 0x2e2   : > { %v7108_v2 = vsel %vm12440_vm4, %v7102_v62, %v7104_v63  ;;  %vm12453_vm4 = vmmov %vm12450_vm0 }
 0x2e3   : > { %9340 = vmatmul.mubr.msk.bf16.gmra.mrb[12].mxu0 %vm208_vm1, %v10525_v61  ;;  %v10535_v61 = vld [vmem:[%s12387_s1 + $0xe0] sm:$0xff]  }
 0x2e4   : > { %6191 = vmatprep.mubr.bf16.mxu0 %v10625_v0 }
 0x2e5   : > { %v7258_v5 = vpop.permute.xlu0 %7257 }
 0x2e7   : > { %9351 = vmatmul.mubr.msk.bf16.vlgmr.msra.gmra.mrb[8].mxu1 %vm208_vm1, %v10527_v1 }
 0x2e8   : > { %6373 = vmatpush1.bf16.msra.mxu1 %v6307_v4  ;;  %6254 = vmatprep.mubr.bf16.mxu1 %v10625_v0  ;;  %v7096_v4 = vpop.permute.xlu1 %7095 }
 0x2e9   : > { %6532 = vmatprep.subr.bf16.mxu1 %v6468_v48  ;;  %v7106_v48 = vsel %vm12442_vm6, %v7098_v58, %v7100_v59  ;;  %v7262_v60 = vpop.permute.xlu0 %7261  ;;  %v7105_v14 = vsel %vm12445_vm9, %v7096_v4, %v7098_v58 }
 0x2eb   : > { %9349 = vmatmul.mubr.msk.bf16.vlgmr.msra.gmra.mrb[8].mxu0 %vm208_vm1, %v10527_v1  ;;  %v6947_v1 = vsel %vm12439_vm3, %v6940_v32, %v6942_v38  ;;  %vm12452_vm3 = vcmask 449536  }
 0x2ec   : > { %6320 = vmatpush1.bf16.msra.mxu0 %v6305_v55  ;;  %6201 = vmatprep.mubr.bf16.mxu0 %v10625_v0  ;;  %v10536_v55 = vld [vmem:[%s12387_s1 + $0xe8] sm:$0xff]   ;;  %vm12454_vm5 = vmmov %vm12452_vm3 }
 0x2ed   : > { %6479 = vmatprep.subr.bf16.mxu0 %v6466_v6  ;;  %v7260_v6 = vpop.permute.xlu1 %7259  ;;  %vm12455_vm6 = vmmov %vm12452_vm3 }
 0x2ef   : > { %9352 = vmatmul.mubr.msk.bf16.gmra.mrb[12].mxu1 %vm208_vm1, %v10528_v52 }
 0x2f0   : > { %6404 = vmatprep.mubr.bf16.mxu1 %v10625_v0 }
 0x2f1   : > { %v7264_v7 = vpop.permute.xlu1 %7263 }
 0x2f2   : > { %v7268_v56 = vsel %vm12444_vm8, %v7262_v60, %v7264_v7  ;;  %vm12457_vm8 = vmmov %vm12452_vm3 }
 0x2f3   : > { %9350 = vmatmul.mubr.msk.bf16.gmra.mrb[12].mxu0 %vm208_vm1, %v10528_v52  ;;  %v10537_v52 = vld [vmem:[%s12387_s1 + $0xf0] sm:$0xff]  }
 0x2f4   : > { %6351 = vmatprep.mubr.bf16.mxu0 %v10625_v0 }
 0x2f5   : > { %v7445_v8 = vpop.permute.xlu1 %7444 }
 0x2f7   : > { %9361 = vmatmul.mubr.msk.bf16.vlgmr.msra.gmra.mrb[8].mxu1 %vm208_vm1, %v10529_v9 }
 0x2f8   : > { %6533 = vmatpush1.bf16.msra.mxu1 %v6467_v10  ;;  %6414 = vmatprep.mubr.bf16.mxu1 %v10625_v0  ;;  %v7256_v10 = vpop.permute.xlu0 %7255 }
 0x2f9   : > { %6692 = vmatprep.subr.bf16.mxu1 %v6628_v11  ;;  %v7266_v11 = vsel %vm12446_vm10, %v7258_v5, %v7260_v6  ;;  %v7449_v17 = vpop.permute.xlu1 %7448  ;;  %v7265_v19 = vsel %vm12449_vm13, %v7256_v10, %v7258_v5 }
 0x2fb   : > { %9359 = vmatmul.mubr.msk.bf16.vlgmr.msra.gmra.mrb[8].mxu0 %vm208_vm1, %v10529_v9  ;;  %v7107_v9 = vsel %vm12443_vm7, %v7100_v59, %v7102_v62  ;;  %vm12456_vm7 = vcmask 441344  }
 0x2fc   : > { %6480 = vmatpush1.bf16.msra.mxu0 %v6465_v12  ;;  %6361 = vmatprep.mubr.bf16.mxu0 %v10625_v0  ;;  %v10538_v12 = vld [vmem:[%s12387_s1 + $0xf8] sm:$0xff]   ;;  %vm12458_vm9 = vmmov %vm12456_vm7 }
 0x2fd   : > { %6639 = vmatprep.subr.bf16.mxu0 %v6626_v13  ;;  %v7447_v13 = vpop.permute.xlu0 %7446  ;;  %vm12459_vm10 = vmmov %vm12456_vm7 }
 0x2ff   : > { %9362 = vmatmul.mubr.msk.bf16.gmra.mrb[12].mxu1 %vm208_vm1, %v10530_v16 }
 0x300   : > { %6564 = vmatprep.mubr.bf16.mxu1 %v10625_v0 }
 0x301   : > { %v7451_v15 = vpop.permute.xlu0 %7450 }
 0x302   : > { %v7455_v21 = vsel %vm12448_vm12, %v7449_v17, %v7451_v15  ;;  %vm12461_vm12 = vmmov %vm12456_vm7 }
 0x303   : > { %9360 = vmatmul.mubr.msk.bf16.gmra.mrb[12].mxu0 %vm208_vm1, %v10530_v16  ;;  %v10539_v16 = vld [vmem:[%s12387_s1 + $0x100] sm:$0xff]  }
 0x304   : > { %6511 = vmatprep.mubr.bf16.mxu0 %v10625_v0 }
 0x305   : > { %v7605_v25 = vpop.permute.xlu0 %7604 }
 0x307   : > { %9371 = vmatmul.mubr.msk.bf16.vlgmr.msra.gmra.mrb[8].mxu1 %vm208_vm1, %v10531_v20 }
 0x308   : > { %6693 = vmatpush1.bf16.msra.mxu1 %v6627_v18  ;;  %6574 = vmatprep.mubr.bf16.mxu1 %v10625_v0  ;;  %v7443_v18 = vpop.permute.xlu1 %7442 }
 0x309   : > { %6852 = vmatprep.subr.bf16.mxu1 %v6788_v23  ;;  %v7453_v23 = vsel %vm12450_vm0, %v7445_v8, %v7447_v13 }
 0x30a   : > { %v4489_v26 = vpop.f32.mrb[0].mxu1 }
 0x30b   : > { %4526 = vst [vmem:[%s12042_s26 + $0x10] sm:$0xff] %v4489_v26  ;;  %9369 = vmatmul.mubr.msk.bf16.vlgmr.msra.gmra.mrb[8].mxu0 %vm208_vm1, %v10531_v20  ;;  %v4491_v27 = vpop.f32.mrb[1].mxu1  ;;  %v7267_v20 = vsel %vm12447_vm11, %v7260_v6, %v7262_v60  ;;  %vm12460_vm11 = vcmask 375808  }
 0x30c   : > { %6640 = vmatpush1.bf16.msra.mxu0 %v6625_v24  ;;  %4527 = vst [vmem:[%s12042_s26 + $0x18] sm:$0xff] %v4491_v27  ;;  %v4493_v29 = vpop.f32.mrb[2].mxu1  ;;  %6521 = vmatprep.mubr.bf16.mxu0 %v10625_v0  ;;  %v10540_v24 = vld [vmem:[%s12387_s1 + $0x108] sm:$0xff]   ;;  %v7607_v26 = vpop.permute.xlu1 %7606  ;;  %vm12462_vm13 = vmmov %vm12460_vm11 }
 0x30d   : > { %4530 = vst [vmem:[%s12042_s26 + $0x50] sm:$0xff] %v4493_v29  ;;  %v4495_v31 = vpop.f32.mrb[3].mxu1  ;;  %6799 = vmatprep.subr.bf16.mxu0 %v6786_v22  ;;  %v10541_v22 = vld [vmem:[%s12387_s1 + $0x110] sm:$0xff]   ;;  %v7609_v27 = vpop.permute.xlu0 %7608  ;;  %v7454_v29 = vsel %vm12451_vm2, %v7447_v13, %v7449_v17  ;;  %vm12463_vm0 = vmmov %vm12460_vm11  ;;  %vm12464_vm2 = vcmask 367616  }
 0x30e   : > { %v4436_v33 = vpop.f32.mrb[0].mxu0  ;;  %4531 = vst [vmem:[%s12042_s26 + $0x58] sm:$0xff] %v4495_v31  ;;  %v7452_v31 = vsel %vm12453_vm4, %v7443_v18, %v7445_v8  ;;  %vm12466_vm4 = vmmov %vm12464_vm2 }
 0x30f   : > { %4524 = vst [vmem:[%s12042_s26] sm:$0xff] %v4436_v33  ;;  %v4438_v34 = vpop.f32.mrb[1].mxu0  ;;  %9372 = vmatmul.mubr.msk.bf16.gmra.mrb[12].mxu1 %vm208_vm1, %v10532_v28  ;;  %v7613_v33 = vsel %vm12454_vm5, %v7605_v25, %v7607_v26  ;;  %vm12467_vm5 = vmmov %vm12464_vm2 }
 0x310   : > { %4525 = vst [vmem:[%s12042_s26 + $0x8] sm:$0xff] %v4438_v34  ;;  %v4440_v35 = vpop.f32.mrb[2].mxu0  ;;  %6724 = vmatprep.mubr.bf16.mxu1 %v10625_v0  ;;  %v10542_v34 = vld [vmem:[%s12387_s1 + $0x118] sm:$0xff]  }
 0x311   : > { %4528 = vst [vmem:[%s12042_s26 + $0x40] sm:$0xff] %v4440_v35  ;;  %v4442_v36 = vpop.f32.mrb[3].mxu0  ;;  %v7603_v32 = vpop.permute.xlu0 %7602 }
 0x312   : > { %4529 = vst [vmem:[%s12042_s26 + $0x48] sm:$0xff] %v4442_v36  ;;  %v4499_v37 = vpop.f32.mrb[4].mxu1 }
 0x313   : > { %4534 = vst [vmem:[%s12042_s26 + $0x90] sm:$0xff] %v4499_v37  ;;  %9370 = vmatmul.mubr.msk.bf16.gmra.mrb[12].mxu0 %vm208_vm1, %v10532_v28  ;;  %v4501_v39 = vpop.f32.mrb[5].mxu1  ;;  %v7611_v28 = vpop.permute.xlu1 %7610  ;;  %v10543_v37 = vld [vmem:[%s12387_s1 + $0x120] sm:$0xff]  }
 0x314   : > { %4535 = vst [vmem:[%s12042_s26 + $0x98] sm:$0xff] %v4501_v39  ;;  %v4503_v42 = vpop.f32.mrb[6].mxu1  ;;  %6671 = vmatprep.mubr.bf16.mxu0 %v10625_v0  ;;  %v7615_v30 = vsel %vm12452_vm3, %v7609_v27, %v7611_v28  ;;  %vm12465_vm3 = vmmov %vm12463_vm0 }
 0x315   : > { %4538 = vst [vmem:[%s12042_s26 + $0xd0] sm:$0xff] %v4503_v42  ;;  %v4505_v44 = vpop.f32.mrb[7].mxu1  ;;  %v7767_v36 = vpop.permute.xlu0 %7766  ;;  %v7612_v42 = vsel %vm12457_vm8, %v7603_v32, %v7605_v25 }
 0x316   : > { %v4446_v45 = vpop.f32.mrb[4].mxu0  ;;  %4539 = vst [vmem:[%s12042_s26 + $0xd8] sm:$0xff] %v4505_v44 }
 0x317   : > { %4532 = vst [vmem:[%s12042_s26 + $0x80] sm:$0xff] %v4446_v45  ;;  %v4448_v47 = vpop.f32.mrb[5].mxu0  ;;  %9381 = vmatmul.mubr.msk.bf16.vlgmr.msra.gmra.mrb[8].mxu1 %vm208_vm1, %v10533_v40  ;;  %v7765_v35 = vpop.permute.xlu1 %7764  ;;  %v10544_v45 = vld [vmem:[%s12387_s1 + $0x128] sm:$0xff]  }
 0x318   : > { %4533 = vst [vmem:[%s12042_s26 + $0x88] sm:$0xff] %v4448_v47  ;;  %v4450_v49 = vpop.f32.mrb[6].mxu0  ;;  %6853 = vmatpush1.bf16.msra.mxu1 %v6787_v43  ;;  %6734 = vmatprep.mubr.bf16.mxu1 %v10625_v0  ;;  %v7773_v44 = vsel %vm12458_vm9, %v7765_v35, %v7767_v36 }
 0x319   : > { %4536 = vst [vmem:[%s12042_s26 + $0xc0] sm:$0xff] %v4450_v49  ;;  %v4452_v51 = vpop.f32.mrb[7].mxu0  ;;  %7012 = vmatprep.subr.bf16.mxu1 %v6948_v46  ;;  %v7771_v39 = vpop.permute.xlu0 %7770  ;;  %v10545_v49 = vld [vmem:[%s12387_s1 + $0x130] sm:$0xff]  }
 0x31a   : > { %4537 = vst [vmem:[%s12042_s26 + $0xc8] sm:$0xff] %v4452_v51 }
 0x31b   : > { %9379 = vmatmul.mubr.msk.bf16.vlgmr.msra.gmra.mrb[8].mxu0 %vm208_vm1, %v10533_v40  ;;  %v7769_v38 = vpop.permute.xlu1 %7768  ;;  %v7614_v40 = vsel %vm12455_vm6, %v7607_v26, %v7609_v27  ;;  %vm12468_vm6 = vcmask 359424  }
 0x31c   : > { %6800 = vmatpush1.bf16.msra.mxu0 %v6785_v50  ;;  %6681 = vmatprep.mubr.bf16.mxu0 %v10625_v0  ;;  %v7775_v41 = vsel %vm12456_vm7, %v7769_v38, %v7771_v39  ;;  %v7774_v53 = vsel %vm12459_vm10, %v7767_v36, %v7769_v38  ;;  %vm12469_vm7 = vmmov %vm12464_vm2  ;;  %vm12472_vm10 = vcmask 293888  }
 0x31d   : > { %6959 = vmatprep.subr.bf16.mxu0 %v6946_v54  ;;  %v7925_v46 = vpop.permute.xlu0 %7924  ;;  %vm12470_vm8 = vmmov %vm12468_vm6 }
 0x31e   : > { %vm12471_vm9 = vmmov %vm12468_vm6 }
 0x31f   : > { %9382 = vmatmul.mubr.msk.bf16.gmra.mrb[12].mxu1 %vm208_vm1, %v10534_v57  ;;  %v7763_v43 = vpop.permute.xlu1 %7762 }
 0x320   : > { %6884 = vmatprep.mubr.bf16.mxu1 %v10625_v0 }
 0x321   : > { %v7929_v50 = vpop.permute.xlu0 %7928 }
 0x323   : > { %9380 = vmatmul.mubr.msk.bf16.gmra.mrb[12].mxu0 %vm208_vm1, %v10534_v57  ;;  %v7927_v47 = vpop.permute.xlu1 %7926  ;;  %v7772_v57 = vsel %vm12461_vm12, %v7763_v43, %v7765_v35  ;;  %vm12474_vm12 = vmmov %vm12472_vm10 }
 0x324   : > { %6831 = vmatprep.mubr.bf16.mxu0 %v10625_v0  ;;  %v7933_v59 = vsel %vm12462_vm13, %v7925_v46, %v7927_v47  ;;  %v7934_v4 = vsel %vm12463_vm0, %v7927_v47, %v7929_v50  ;;  %vm12475_vm13 = vmmov %vm12472_vm10  ;;  %v10556_v47 = vld [vmem:[%s12387_s1 + $0x188] sm:$0xff]  }
 0x325   : > { %v7923_v58 = vpop.permute.xlu0 %7922  ;;  %vm12476_vm0 = vmmov %vm12472_vm10 }
 0x327   : > { %9391 = vmatmul.mubr.msk.bf16.vlgmr.msra.gmra.mrb[8].mxu1 %vm208_vm1, %v10535_v61  ;;  %v7931_v51 = vpop.permute.xlu1 %7930 }
 0x328   : > { %7013 = vmatpush1.bf16.msra.mxu1 %v6947_v1  ;;  %6894 = vmatprep.mubr.bf16.mxu1 %v10625_v0  ;;  %v7935_v54 = vsel %vm12460_vm11, %v7929_v50, %v7931_v51  ;;  %v10547_v1 = vld [vmem:[%s12387_s1 + $0x140] sm:$0xff]   ;;  %vm12473_vm11 = vmmov %vm12468_vm6 }
 0x329   : > { %7172 = vmatprep.subr.bf16.mxu1 %v7108_v2  ;;  %v8087_v63 = vpop.permute.xlu0 %8086 }
 0x32b   : > { %9389 = vmatmul.mubr.msk.bf16.vlgmr.msra.gmra.mrb[8].mxu0 %vm208_vm1, %v10535_v61  ;;  %v10546_v61 = vld [vmem:[%s12387_s1 + $0x138] sm:$0xff]   ;;  %v8085_v62 = vpop.permute.xlu1 %8084 }
 0x32c   : > { %6960 = vmatpush1.bf16.msra.mxu0 %v6945_v3  ;;  %6841 = vmatprep.mubr.bf16.mxu0 %v10625_v0  ;;  %v8093_v6 = vsel %vm12466_vm4, %v8085_v62, %v8087_v63 }
 0x32d   : > { %7119 = vmatprep.subr.bf16.mxu0 %v7106_v48  ;;  %v8091_v3 = vpop.permute.xlu0 %8090 }
 0x32f   : > { %9392 = vmatmul.mubr.msk.bf16.gmra.mrb[12].mxu1 %vm208_vm1, %v10536_v55  ;;  %v8089_v2 = vpop.permute.xlu1 %8088 }
 0x330   : > { %7044 = vmatprep.mubr.bf16.mxu1 %v10625_v0  ;;  %v8095_v48 = vsel %vm12464_vm2, %v8089_v2, %v8091_v3  ;;  %v8094_v10 = vsel %vm12467_vm5, %v8087_v63, %v8089_v2 }
 0x331   : > { %v8245_v60 = vpop.permute.xlu0 %8244 }
 0x333   : > { %9390 = vmatmul.mubr.msk.bf16.gmra.mrb[12].mxu0 %vm208_vm1, %v10536_v55  ;;  %v7932_v55 = vsel %vm12465_vm3, %v7923_v58, %v7925_v46  ;;  %v8083_v5 = vpop.permute.xlu1 %8082  ;;  %v10560_v58 = vld [vmem:[%s12387_s1 + $0x1a8] sm:$0xff]  }
 0x334   : > { %6991 = vmatprep.mubr.bf16.mxu0 %v10625_v0 }
 0x337   : > { %9401 = vmatmul.mubr.msk.bf16.vlgmr.msra.gmra.mrb[8].mxu1 %vm208_vm1, %v10537_v52  ;;  %v8247_v7 = vpop.permute.xlu1 %8246 }
 0x338   : > { %7173 = vmatpush1.bf16.msra.mxu1 %v7107_v9  ;;  %7054 = vmatprep.mubr.bf16.mxu1 %v10625_v0  ;;  %v10549_v9 = vld [vmem:[%s12387_s1 + $0x150] sm:$0xff]   ;;  %v8253_v13 = vsel %vm12470_vm8, %v8245_v60, %v8247_v7 }
 0x339   : > { %7332 = vmatprep.subr.bf16.mxu1 %v7268_v56  ;;  %v8249_v56 = vpop.permute.xlu0 %8248 }
 0x33a   : > { %v8254_v18 = vsel %vm12471_vm9, %v8247_v7, %v8249_v56 }
 0x33b   : > { %9399 = vmatmul.mubr.msk.bf16.vlgmr.msra.gmra.mrb[8].mxu0 %vm208_vm1, %v10537_v52  ;;  %v10548_v52 = vld [vmem:[%s12387_s1 + $0x148] sm:$0xff]  }
 0x33c   : > { %7120 = vmatpush1.bf16.msra.mxu0 %v7105_v14  ;;  %7001 = vmatprep.mubr.bf16.mxu0 %v10625_v0  ;;  %v8251_v14 = vpop.permute.xlu1 %8250 }
 0x33d   : > { %7279 = vmatprep.subr.bf16.mxu0 %v7266_v11  ;;  %v8255_v11 = vsel %vm12468_vm6, %v8249_v56, %v8251_v14  ;;  %v8243_v8 = vpop.permute.xlu0 %8242 }
 0x33f   : > { %9402 = vmatmul.mubr.msk.bf16.gmra.mrb[12].mxu1 %vm208_vm1, %v10538_v12 }
 0x340   : > { %7204 = vmatprep.mubr.bf16.mxu1 %v10625_v0  ;;  %v8405_v17 = vpop.permute.xlu1 %8404 }
 0x341   : > { %v8407_v15 = vpop.permute.xlu0 %8406 }
 0x342   : > { %v8413_v26 = vsel %vm12474_vm12, %v8405_v17, %v8407_v15 }
 0x343   : > { %9400 = vmatmul.mubr.msk.bf16.gmra.mrb[12].mxu0 %vm208_vm1, %v10538_v12  ;;  %v8092_v12 = vsel %vm12469_vm7, %v8083_v5, %v8085_v62 }
 0x344   : > { %7151 = vmatprep.mubr.bf16.mxu0 %v10625_v0 }
 0x347   : > { %9411 = vmatmul.mubr.msk.bf16.vlgmr.msra.gmra.mrb[8].mxu1 %vm208_vm1, %v10539_v16 }
 0x348   : > { %7333 = vmatpush1.bf16.msra.mxu1 %v7267_v20  ;;  %7214 = vmatprep.mubr.bf16.mxu1 %v10625_v0  ;;  %v10551_v20 = vld [vmem:[%s12387_s1 + $0x160] sm:$0xff]  }
 0x349   : > { %7519 = vmatprep.subr.bf16.mxu1 %v7455_v21  ;;  %v8409_v21 = vpop.permute.xlu1 %8408 }
 0x34a   : > { %v8414_v32 = vsel %vm12475_vm13, %v8407_v15, %v8409_v21 }
 0x34b   : > { %9409 = vmatmul.mubr.msk.bf16.vlgmr.msra.gmra.mrb[8].mxu0 %vm208_vm1, %v10539_v16  ;;  %v10550_v16 = vld [vmem:[%s12387_s1 + $0x158] sm:$0xff]  }
 0x34c   : > { %7280 = vmatpush1.bf16.msra.mxu0 %v7265_v19  ;;  %7161 = vmatprep.mubr.bf16.mxu0 %v10625_v0  ;;  %v8411_v19 = vpop.permute.xlu0 %8410 }
 0x34d   : > { %7466 = vmatprep.subr.bf16.mxu0 %v7453_v23  ;;  %v8415_v23 = vsel %vm12472_vm10, %v8409_v21, %v8411_v19  ;;  %v8403_v25 = vpop.permute.xlu1 %8402 }
 0x34f   : > { %9412 = vmatmul.mubr.msk.bf16.gmra.mrb[12].mxu1 %vm208_vm1, %v10540_v24 }
 0x350   : > { %7364 = vmatprep.mubr.bf16.mxu1 %v10625_v0  ;;  %v8565_v27 = vpop.permute.xlu0 %8564 }
 0x351   : > { %v8567_v28 = vpop.permute.xlu1 %8566 }
 0x352   : > { %v8573_v36 = vsel %vm4225_vm14, %v8565_v27, %v8567_v28 }
 0x353   : > { %9410 = vmatmul.mubr.msk.bf16.gmra.mrb[12].mxu0 %vm208_vm1, %v10540_v24  ;;  %v8252_v24 = vsel %vm12473_vm11, %v8243_v8, %v8245_v60 }
 0x354   : > { %7311 = vmatprep.mubr.bf16.mxu0 %v10625_v0 }
 0x357   : > { %9421 = vmatmul.mubr.msk.bf16.vlgmr.msra.gmra.mrb[8].mxu1 %vm208_vm1, %v10541_v22 }
 0x358   : > { %7520 = vmatpush1.bf16.msra.mxu1 %v7454_v29  ;;  %7374 = vmatprep.mubr.bf16.mxu1 %v10625_v0  ;;  %v10553_v29 = vld [vmem:[%s12387_s1 + $0x170] sm:$0xff]  }
 0x359   : > { %7679 = vmatprep.subr.bf16.mxu1 %v7615_v30  ;;  %v8569_v30 = vpop.permute.xlu0 %8568 }
 0x35b   : > { %9419 = vmatmul.mubr.msk.bf16.vlgmr.msra.gmra.mrb[8].mxu0 %vm208_vm1, %v10541_v22  ;;  %v10552_v22 = vld [vmem:[%s12387_s1 + $0x168] sm:$0xff]  }
 0x35c   : > { %7467 = vmatpush1.bf16.msra.mxu0 %v7452_v31  ;;  %7321 = vmatprep.mubr.bf16.mxu0 %v10625_v0  ;;  %v8571_v31 = vpop.permute.xlu1 %8570 }
 0x35d   : > { %7626 = vmatprep.subr.bf16.mxu0 %v7613_v33  ;;  %v8575_v33 = vsel %vm4225_vm14, %v8569_v30, %v8571_v31  ;;  %v8563_v35 = vpop.permute.xlu0 %8562 }
 0x35f   : > { %9422 = vmatmul.mubr.msk.bf16.gmra.mrb[12].mxu1 %vm208_vm1, %v10542_v34 }
 0x360   : > { %7551 = vmatprep.mubr.bf16.mxu1 %v10625_v0  ;;  %v8725_v39 = vpop.permute.xlu1 %8724 }
 0x361   : > { %v8727_v38 = vpop.permute.xlu0 %8726 }
 0x362   : > { %v8733_v46 = vsel %vm4387_vm15, %v8725_v39, %v8727_v38 }
 0x363   : > { %9420 = vmatmul.mubr.msk.bf16.gmra.mrb[12].mxu0 %vm208_vm1, %v10542_v34  ;;  %v8412_v34 = vsel %vm12476_vm0, %v8403_v25, %v8405_v17 }
 0x364   : > { %7498 = vmatprep.mubr.bf16.mxu0 %v10625_v0  ;;  %v8729_v43 = vpop.permute.xlu1 %8728 }
 0x365   : > { %v8734_v50 = vsel %vm4387_vm15, %v8727_v38, %v8729_v43 }
 0x367   : > { %9436 = vmatmul.mubr.msk.bf16.vlgmr.msra.gmra.mrb[8].mxu1 %vm208_vm1, %v10543_v37 }
 0x368   : > { %7680 = vmatpush1.bf16.msra.mxu1 %v7614_v40  ;;  %7561 = vmatprep.mubr.bf16.mxu1 %v10625_v0  ;;  %v10555_v40 = vld [vmem:[%s12387_s1 + $0x180] sm:$0xff]   ;;  %v8723_v51 = vpop.permute.xlu1 %8722 }
 0x369   : > { %7839 = vmatprep.subr.bf16.mxu1 %v7775_v41  ;;  %v8731_v41 = vpop.permute.xlu0 %8730 }
 0x36b   : > { %9434 = vmatmul.mubr.msk.bf16.vlgmr.msra.gmra.mrb[8].mxu0 %vm208_vm1, %v10543_v37  ;;  %v10554_v37 = vld [vmem:[%s12387_s1 + $0x178] sm:$0xff]  }
 0x36c   : > { %7627 = vmatpush1.bf16.msra.mxu0 %v7612_v42  ;;  %7508 = vmatprep.mubr.bf16.mxu0 %v10625_v0  ;;  %v8574_v42 = vsel %vm4225_vm14, %v8567_v28, %v8569_v30 }
 0x36d   : > { %7786 = vmatprep.subr.bf16.mxu0 %v7773_v44  ;;  %v8735_v44 = vsel %vm4387_vm15, %v8729_v43, %v8731_v41 }
 0x36f   : > { %9437 = vmatmul.mubr.msk.bf16.gmra.mrb[12].mxu1 %vm208_vm1, %v10544_v45 }
 0x370   : > { %7711 = vmatprep.mubr.bf16.mxu1 %v10625_v0 }
 0x373   : > { %9435 = vmatmul.mubr.msk.bf16.gmra.mrb[12].mxu0 %vm208_vm1, %v10544_v45  ;;  %v8572_v45 = vsel %vm4225_vm14, %v8563_v35, %v8565_v27 }
 0x374   : > { %7658 = vmatprep.mubr.bf16.mxu0 %v10625_v0 }
 0x377   : > { %9446 = vmatmul.mubr.msk.bf16.vlgmr.msra.gmra.mrb[8].mxu1 %vm208_vm1, %v10545_v49 }
 0x378   : > { %7840 = vmatpush1.bf16.msra.mxu1 %v7774_v53  ;;  %7721 = vmatprep.mubr.bf16.mxu1 %v10625_v0  ;;  %v8732_v53 = vsel %vm4387_vm15, %v8723_v51, %v8725_v39 }
 0x379   : > { %7999 = vmatprep.subr.bf16.mxu1 %v7935_v54  ;;  %v10558_v54 = vld [vmem:[%s12387_s1 + $0x198] sm:$0xff]  }
 0x37b   : > { %9444 = vmatmul.mubr.msk.bf16.vlgmr.msra.gmra.mrb[8].mxu0 %vm208_vm1, %v10545_v49  ;;  %v10557_v49 = vld [vmem:[%s12387_s1 + $0x190] sm:$0xff]  }
 0x37c   : > { %7787 = vmatpush1.bf16.msra.mxu0 %v7772_v57  ;;  %7668 = vmatprep.mubr.bf16.mxu0 %v10625_v0  ;;  %v10559_v57 = vld [vmem:[%s12387_s1 + $0x1a0] sm:$0xff]  }
 0x37d   : > { %7946 = vmatprep.subr.bf16.mxu0 %v7933_v59 }
 0x37f   : > { %9447 = vmatmul.mubr.msk.bf16.gmra.mrb[12].mxu1 %vm208_vm1, %v10546_v61 }
 0x380   : > { %7871 = vmatprep.mubr.bf16.mxu1 %v10625_v0 }
 0x383   : > { %9445 = vmatmul.mubr.msk.bf16.gmra.mrb[12].mxu0 %vm208_vm1, %v10546_v61 }
 0x384   : > { %7818 = vmatprep.mubr.bf16.mxu0 %v10625_v0 }
 0x387   : > { %9456 = vmatmul.mubr.msk.bf16.vlgmr.msra.gmra.mrb[8].mxu1 %vm208_vm1, %v10547_v1 }
 0x388   : > { %8000 = vmatpush1.bf16.msra.mxu1 %v7934_v4  ;;  %7881 = vmatprep.mubr.bf16.mxu1 %v10625_v0 }
 0x389   : > { %8159 = vmatprep.subr.bf16.mxu1 %v8095_v48 }
 0x38b   : > { %9454 = vmatmul.mubr.msk.bf16.vlgmr.msra.gmra.mrb[8].mxu0 %vm208_vm1, %v10547_v1 }
 0x38c   : > { %7947 = vmatpush1.bf16.msra.mxu0 %v7932_v55  ;;  %7828 = vmatprep.mubr.bf16.mxu0 %v10625_v0 }
 0x38d   : > { %8106 = vmatprep.subr.bf16.mxu0 %v8093_v6 }
 0x38f   : > { %9457 = vmatmul.mubr.msk.bf16.gmra.mrb[12].mxu1 %vm208_vm1, %v10548_v52 }
 0x390   : > { %8031 = vmatprep.mubr.bf16.mxu1 %v10625_v0 }
 0x393   : > { %9455 = vmatmul.mubr.msk.bf16.gmra.mrb[12].mxu0 %vm208_vm1, %v10548_v52 }
 0x394   : > { %7978 = vmatprep.mubr.bf16.mxu0 %v10625_v0 }
 0x397   : > { %9466 = vmatmul.mubr.msk.bf16.vlgmr.msra.gmra.mrb[8].mxu1 %vm208_vm1, %v10549_v9 }
 0x398   : > { %8160 = vmatpush1.bf16.msra.mxu1 %v8094_v10  ;;  %8041 = vmatprep.mubr.bf16.mxu1 %v10625_v0 }
 0x399   : > { %8319 = vmatprep.subr.bf16.mxu1 %v8255_v11 }
 0x39b   : > { %9464 = vmatmul.mubr.msk.bf16.vlgmr.msra.gmra.mrb[8].mxu0 %vm208_vm1, %v10549_v9 }
 0x39c   : > { %8107 = vmatpush1.bf16.msra.mxu0 %v8092_v12  ;;  %7988 = vmatprep.mubr.bf16.mxu0 %v10625_v0 }
 0x39d   : > { %8266 = vmatprep.subr.bf16.mxu0 %v8253_v13 }
 0x39f   : > { %9467 = vmatmul.mubr.msk.bf16.gmra.mrb[12].mxu1 %vm208_vm1, %v10550_v16 }
 0x3a0   : > { %8191 = vmatprep.mubr.bf16.mxu1 %v10625_v0 }
 0x3a3   : > { %9465 = vmatmul.mubr.msk.bf16.gmra.mrb[12].mxu0 %vm208_vm1, %v10550_v16 }
 0x3a4   : > { %8138 = vmatprep.mubr.bf16.mxu0 %v10625_v0 }
 0x3a7   : > { %9476 = vmatmul.mubr.msk.bf16.vlgmr.msra.gmra.mrb[8].mxu1 %vm208_vm1, %v10551_v20 }
 0x3a8   : > { %8320 = vmatpush1.bf16.msra.mxu1 %v8254_v18  ;;  %8201 = vmatprep.mubr.bf16.mxu1 %v10625_v0 }
 0x3a9   : > { %8479 = vmatprep.subr.bf16.mxu1 %v8415_v23 }
 0x3ab   : > { %9474 = vmatmul.mubr.msk.bf16.vlgmr.msra.gmra.mrb[8].mxu0 %vm208_vm1, %v10551_v20 }
 0x3ac   : > { %8267 = vmatpush1.bf16.msra.mxu0 %v8252_v24  ;;  %8148 = vmatprep.mubr.bf16.mxu0 %v10625_v0 }
 0x3ad   : > { %8426 = vmatprep.subr.bf16.mxu0 %v8413_v26 }
 0x3af   : > { %9477 = vmatmul.mubr.msk.bf16.gmra.mrb[12].mxu1 %vm208_vm1, %v10552_v22 }
 0x3b0   : > { %8351 = vmatprep.mubr.bf16.mxu1 %v10625_v0 }
 0x3b3   : > { %9475 = vmatmul.mubr.msk.bf16.gmra.mrb[12].mxu0 %vm208_vm1, %v10552_v22 }
 0x3b4   : > { %8298 = vmatprep.mubr.bf16.mxu0 %v10625_v0 }
 0x3b7   : > { %9486 = vmatmul.mubr.msk.bf16.vlgmr.msra.gmra.mrb[8].mxu1 %vm208_vm1, %v10553_v29 }
 0x3b8   : > { %8480 = vmatpush1.bf16.msra.mxu1 %v8414_v32  ;;  %8361 = vmatprep.mubr.bf16.mxu1 %v10625_v0 }
 0x3b9   : > { %8639 = vmatprep.subr.bf16.mxu1 %v8575_v33 }
 0x3bb   : > { %9484 = vmatmul.mubr.msk.bf16.vlgmr.msra.gmra.mrb[8].mxu0 %vm208_vm1, %v10553_v29 }
 0x3bc   : > { %8427 = vmatpush1.bf16.msra.mxu0 %v8412_v34  ;;  %8308 = vmatprep.mubr.bf16.mxu0 %v10625_v0 }
 0x3bd   : > { %8586 = vmatprep.subr.bf16.mxu0 %v8573_v36 }
 0x3bf   : > { %9487 = vmatmul.mubr.msk.bf16.gmra.mrb[12].mxu1 %vm208_vm1, %v10554_v37 }
 0x3c0   : > { %8511 = vmatprep.mubr.bf16.mxu1 %v10625_v0 }
 0x3c3   : > { %9485 = vmatmul.mubr.msk.bf16.gmra.mrb[12].mxu0 %vm208_vm1, %v10554_v37 }
 0x3c4   : > { %8458 = vmatprep.mubr.bf16.mxu0 %v10625_v0 }
 0x3c7   : > { %9496 = vmatmul.mubr.msk.bf16.vlgmr.msra.gmra.mrb[8].mxu1 %vm208_vm1, %v10555_v40 }
 0x3c8   : > { %8640 = vmatpush1.bf16.msra.mxu1 %v8574_v42  ;;  %8521 = vmatprep.mubr.bf16.mxu1 %v10625_v0 }
 0x3c9   : > { %8799 = vmatprep.subr.bf16.mxu1 %v8735_v44 }
 0x3cb   : > { %9494 = vmatmul.mubr.msk.bf16.vlgmr.msra.gmra.mrb[8].mxu0 %vm208_vm1, %v10555_v40 }
 0x3cc   : > { %8587 = vmatpush1.bf16.msra.mxu0 %v8572_v45  ;;  %8468 = vmatprep.mubr.bf16.mxu0 %v10625_v0 }
 0x3cd   : > { %8746 = vmatprep.subr.bf16.mxu0 %v8733_v46 }
 0x3cf   : > { %9497 = vmatmul.mubr.msk.bf16.gmra.mrb[12].mxu1 %vm208_vm1, %v10556_v47 }
 0x3d0   : > { %8671 = vmatprep.mubr.bf16.mxu1 %v10625_v0 }
 0x3d3   : > { %9495 = vmatmul.mubr.msk.bf16.gmra.mrb[12].mxu0 %vm208_vm1, %v10556_v47 }
 0x3d4   : > { %8618 = vmatprep.mubr.bf16.mxu0 %v10625_v0 }
 0x3d7   : > { %9506 = vmatmul.mubr.msk.bf16.vlgmr.msra.gmra.mrb[8].mxu1 %vm208_vm1, %v10557_v49 }
 0x3d8   : > { %8800 = vmatpush1.bf16.msra.mxu1 %v8734_v50  ;;  %8681 = vmatprep.mubr.bf16.mxu1 %v10625_v0 }
 0x3db   : > { %9504 = vmatmul.mubr.msk.bf16.vlgmr.msra.gmra.mrb[8].mxu0 %vm208_vm1, %v10557_v49 }
 0x3dc   : > { %8747 = vmatpush1.bf16.msra.mxu0 %v8732_v53  ;;  %8628 = vmatprep.mubr.bf16.mxu0 %v10625_v0 }
 0x3df   : > { %9507 = vmatmul.mubr.msk.bf16.gmra.mrb[12].mxu1 %vm208_vm1, %v10558_v54 }
 0x3e0   : > { %8831 = vmatprep.mubr.bf16.mxu1 %v10625_v0 }
 0x3e3   : > { %9505 = vmatmul.mubr.msk.bf16.gmra.mrb[12].mxu0 %vm208_vm1, %v10558_v54 }
 0x3e4   : > { %8778 = vmatprep.mubr.bf16.mxu0 %v10625_v0 }
 0x3e7   : > { %9516 = vmatmul.mubr.msk.bf16.vlgmr.msra.gmra.mrb[8].mxu1 %vm208_vm1, %v10559_v57 }
 0x3e8   : > { %8841 = vmatprep.mubr.bf16.mxu1 %v10625_v0 }
 0x3eb   : > { %9514 = vmatmul.mubr.msk.bf16.vlgmr.msra.gmra.mrb[8].mxu0 %vm208_vm1, %v10559_v57 }
 0x3ec   : > { %8788 = vmatprep.mubr.bf16.mxu0 %v10625_v0 }
 0x3ef   : > { %9517 = vmatmul.mubr.msk.bf16.gmra.mrb[12].mxu1 %vm208_vm1, %v10560_v58 }
 0x3f3   : > { %9515 = vmatmul.mubr.msk.bf16.gmra.mrb[12].mxu0 %vm208_vm1, %v10560_v58 }
 0x4ba   : > { %v8833_v59 = vpop.f32.mrb[8].mxu1 }
 0x4bb   : > { %8870 = vst [vmem:[%s12042_s26 + $0x30] sm:$0xff] %v8833_v59  ;;  %v8835_v61 = vpop.f32.mrb[9].mxu1 }
 0x4bc   : > { %8871 = vst [vmem:[%s12042_s26 + $0x38] sm:$0xff] %v8835_v61  ;;  %v8837_v62 = vpop.f32.mrb[10].mxu1 }
 0x4bd   : > { %8874 = vst [vmem:[%s12042_s26 + $0x70] sm:$0xff] %v8837_v62  ;;  %v8839_v63 = vpop.f32.mrb[11].mxu1 }
 0x4be   : > { %v8780_v1 = vpop.f32.mrb[8].mxu0  ;;  %8875 = vst [vmem:[%s12042_s26 + $0x78] sm:$0xff] %v8839_v63 }
 0x4bf   : > { %8868 = vst [vmem:[%s12042_s26 + $0x20] sm:$0xff] %v8780_v1  ;;  %v8782_v0 = vpop.f32.mrb[9].mxu0 }
 0x4c0   : > { %8869 = vst [vmem:[%s12042_s26 + $0x28] sm:$0xff] %v8782_v0  ;;  %v8784_v2 = vpop.f32.mrb[10].mxu0 }
 0x4c1   : > { %8872 = vst [vmem:[%s12042_s26 + $0x60] sm:$0xff] %v8784_v2  ;;  %v8786_v3 = vpop.f32.mrb[11].mxu0 }
 0x4c2   : > { %8873 = vst [vmem:[%s12042_s26 + $0x68] sm:$0xff] %v8786_v3  ;;  %v8843_v4 = vpop.f32.mrb[12].mxu1 }
 0x4c3   : > { %8878 = vst [vmem:[%s12042_s26 + $0xb0] sm:$0xff] %v8843_v4  ;;  %v8845_v48 = vpop.f32.mrb[13].mxu1 }
 0x4c4   : > { %8879 = vst [vmem:[%s12042_s26 + $0xb8] sm:$0xff] %v8845_v48  ;;  %v8847_v55 = vpop.f32.mrb[14].mxu1 }
 0x4c5   : > { %8882 = vst [vmem:[%s12042_s26 + $0xf0] sm:$0xff] %v8847_v55  ;;  %v8849_v5 = vpop.f32.mrb[15].mxu1 }
 0x4c6   : > { %v8790_v6 = vpop.f32.mrb[12].mxu0  ;;  %8883 = vst [vmem:[%s12042_s26 + $0xf8] sm:$0xff] %v8849_v5 }
 0x4c7   : > { %8876 = vst [vmem:[%s12042_s26 + $0xa0] sm:$0xff] %v8790_v6  ;;  %v8792_v52 = vpop.f32.mrb[13].mxu0 }
 0x4c8   : > { %8877 = vst [vmem:[%s12042_s26 + $0xa8] sm:$0xff] %v8792_v52  ;;  %v8794_v60 = vpop.f32.mrb[14].mxu0 }
 0x4c9   : > { %8880 = vst [vmem:[%s12042_s26 + $0xe0] sm:$0xff] %v8794_v60  ;;  %v8796_v7 = vpop.f32.mrb[15].mxu0 }
 0x4ca   : > { %8881 = vst [vmem:[%s12042_s26 + $0xe8] sm:$0xff] %v8796_v7 }
 0x4cb   : > { %10574 = shalt.err (!%p10571_p3)
}
 0x4cc   : > { %s10575_s4 = scalar_lea.hbm %s12336_s27, 4096  ;;  %s10579_s6 = scalar_lea.hbm %s12388_s2, 8192 }
 0x4cd   : > { %p10576_p4 = scmp.ne.s32.totalorder %s12336_s27, %s10575_s4  ;;  %p10580_p9 = scmp.lt.u32.totalorder %s12336_s27, %s12388_s2 }
 0x4ce   : > { %p10581_p10 = scmp.lt.u32.totalorder %s10579_s6, %s10575_s4  ;;  %p10583_p12 = scmp.lt.u32.totalorder %s10575_s4, %s12336_s27 }
 0x4cf   : > { %p10577_p7 = pnand %p10576_p4, %p10708_p5 }
 0x4d0   : > { %p10582_p11 = por %p10581_p10, %p10580_p9 }
 0x4d1   : > { %p10578_p8 = pneg %p10577_p7 }
 0x4d2   : > { %p10584_p13 = por %p10583_p12, %p10582_p11 }
 0x4d4   : > { %p10585_p0 = pnand %p10584_p13, %p10578_p8 }
 0x4d6   : > { %10588 = shalt.err (!%p10585_p0)
}
 0x4d7   : > { %s10653_s30 = smov 1024   ;;  %s10654_s7 = smov 64  }
 0x4d8   : > { %10357 = dma.vmem_to_hbm [thread:$0]  (%p10708_p5), %s12338_s3, 4096, %s12336_s27, %s12345_s13, %s10653_s30, %s10653_s30, %s10654_s7  }
 0x4d9 PF: > { %p10363_p1 = scmp.ge.s32.totalorder %s10623_s12, 2  ;;  %s8913_s8 = sand.u32 1, %s10611_s9  }
 0x4da   : > { %s8914_s25 = scalar_lea.sflag [#allocation3], %s8913_s8 }
 0x4db   : > { %p10360_p2 = pnand %p10363_p1, %p10712_p6 }
 0x4dd   : > { %10606 = dma.done.wait (!%p10360_p2), %s8914_s25, 4096  }
 0x4de   : > { %10608 = vsyncadd (!%p10360_p2), %s8914_s25, 4294963200  ;;  %p12_p3 = scmp.ge.s32.totalorder %s10695_s15, 4   ;;  %s12477_s9 = smov %s10615_s10 }
 0x4df   : > { %s12478_s10 = smov %s10619_s11  ;;  %s12479_s11 = smov %s10706_s18 }
 0x4e0   : > { %s12480_s12 = smov %s10695_s15  ;;  %14 = sbr.rel (!%p12_p3) target bundleno = 3 (0x3), region = 89 }
 0x4e7   :  { %8919 = vsyncpa [#allocation3], 1 }
 0x4e8   :  { %8921 = vsyncpa [#allocation3 + $0x1], 1 }

</bundles_post_ra>
